<compile_context>
chip_gen: v5e
topology: v5e:2x2
jax: 0.10.0
libtpu: 0.0.40
codegen_flags: <defaults>
</compile_context>

<pallas_src>
import functools

import jax
import jax.numpy as jnp
from jax.experimental import pallas as pl
from jax.experimental.pallas import tpu as pltpu


def _sigmoid(z):
    # explicit form (exp + divide) to keep the in-kernel lowering trivial
    return 1.0 / (1.0 + jnp.exp(-z))


# ----------------------------------------------------------------------------
# Pallas kernel: fused 3x3 conv (4 gates in one accumulator) + LSTM cell,
# everything channels-major so stores are lane-dense.
# ----------------------------------------------------------------------------
def conv_lstm_cell_kernel(x_ref, w_ref, b_ref, c_ref, h_out_ref, c_out_ref,
                          acc_ref, *, H, W, hidden):
    # x_ref: (Ct, (H+2)*W + 2)  -- [x, h_prev] channels-major, H zero-padded,
    #                              spatial flattened, +1 zero col front/back so
    #                              every tap is a contiguous lane slice.
    # w_ref: (9, 4*hidden, Ct)  -- fused gate weights, gate order [f, i, o, c~]
    # b_ref: (4*hidden, 1)      -- fused conv biases
    # c_ref: (hidden, H*W)      -- c_prev
    # h_out_ref / c_out_ref: (hidden, H*W)
    # acc_ref: VMEM scratch (4*hidden, H*W) f32
    HW = H * W

    # fold the conv bias into the accumulator init (broadcast along lanes)
    acc_ref[...] = jnp.broadcast_to(b_ref[...], acc_ref.shape)

    # column index of each output pixel (lanes are flattened (h, w))
    col = jax.lax.broadcasted_iota(jnp.int32, (1, HW), 1) % W
    not_left = col > 0           # left neighbour is a real pixel
    not_right = col < (W - 1)    # right neighbour is a real pixel

    # 9 shifted taps of the single input block; each tap is one MXU matmul
    # against the fused 4-gate weights.
    for dy in range(3):
        for dx in range(3):
            k = dy * 3 + dx
            tap = x_ref[:, pl.ds(dy * W + dx, HW)]      # (Ct, HW)
            if dx == 0:
                tap = jnp.where(not_left, tap, 0.0)
            elif dx == 2:
                tap = jnp.where(not_right, tap, 0.0)
            acc_ref[...] += jnp.dot(w_ref[k], tap,
                                    preferred_element_type=jnp.float32)

    hd = hidden
    gates = acc_ref[...]                          # (4*hidden, HW), f32
    f_t = _sigmoid(gates[0 * hd:1 * hd, :])
    i_t = _sigmoid(gates[1 * hd:2 * hd, :])
    o_t = _sigmoid(gates[2 * hd:3 * hd, :])
    g_t = jnp.tanh(gates[3 * hd:4 * hd, :])

    c_prev = c_ref[...].astype(jnp.float32)
    c_t = f_t * c_prev + i_t * g_t
    h_t = o_t * jnp.tanh(c_t)

    h_out_ref[...] = h_t.astype(h_out_ref.dtype)
    c_out_ref[...] = c_t.astype(c_out_ref.dtype)


# ----------------------------------------------------------------------------
# Parameter prep: fold the 4 gate convs into one weight / bias (done once)
# ----------------------------------------------------------------------------
def fuse_gate_params(params):
    """(hid,Ct,3,3) x4 + (hid,) x4  ->  (9, 4*hid, Ct) weight, (4*hid, 1) bias.

    Gate order along the fused output dim is [f, i, o, c~] (matches kernel).
    """
    ws, bs = [], []
    for g in ("f", "i", "o", "c"):
        w_pt = params[f"w_{g}"]                       # PyTorch OIHW layout
        hid, ct = w_pt.shape[0], w_pt.shape[1]
        # (hid, Ct, ky, kx) -> (ky, kx, hid, Ct) -> (9, hid, Ct)
        ws.append(jnp.transpose(w_pt, (2, 3, 0, 1)).reshape(9, hid, ct))
        bs.append(params[f"b_{g}"])
    w_all = jnp.concatenate(ws, axis=1)               # (9, 4*hid, Ct)
    b_all = jnp.concatenate(bs, axis=0).reshape(-1, 1).astype(jnp.float32)
    return w_all, b_all


# ----------------------------------------------------------------------------
# Wrapper: layout glue (channel concat, padding, flatten; all NCHW-native,
# i.e. zero transposes) + pallas_call
# ----------------------------------------------------------------------------
def unit_conv_lstm_forward(x, hidden_state, fused_w, fused_b,
                           *, compute_dtype=jnp.float32):
    h_prev, c_prev = hidden_state
    n, cin, hgt, wid = x.shape
    hid = h_prev.shape[1]
    ct = cin + hid
    hw = hgt * wid

    # combined = cat([x, h_prev], channel), kept channels-major (NCHW order)
    comb = jnp.concatenate([x, h_prev], axis=1)              # (N, Ct, H, W)
    # zero-pad H, flatten spatial, add one extra zero column front/back so
    # every 3x3 tap of every output pixel is a contiguous lane slice in-kernel
    comb = jnp.pad(comb, ((0, 0), (0, 0), (1, 1), (0, 0)))   # (N, Ct, H+2, W)
    comb = comb.reshape(n, ct, (hgt + 2) * wid)
    comb = jnp.pad(comb, ((0, 0), (0, 0), (1, 1)))           # (N, Ct, R)
    rows_padded = (hgt + 2) * wid + 2

    comb = comb.astype(compute_dtype)
    w = fused_w.astype(compute_dtype)
    b = fused_b.astype(jnp.float32)
    c_flat = c_prev.reshape(n, hid, hw).astype(jnp.float32)  # free reshape

    itemsize = jnp.dtype(compute_dtype).itemsize
    cost = pl.CostEstimate(
        flops=2 * n * hw * 9 * ct * 4 * hid,
        transcendentals=5 * n * hw * hid,                    # 3 sigmoid + 2 tanh
        bytes_accessed=(comb.size + w.size) * itemsize
                       + (b.size + c_flat.size + 2 * n * hw * hid) * 4)

    kernel = functools.partial(conv_lstm_cell_kernel, H=hgt, W=wid, hidden=hid)
    h_flat, c_out_flat = pl.pallas_call(
        kernel,
        out_shape=(jax.ShapeDtypeStruct((n, hid, hw), jnp.float32),
                   jax.ShapeDtypeStruct((n, hid, hw), jnp.float32)),
        grid_spec=pltpu.PrefetchScalarGridSpec(
            num_scalar_prefetch=0,
            grid=(n,),                                       # one image / step
            in_specs=[
                pl.BlockSpec((None, ct, rows_padded), lambda i: (i, 0, 0)),
                pl.BlockSpec((9, 4 * hid, ct), lambda i: (0, 0, 0)),
                pl.BlockSpec((4 * hid, 1), lambda i: (0, 0)),
                pl.BlockSpec((None, hid, hw), lambda i: (i, 0, 0)),
            ],
            out_specs=[
                pl.BlockSpec((None, hid, hw), lambda i: (i, 0, 0)),
                pl.BlockSpec((None, hid, hw), lambda i: (i, 0, 0)),
            ],
            scratch_shapes=[pltpu.VMEM((4 * hid, hw), jnp.float32)],
        ),
        compiler_params=pltpu.CompilerParams(
            dimension_semantics=("parallel",),
            vmem_limit_bytes=32 * 1024 * 1024),
        cost_estimate=cost,
    )(comb, w, b, c_flat)

    # kernel already emits channels-major -> NCHW is a free reshape
    h_t = h_flat.reshape(n, hid, hgt, wid)
    c_t = c_out_flat.reshape(n, hid, hgt, wid)
    return h_t, (h_t, c_t)      # same structure as the PyTorch module


# ----------------------------------------------------------------------------
# Deterministic parameter construction + pure-JAX reference
# ----------------------------------------------------------------------------
def make_params(key, input_dim, hidden_dim, scale=0.05):
    ct = input_dim + hidden_dim
    keys = jax.random.split(key, 8)
    params = {}
    for idx, g in enumerate(("f", "i", "o", "c")):
        params[f"w_{g}"] = scale * jax.random.normal(
            keys[2 * idx], (hidden_dim, ct, 3, 3), jnp.float32)
        params[f"b_{g}"] = scale * jax.random.normal(
            keys[2 * idx + 1], (hidden_dim,), jnp.float32)
    return params


def reference_forward(x, hidden_state, params):
    h_prev, c_prev = hidden_state
    comb = jnp.concatenate([x, h_prev], axis=1)   # NCHW

    def conv(w, b):
        y = jax.lax.conv_general_dilated(
            comb, w, window_strides=(1, 1), padding=((1, 1), (1, 1)),
            dimension_numbers=("NCHW", "OIHW", "NCHW"))
        return y + b[None, :, None, None]

    f_t = jax.nn.sigmoid(conv(params["w_f"], params["b_f"]))
    i_t = jax.nn.sigmoid(conv(params["w_i"], params["b_i"]))
    o_t = jax.nn.sigmoid(conv(params["w_o"], params["b_o"]))
    g_t = jnp.tanh(conv(params["w_c"], params["b_c"]))
    c_t = f_t * c_prev + i_t * g_t
    h_t = o_t * jnp.tanh(c_t)
    return h_t, (h_t, c_t)


if __name__ == "__main__":
    key = jax.random.PRNGKey(0)
    kx, kh, kc, kp = jax.random.split(key, 4)

    N, CIN, HID, H, W = 2, 4, 32, 16, 16
    x = jax.random.normal(kx, (N, CIN, H, W), jnp.float32)
    h0 = jax.random.normal(kh, (N, HID, H, W), jnp.float32)
    c0 = jax.random.normal(kc, (N, HID, H, W), jnp.float32)

    params = make_params(kp, CIN, HID)
    fused_w, fused_b = fuse_gate_params(params)

    # reference (pure JAX, f32)
    h_ref, (_, c_ref) = reference_forward(x, (h0, c0), params)

    # f32 matmul path (tight check)
    fwd_f32 = jax.jit(functools.partial(unit_conv_lstm_forward,
                                        compute_dtype=jnp.float32))
    h_t, (_, c_t) = fwd_f32(x, (h0, c0), fused_w, fused_b)
    h_t = jax.block_until_ready(h_t)
    c_t = jax.block_until_ready(c_t)
    assert h_t.shape == (N, HID, H, W) and c_t.shape == (N, HID, H, W)
    err = max(float(jnp.max(jnp.abs(h_t - h_ref))),
              float(jnp.max(jnp.abs(c_t - c_ref))))
    assert err < 1e-3, f"f32 mismatch vs reference: {err}"

    # bf16 matmul path (perf mode: bf16 MXU inputs, f32 accumulate/gates)
    fwd_bf16 = jax.jit(functools.partial(unit_conv_lstm_forward,
                                         compute_dtype=jnp.bfloat16))
    h_b, (_, c_b) = fwd_bf16(x, (h0, c0), fused_w, fused_b)
    h_b = jax.block_until_ready(h_b)
    c_b = jax.block_until_ready(c_b)
    err_b = max(float(jnp.max(jnp.abs(h_b - h_ref))),
                float(jnp.max(jnp.abs(c_b - c_ref))))
    assert err_b < 1e-1, f"bf16 mismatch vs reference: {err_b}"

    print("KERNEL_OK")
</pallas_src>

<mosaic_0001>
module attributes {stable_mosaic.version = 11 : i64} {
  func.func @conv_lstm_cell_kernel(%arg0: i32, %arg1: memref<1x36x290xf32, #tpu.memory_space<vmem>>, %arg2: memref<9x128x36xf32, #tpu.memory_space<vmem>>, %arg3: memref<128x1xf32, #tpu.memory_space<vmem>>, %arg4: memref<1x32x256xf32, #tpu.memory_space<vmem>>, %arg5: memref<1x32x256xf32, #tpu.memory_space<vmem>>, %arg6: memref<1x32x256xf32, #tpu.memory_space<vmem>>, %arg7: memref<128x256xf32, #tpu.memory_space<vmem>>) attributes {dimension_semantics = [#tpu.dimension_semantics<parallel>], iteration_bounds = array<i64: 2>, scalar_prefetch = 0 : i64, scratch_operands = 1 : i64, tpu.core_type = #tpu.core_type<tc>, window_params = [{transform_indices = @transform_0, window_bounds = array<i64: 1, 36, 290>}, {pipeline_mode = #tpu.pipeline_mode<synchronous>, transform_indices = @transform_1, window_bounds = array<i64: 9, 128, 36>}, {pipeline_mode = #tpu.pipeline_mode<synchronous>, transform_indices = @transform_2, window_bounds = array<i64: 128, 1>}, {transform_indices = @transform_3, window_bounds = array<i64: 1, 32, 256>}, {transform_indices = @transform_4, window_bounds = array<i64: 1, 32, 256>}, {transform_indices = @transform_5, window_bounds = array<i64: 1, 32, 256>}]} {
    %c0 = arith.constant 0 : index
    %c0_0 = arith.constant 0 : index
    %0 = vector.load %arg3[%c0, %c0_0] : memref<128x1xf32, #tpu.memory_space<vmem>>, vector<128x1xf32>
    %1 = vector.shape_cast %0 : vector<128x1xf32> to vector<128x1xf32>
    %2 = vector.broadcast %1 : vector<128x1xf32> to vector<128x256xf32>
    %c0_1 = arith.constant 0 : index
    %c0_2 = arith.constant 0 : index
    %3 = vector.load %arg7[%c0_1, %c0_2] : memref<128x256xf32, #tpu.memory_space<vmem>>, vector<128x256xf32>
    tpu.vector_store %arg7[%c0_1, %c0_2], %2 {strides = array<i32>} : memref<128x256xf32, #tpu.memory_space<vmem>>, vector<128x256xf32>,
    %4 = tpu.iota {dimensions = array<i32: 1>} : vector<1x256xi32>
    %c16_i32 = arith.constant 16 : i32
    %c0_i32 = arith.constant 0 : i32
    %5 = arith.cmpi eq, %c16_i32, %c0_i32 : i32
    %c1_i32 = arith.constant 1 : i32
    %6 = arith.select %5, %c1_i32, %c16_i32 : i32
    %7 = vector.broadcast %6 : i32 to vector<1x256xi32>
    %8 = arith.remsi %4, %7 : vector<1x256xi32>
    %c0_i32_3 = arith.constant 0 : i32
    %9 = vector.broadcast %c0_i32_3 : i32 to vector<1x256xi32>
    %10 = arith.cmpi ne, %8, %9 : vector<1x256xi32>
    %c0_i32_4 = arith.constant 0 : i32
    %11 = vector.broadcast %c0_i32_4 : i32 to vector<1x256xi32>
    %12 = arith.cmpi slt, %8, %11 : vector<1x256xi32>
    %c0_i32_5 = arith.constant 0 : i32
    %13 = arith.cmpi slt, %6, %c0_i32_5 : i32
    %14 = vector.broadcast %13 : i1 to vector<1x256xi1>
    %15 = vector.broadcast %14 : vector<1x256xi1> to vector<1x256xi1>
    %16 = arith.xori %12, %15 : vector<1x256xi1>
    %17 = arith.andi %16, %10 : vector<1x256xi1>
    %18 = vector.broadcast %6 : i32 to vector<1x256xi32>
    %19 = arith.addi %8, %18 : vector<1x256xi32>
    %20 = arith.select %17, %19, %8 : vector<1x256xi1>, vector<1x256xi32>
    %c0_i32_6 = arith.constant 0 : i32
    %21 = vector.broadcast %c0_i32_6 : i32 to vector<1x256xi32>
    %22 = arith.cmpi sgt, %20, %21 : vector<1x256xi32>
    %c15_i32 = arith.constant 15 : i32
    %23 = vector.broadcast %c15_i32 : i32 to vector<1x256xi32>
    %24 = arith.cmpi slt, %20, %23 : vector<1x256xi32>
    %c0_7 = arith.constant 0 : index
    %c0_8 = arith.constant 0 : index
    %c0_9 = arith.constant 0 : index
    %25 = vector.load %arg1[%c0_7, %c0_8, %c0_9] : memref<1x36x290xf32, #tpu.memory_space<vmem>>, vector<1x36x256xf32>
    %26 = vector.shape_cast %25 : vector<1x36x256xf32> to vector<36x256xf32>
    %cst = arith.constant 0.000000e+00 : f32
    %27 = vector.shape_cast %22 : vector<1x256xi1> to vector<1x256xi1>
    %28 = vector.broadcast %27 : vector<1x256xi1> to vector<36x256xi1>
    %29 = vector.broadcast %cst : f32 to vector<36x256xf32>
    %30 = arith.select %28, %26, %29 : vector<36x256xi1>, vector<36x256xf32>
    %c0_10 = arith.constant 0 : index
    %c0_11 = arith.constant 0 : index
    %31 = vector.load %arg7[%c0_10, %c0_11] : memref<128x256xf32, #tpu.memory_space<vmem>>, vector<128x256xf32>
    %c0_12 = arith.constant 0 : index
    %c0_13 = arith.constant 0 : index
    %c0_14 = arith.constant 0 : index
    %32 = vector.load %arg2[%c0_12, %c0_13, %c0_14] : memref<9x128x36xf32, #tpu.memory_space<vmem>>, vector<1x128x36xf32>
    %33 = vector.shape_cast %32 : vector<1x128x36xf32> to vector<128x36xf32>
    %cst_15 = arith.constant dense<0.000000e+00> : vector<128x256xf32>
    %34 = tpu.matmul %33, %30, %cst_15 {dimension_numbers = #tpu.dot_dimension_numbers<[1], [0], [0], [1], [0, 0, 1, 1], [], []>} : vector<128x36xf32>, vector<36x256xf32>, vector<128x256xf32> -> vector<128x256xf32>
    %35 = arith.addf %31, %34 : vector<128x256xf32>
    %c0_16 = arith.constant 0 : index
    %c0_17 = arith.constant 0 : index
    %36 = vector.load %arg7[%c0_16, %c0_17] : memref<128x256xf32, #tpu.memory_space<vmem>>, vector<128x256xf32>
    tpu.vector_store %arg7[%c0_16, %c0_17], %35 {strides = array<i32>} : memref<128x256xf32, #tpu.memory_space<vmem>>, vector<128x256xf32>,
    %c0_18 = arith.constant 0 : index
    %c0_19 = arith.constant 0 : index
    %c1 = arith.constant 1 : index
    %37 = vector.load %arg1[%c0_18, %c0_19, %c1] : memref<1x36x290xf32, #tpu.memory_space<vmem>>, vector<1x36x256xf32>
    %38 = vector.shape_cast %37 : vector<1x36x256xf32> to vector<36x256xf32>
    %c0_20 = arith.constant 0 : index
    %c0_21 = arith.constant 0 : index
    %39 = vector.load %arg7[%c0_20, %c0_21] : memref<128x256xf32, #tpu.memory_space<vmem>>, vector<128x256xf32>
    %c1_22 = arith.constant 1 : index
    %c0_23 = arith.constant 0 : index
    %c0_24 = arith.constant 0 : index
    %40 = vector.load %arg2[%c1_22, %c0_23, %c0_24] : memref<9x128x36xf32, #tpu.memory_space<vmem>>, vector<1x128x36xf32>
    %41 = vector.shape_cast %40 : vector<1x128x36xf32> to vector<128x36xf32>
    %cst_25 = arith.constant dense<0.000000e+00> : vector<128x256xf32>
    %42 = tpu.matmul %41, %38, %cst_25 {dimension_numbers = #tpu.dot_dimension_numbers<[1], [0], [0], [1], [0, 0, 1, 1], [], []>} : vector<128x36xf32>, vector<36x256xf32>, vector<128x256xf32> -> vector<128x256xf32>
    %43 = arith.addf %39, %42 : vector<128x256xf32>
    %c0_26 = arith.constant 0 : index
    %c0_27 = arith.constant 0 : index
    %44 = vector.load %arg7[%c0_26, %c0_27] : memref<128x256xf32, #tpu.memory_space<vmem>>, vector<128x256xf32>
    tpu.vector_store %arg7[%c0_26, %c0_27], %43 {strides = array<i32>} : memref<128x256xf32, #tpu.memory_space<vmem>>, vector<128x256xf32>,
    %c0_28 = arith.constant 0 : index
    %c0_29 = arith.constant 0 : index
    %c2 = arith.constant 2 : index
    %45 = vector.load %arg1[%c0_28, %c0_29, %c2] : memref<1x36x290xf32, #tpu.memory_space<vmem>>, vector<1x36x256xf32>
    %46 = vector.shape_cast %45 : vector<1x36x256xf32> to vector<36x256xf32>
    %cst_30 = arith.constant 0.000000e+00 : f32
    %47 = vector.shape_cast %24 : vector<1x256xi1> to vector<1x256xi1>
    %48 = vector.broadcast %47 : vector<1x256xi1> to vector<36x256xi1>
    %49 = vector.broadcast %cst_30 : f32 to vector<36x256xf32>
    %50 = arith.select %48, %46, %49 : vector<36x256xi1>, vector<36x256xf32>
    %c0_31 = arith.constant 0 : index
    %c0_32 = arith.constant 0 : index
    %51 = vector.load %arg7[%c0_31, %c0_32] : memref<128x256xf32, #tpu.memory_space<vmem>>, vector<128x256xf32>
    %c2_33 = arith.constant 2 : index
    %c0_34 = arith.constant 0 : index
    %c0_35 = arith.constant 0 : index
    %52 = vector.load %arg2[%c2_33, %c0_34, %c0_35] : memref<9x128x36xf32, #tpu.memory_space<vmem>>, vector<1x128x36xf32>
    %53 = vector.shape_cast %52 : vector<1x128x36xf32> to vector<128x36xf32>
    %cst_36 = arith.constant dense<0.000000e+00> : vector<128x256xf32>
    %54 = tpu.matmul %53, %50, %cst_36 {dimension_numbers = #tpu.dot_dimension_numbers<[1], [0], [0], [1], [0, 0, 1, 1], [], []>} : vector<128x36xf32>, vector<36x256xf32>, vector<128x256xf32> -> vector<128x256xf32>
    %55 = arith.addf %51, %54 : vector<128x256xf32>
    %c0_37 = arith.constant 0 : index
    %c0_38 = arith.constant 0 : index
    %56 = vector.load %arg7[%c0_37, %c0_38] : memref<128x256xf32, #tpu.memory_space<vmem>>, vector<128x256xf32>
    tpu.vector_store %arg7[%c0_37, %c0_38], %55 {strides = array<i32>} : memref<128x256xf32, #tpu.memory_space<vmem>>, vector<128x256xf32>,
    %c0_39 = arith.constant 0 : index
    %c0_40 = arith.constant 0 : index
    %c16 = arith.constant 16 : index
    %57 = vector.load %arg1[%c0_39, %c0_40, %c16] : memref<1x36x290xf32, #tpu.memory_space<vmem>>, vector<1x36x256xf32>
    %58 = vector.shape_cast %57 : vector<1x36x256xf32> to vector<36x256xf32>
    %cst_41 = arith.constant 0.000000e+00 : f32
    %59 = vector.shape_cast %22 : vector<1x256xi1> to vector<1x256xi1>
    %60 = vector.broadcast %59 : vector<1x256xi1> to vector<36x256xi1>
    %61 = vector.broadcast %cst_41 : f32 to vector<36x256xf32>
    %62 = arith.select %60, %58, %61 : vector<36x256xi1>, vector<36x256xf32>
    %c0_42 = arith.constant 0 : index
    %c0_43 = arith.constant 0 : index
    %63 = vector.load %arg7[%c0_42, %c0_43] : memref<128x256xf32, #tpu.memory_space<vmem>>, vector<128x256xf32>
    %c3 = arith.constant 3 : index
    %c0_44 = arith.constant 0 : index
    %c0_45 = arith.constant 0 : index
    %64 = vector.load %arg2[%c3, %c0_44, %c0_45] : memref<9x128x36xf32, #tpu.memory_space<vmem>>, vector<1x128x36xf32>
    %65 = vector.shape_cast %64 : vector<1x128x36xf32> to vector<128x36xf32>
    %cst_46 = arith.constant dense<0.000000e+00> : vector<128x256xf32>
    %66 = tpu.matmul %65, %62, %cst_46 {dimension_numbers = #tpu.dot_dimension_numbers<[1], [0], [0], [1], [0, 0, 1, 1], [], []>} : vector<128x36xf32>, vector<36x256xf32>, vector<128x256xf32> -> vector<128x256xf32>
    %67 = arith.addf %63, %66 : vector<128x256xf32>
    %c0_47 = arith.constant 0 : index
    %c0_48 = arith.constant 0 : index
    %68 = vector.load %arg7[%c0_47, %c0_48] : memref<128x256xf32, #tpu.memory_space<vmem>>, vector<128x256xf32>
    tpu.vector_store %arg7[%c0_47, %c0_48], %67 {strides = array<i32>} : memref<128x256xf32, #tpu.memory_space<vmem>>, vector<128x256xf32>,
    %c0_49 = arith.constant 0 : index
    %c0_50 = arith.constant 0 : index
    %c17 = arith.constant 17 : index
    %69 = vector.load %arg1[%c0_49, %c0_50, %c17] : memref<1x36x290xf32, #tpu.memory_space<vmem>>, vector<1x36x256xf32>
    %70 = vector.shape_cast %69 : vector<1x36x256xf32> to vector<36x256xf32>
    %c0_51 = arith.constant 0 : index
    %c0_52 = arith.constant 0 : index
    %71 = vector.load %arg7[%c0_51, %c0_52] : memref<128x256xf32, #tpu.memory_space<vmem>>, vector<128x256xf32>
    %c4 = arith.constant 4 : index
    %c0_53 = arith.constant 0 : index
    %c0_54 = arith.constant 0 : index
    %72 = vector.load %arg2[%c4, %c0_53, %c0_54] : memref<9x128x36xf32, #tpu.memory_space<vmem>>, vector<1x128x36xf32>
    %73 = vector.shape_cast %72 : vector<1x128x36xf32> to vector<128x36xf32>
    %cst_55 = arith.constant dense<0.000000e+00> : vector<128x256xf32>
    %74 = tpu.matmul %73, %70, %cst_55 {dimension_numbers = #tpu.dot_dimension_numbers<[1], [0], [0], [1], [0, 0, 1, 1], [], []>} : vector<128x36xf32>, vector<36x256xf32>, vector<128x256xf32> -> vector<128x256xf32>
    %75 = arith.addf %71, %74 : vector<128x256xf32>
    %c0_56 = arith.constant 0 : index
    %c0_57 = arith.constant 0 : index
    %76 = vector.load %arg7[%c0_56, %c0_57] : memref<128x256xf32, #tpu.memory_space<vmem>>, vector<128x256xf32>
    tpu.vector_store %arg7[%c0_56, %c0_57], %75 {strides = array<i32>} : memref<128x256xf32, #tpu.memory_space<vmem>>, vector<128x256xf32>,
    %c0_58 = arith.constant 0 : index
    %c0_59 = arith.constant 0 : index
    %c18 = arith.constant 18 : index
    %77 = vector.load %arg1[%c0_58, %c0_59, %c18] : memref<1x36x290xf32, #tpu.memory_space<vmem>>, vector<1x36x256xf32>
    %78 = vector.shape_cast %77 : vector<1x36x256xf32> to vector<36x256xf32>
    %cst_60 = arith.constant 0.000000e+00 : f32
    %79 = vector.shape_cast %24 : vector<1x256xi1> to vector<1x256xi1>
    %80 = vector.broadcast %79 : vector<1x256xi1> to vector<36x256xi1>
    %81 = vector.broadcast %cst_60 : f32 to vector<36x256xf32>
    %82 = arith.select %80, %78, %81 : vector<36x256xi1>, vector<36x256xf32>
    %c0_61 = arith.constant 0 : index
    %c0_62 = arith.constant 0 : index
    %83 = vector.load %arg7[%c0_61, %c0_62] : memref<128x256xf32, #tpu.memory_space<vmem>>, vector<128x256xf32>
    %c5 = arith.constant 5 : index
    %c0_63 = arith.constant 0 : index
    %c0_64 = arith.constant 0 : index
    %84 = vector.load %arg2[%c5, %c0_63, %c0_64] : memref<9x128x36xf32, #tpu.memory_space<vmem>>, vector<1x128x36xf32>
    %85 = vector.shape_cast %84 : vector<1x128x36xf32> to vector<128x36xf32>
    %cst_65 = arith.constant dense<0.000000e+00> : vector<128x256xf32>
    %86 = tpu.matmul %85, %82, %cst_65 {dimension_numbers = #tpu.dot_dimension_numbers<[1], [0], [0], [1], [0, 0, 1, 1], [], []>} : vector<128x36xf32>, vector<36x256xf32>, vector<128x256xf32> -> vector<128x256xf32>
    %87 = arith.addf %83, %86 : vector<128x256xf32>
    %c0_66 = arith.constant 0 : index
    %c0_67 = arith.constant 0 : index
    %88 = vector.load %arg7[%c0_66, %c0_67] : memref<128x256xf32, #tpu.memory_space<vmem>>, vector<128x256xf32>
    tpu.vector_store %arg7[%c0_66, %c0_67], %87 {strides = array<i32>} : memref<128x256xf32, #tpu.memory_space<vmem>>, vector<128x256xf32>,
    %c0_68 = arith.constant 0 : index
    %c0_69 = arith.constant 0 : index
    %c32 = arith.constant 32 : index
    %89 = vector.load %arg1[%c0_68, %c0_69, %c32] : memref<1x36x290xf32, #tpu.memory_space<vmem>>, vector<1x36x256xf32>
    %90 = vector.shape_cast %89 : vector<1x36x256xf32> to vector<36x256xf32>
    %cst_70 = arith.constant 0.000000e+00 : f32
    %91 = vector.shape_cast %22 : vector<1x256xi1> to vector<1x256xi1>
    %92 = vector.broadcast %91 : vector<1x256xi1> to vector<36x256xi1>
    %93 = vector.broadcast %cst_70 : f32 to vector<36x256xf32>
    %94 = arith.select %92, %90, %93 : vector<36x256xi1>, vector<36x256xf32>
    %c0_71 = arith.constant 0 : index
    %c0_72 = arith.constant 0 : index
    %95 = vector.load %arg7[%c0_71, %c0_72] : memref<128x256xf32, #tpu.memory_space<vmem>>, vector<128x256xf32>
    %c6 = arith.constant 6 : index
    %c0_73 = arith.constant 0 : index
    %c0_74 = arith.constant 0 : index
    %96 = vector.load %arg2[%c6, %c0_73, %c0_74] : memref<9x128x36xf32, #tpu.memory_space<vmem>>, vector<1x128x36xf32>
    %97 = vector.shape_cast %96 : vector<1x128x36xf32> to vector<128x36xf32>
    %cst_75 = arith.constant dense<0.000000e+00> : vector<128x256xf32>
    %98 = tpu.matmul %97, %94, %cst_75 {dimension_numbers = #tpu.dot_dimension_numbers<[1], [0], [0], [1], [0, 0, 1, 1], [], []>} : vector<128x36xf32>, vector<36x256xf32>, vector<128x256xf32> -> vector<128x256xf32>
    %99 = arith.addf %95, %98 : vector<128x256xf32>
    %c0_76 = arith.constant 0 : index
    %c0_77 = arith.constant 0 : index
    %100 = vector.load %arg7[%c0_76, %c0_77] : memref<128x256xf32, #tpu.memory_space<vmem>>, vector<128x256xf32>
    tpu.vector_store %arg7[%c0_76, %c0_77], %99 {strides = array<i32>} : memref<128x256xf32, #tpu.memory_space<vmem>>, vector<128x256xf32>,
    %c0_78 = arith.constant 0 : index
    %c0_79 = arith.constant 0 : index
    %c33 = arith.constant 33 : index
    %101 = vector.load %arg1[%c0_78, %c0_79, %c33] : memref<1x36x290xf32, #tpu.memory_space<vmem>>, vector<1x36x256xf32>
    %102 = vector.shape_cast %101 : vector<1x36x256xf32> to vector<36x256xf32>
    %c0_80 = arith.constant 0 : index
    %c0_81 = arith.constant 0 : index
    %103 = vector.load %arg7[%c0_80, %c0_81] : memref<128x256xf32, #tpu.memory_space<vmem>>, vector<128x256xf32>
    %c7 = arith.constant 7 : index
    %c0_82 = arith.constant 0 : index
    %c0_83 = arith.constant 0 : index
    %104 = vector.load %arg2[%c7, %c0_82, %c0_83] : memref<9x128x36xf32, #tpu.memory_space<vmem>>, vector<1x128x36xf32>
    %105 = vector.shape_cast %104 : vector<1x128x36xf32> to vector<128x36xf32>
    %cst_84 = arith.constant dense<0.000000e+00> : vector<128x256xf32>
    %106 = tpu.matmul %105, %102, %cst_84 {dimension_numbers = #tpu.dot_dimension_numbers<[1], [0], [0], [1], [0, 0, 1, 1], [], []>} : vector<128x36xf32>, vector<36x256xf32>, vector<128x256xf32> -> vector<128x256xf32>
    %107 = arith.addf %103, %106 : vector<128x256xf32>
    %c0_85 = arith.constant 0 : index
    %c0_86 = arith.constant 0 : index
    %108 = vector.load %arg7[%c0_85, %c0_86] : memref<128x256xf32, #tpu.memory_space<vmem>>, vector<128x256xf32>
    tpu.vector_store %arg7[%c0_85, %c0_86], %107 {strides = array<i32>} : memref<128x256xf32, #tpu.memory_space<vmem>>, vector<128x256xf32>,
    %c0_87 = arith.constant 0 : index
    %c0_88 = arith.constant 0 : index
    %c34 = arith.constant 34 : index
    %109 = vector.load %arg1[%c0_87, %c0_88, %c34] : memref<1x36x290xf32, #tpu.memory_space<vmem>>, vector<1x36x256xf32>
    %110 = vector.shape_cast %109 : vector<1x36x256xf32> to vector<36x256xf32>
    %cst_89 = arith.constant 0.000000e+00 : f32
    %111 = vector.shape_cast %24 : vector<1x256xi1> to vector<1x256xi1>
    %112 = vector.broadcast %111 : vector<1x256xi1> to vector<36x256xi1>
    %113 = vector.broadcast %cst_89 : f32 to vector<36x256xf32>
    %114 = arith.select %112, %110, %113 : vector<36x256xi1>, vector<36x256xf32>
    %c0_90 = arith.constant 0 : index
    %c0_91 = arith.constant 0 : index
    %115 = vector.load %arg7[%c0_90, %c0_91] : memref<128x256xf32, #tpu.memory_space<vmem>>, vector<128x256xf32>
    %c8 = arith.constant 8 : index
    %c0_92 = arith.constant 0 : index
    %c0_93 = arith.constant 0 : index
    %116 = vector.load %arg2[%c8, %c0_92, %c0_93] : memref<9x128x36xf32, #tpu.memory_space<vmem>>, vector<1x128x36xf32>
    %117 = vector.shape_cast %116 : vector<1x128x36xf32> to vector<128x36xf32>
    %cst_94 = arith.constant dense<0.000000e+00> : vector<128x256xf32>
    %118 = tpu.matmul %117, %114, %cst_94 {dimension_numbers = #tpu.dot_dimension_numbers<[1], [0], [0], [1], [0, 0, 1, 1], [], []>} : vector<128x36xf32>, vector<36x256xf32>, vector<128x256xf32> -> vector<128x256xf32>
    %119 = arith.addf %115, %118 : vector<128x256xf32>
    %c0_95 = arith.constant 0 : index
    %c0_96 = arith.constant 0 : index
    %120 = vector.load %arg7[%c0_95, %c0_96] : memref<128x256xf32, #tpu.memory_space<vmem>>, vector<128x256xf32>
    tpu.vector_store %arg7[%c0_95, %c0_96], %119 {strides = array<i32>} : memref<128x256xf32, #tpu.memory_space<vmem>>, vector<128x256xf32>,
    %c0_97 = arith.constant 0 : index
    %c0_98 = arith.constant 0 : index
    %121 = vector.load %arg7[%c0_97, %c0_98] : memref<128x256xf32, #tpu.memory_space<vmem>>, vector<128x256xf32>
    %122 = vector.extract_strided_slice %121 {offsets = [0, 0], sizes = [32, 256], strides = [1, 1]} : vector<128x256xf32> to vector<32x256xf32>
    %cst_99 = arith.constant 0.000000e+00 : f32
    %123 = vector.broadcast %cst_99 : f32 to vector<32x256xf32>
    %124 = arith.subf %123, %122 : vector<32x256xf32>
    %125 = math.exp %124 : vector<32x256xf32>
    %cst_100 = arith.constant 1.000000e+00 : f32
    %126 = vector.broadcast %cst_100 : f32 to vector<32x256xf32>
    %127 = arith.addf %126, %125 : vector<32x256xf32>
    %cst_101 = arith.constant 1.000000e+00 : f32
    %128 = vector.broadcast %cst_101 : f32 to vector<32x256xf32>
    %129 = arith.divf %128, %127 : vector<32x256xf32>
    %130 = vector.extract_strided_slice %121 {offsets = [32, 0], sizes = [32, 256], strides = [1, 1]} : vector<128x256xf32> to vector<32x256xf32>
    %cst_102 = arith.constant 0.000000e+00 : f32
    %131 = vector.broadcast %cst_102 : f32 to vector<32x256xf32>
    %132 = arith.subf %131, %130 : vector<32x256xf32>
    %133 = math.exp %132 : vector<32x256xf32>
    %cst_103 = arith.constant 1.000000e+00 : f32
    %134 = vector.broadcast %cst_103 : f32 to vector<32x256xf32>
    %135 = arith.addf %134, %133 : vector<32x256xf32>
    %cst_104 = arith.constant 1.000000e+00 : f32
    %136 = vector.broadcast %cst_104 : f32 to vector<32x256xf32>
    %137 = arith.divf %136, %135 : vector<32x256xf32>
    %138 = vector.extract_strided_slice %121 {offsets = [64, 0], sizes = [32, 256], strides = [1, 1]} : vector<128x256xf32> to vector<32x256xf32>
    %cst_105 = arith.constant 0.000000e+00 : f32
    %139 = vector.broadcast %cst_105 : f32 to vector<32x256xf32>
    %140 = arith.subf %139, %138 : vector<32x256xf32>
    %141 = math.exp %140 : vector<32x256xf32>
    %cst_106 = arith.constant 1.000000e+00 : f32
    %142 = vector.broadcast %cst_106 : f32 to vector<32x256xf32>
    %143 = arith.addf %142, %141 : vector<32x256xf32>
    %cst_107 = arith.constant 1.000000e+00 : f32
    %144 = vector.broadcast %cst_107 : f32 to vector<32x256xf32>
    %145 = arith.divf %144, %143 : vector<32x256xf32>
    %146 = vector.extract_strided_slice %121 {offsets = [96, 0], sizes = [32, 256], strides = [1, 1]} : vector<128x256xf32> to vector<32x256xf32>
    %147 = math.tanh %146 : vector<32x256xf32>
    %c0_108 = arith.constant 0 : index
    %c0_109 = arith.constant 0 : index
    %c0_110 = arith.constant 0 : index
    %148 = vector.load %arg4[%c0_108, %c0_109, %c0_110] : memref<1x32x256xf32, #tpu.memory_space<vmem>>, vector<1x32x256xf32>
    %149 = vector.shape_cast %148 : vector<1x32x256xf32> to vector<32x256xf32>
    %150 = arith.mulf %129, %149 : vector<32x256xf32>
    %151 = arith.mulf %137, %147 : vector<32x256xf32>
    %152 = arith.addf %150, %151 : vector<32x256xf32>
    %153 = math.tanh %152 : vector<32x256xf32>
    %154 = arith.mulf %145, %153 : vector<32x256xf32>
    %c0_111 = arith.constant 0 : index
    %c0_112 = arith.constant 0 : index
    %c0_113 = arith.constant 0 : index
    %155 = vector.load %arg5[%c0_111, %c0_112, %c0_113] : memref<1x32x256xf32, #tpu.memory_space<vmem>>, vector<1x32x256xf32>
    %156 = vector.shape_cast %155 : vector<1x32x256xf32> to vector<32x256xf32>
    %157 = vector.shape_cast %154 : vector<32x256xf32> to vector<1x32x256xf32>
    tpu.vector_store %arg5[%c0_111, %c0_112, %c0_113], %157 {strides = array<i32>} : memref<1x32x256xf32, #tpu.memory_space<vmem>>, vector<1x32x256xf32>,
    %c0_114 = arith.constant 0 : index
    %c0_115 = arith.constant 0 : index
    %c0_116 = arith.constant 0 : index
    %158 = vector.load %arg6[%c0_114, %c0_115, %c0_116] : memref<1x32x256xf32, #tpu.memory_space<vmem>>, vector<1x32x256xf32>
    %159 = vector.shape_cast %158 : vector<1x32x256xf32> to vector<32x256xf32>
    %160 = vector.shape_cast %152 : vector<32x256xf32> to vector<1x32x256xf32>
    tpu.vector_store %arg6[%c0_114, %c0_115, %c0_116], %160 {strides = array<i32>} : memref<1x32x256xf32, #tpu.memory_space<vmem>>, vector<1x32x256xf32>,
    return
  }
  func.func @transform_0(%arg0: i32) -> (i32, i32, i32) {
    %c0_i32 = arith.constant 0 : i32
    %c0_i32_0 = arith.constant 0 : i32
    %c0_i32_1 = arith.constant 0 : i32
    return %arg0, %c0_i32, %c0_i32_0 : i32, i32, i32
  }
  func.func @transform_1(%arg0: i32) -> (i32, i32, i32) {
    %c0_i32 = arith.constant 0 : i32
    %c0_i32_0 = arith.constant 0 : i32
    %c0_i32_1 = arith.constant 0 : i32
    %c0_i32_2 = arith.constant 0 : i32
    return %c0_i32, %c0_i32_0, %c0_i32_1 : i32, i32, i32
  }
  func.func @transform_2(%arg0: i32) -> (i32, i32) {
    %c0_i32 = arith.constant 0 : i32
    %c0_i32_0 = arith.constant 0 : i32
    %c0_i32_1 = arith.constant 0 : i32
    return %c0_i32, %c0_i32_0 : i32, i32
  }
  func.func @transform_3(%arg0: i32) -> (i32, i32, i32) {
    %c0_i32 = arith.constant 0 : i32
    %c0_i32_0 = arith.constant 0 : i32
    %c0_i32_1 = arith.constant 0 : i32
    return %arg0, %c0_i32, %c0_i32_0 : i32, i32, i32
  }
  func.func @transform_4(%arg0: i32) -> (i32, i32, i32) {
    %c0_i32 = arith.constant 0 : i32
    %c0_i32_0 = arith.constant 0 : i32
    %c0_i32_1 = arith.constant 0 : i32
    return %arg0, %c0_i32, %c0_i32_0 : i32, i32, i32
  }
  func.func @transform_5(%arg0: i32) -> (i32, i32, i32) {
    %c0_i32 = arith.constant 0 : i32
    %c0_i32_0 = arith.constant 0 : i32
    %c0_i32_1 = arith.constant 0 : i32
    return %arg0, %c0_i32, %c0_i32_0 : i32, i32, i32
  }
}

</mosaic_0001>

<bundles_post_ra>
// kernel: unit_conv_lstm_forward.1
= control target key start
LH: loop header
LB: loop body
LE: loop exit
PB: predicated region body
PF: predicated region fallthrough
CT: control target
= control target key end

     0   :  { %s5260_s18 = smov 0   ;;  %s8233_s0 = inlined_call_operand.vmem [shape: f32[2,36,290], index: 0, kind: input, shape index: {}]   ;;  %s8234_s1 = inlined_call_operand.vmem [shape: f32[9,128,36], index: 1, kind: input, shape index: {}]   ;;  %s8235_s2 = inlined_call_operand.vmem [shape: f32[128,1], index: 2, kind: input, shape index: {}]   ;;  %s8236_s3 = inlined_call_operand.vmem [shape: f32[2,32,256], index: 3, kind: input, shape index: {}]   ;;  %s8237_s4 = inlined_call_operand.vmem [shape: f32[2,32,256], index: 4, kind: output, shape index: {0}]   ;;  %s8238_s5 = inlined_call_operand.vmem [shape: f32[2,32,256], index: 5, kind: output, shape index: {1}]  }
   0x1 LB: > { %s4465_s19 = sadd.s32 4294967295, %s5219_s18   ;;  %p4469_p0 = scmp.ge.s32.totalorder %s5219_s18, 1  ;;  %s5219_s18 = sphi %s5260_s18, %s16_s18  }
   0x2   : > { %p200_p1 = scmp.lt.s32.totalorder %s5219_s18, 3 }
   0x4   : > { %p201_p2 = pnand %p4469_p0, %p200_p1 }
   0x6   : > { %204 = sbr.rel (%p201_p2) target bundleno = 860 (0x35c), region = 36 }
   0xb   : > { %p238_p3 = scmp.lt.s32.totalorder %s4465_s19, 1  ;;  %s5221_s24 = smov 127   ;;  %v386_v24 = vlaneseq  ;;  %vm538_vm2 = vcmask 1043456   ;;  %v481_v35 = vld [vmem:[%s8234_s1 + $0x40] sm:$0xff]  ;;  %vm489_vm3 = vcmask 293888   ;;  %v482_v36 = vld [vmem:[%s8234_s1 + $0x48] sm:$0xff] }
   0xc   : > { %s5222_s25 = smov 126   ;;  %v483_v37 = vld [vmem:[%s8234_s1 + $0x50] sm:$0xff]  ;;  %s5223_s7 = smov 112   ;;  %v484_v41 = vld [vmem:[%s8234_s1 + $0x58] sm:$0xff]  ;;  %v485_v42 = vld [vmem:[%s8234_s1 + $0x60] sm:$0xff]  ;;  %vm848_vm4 = vcmask 1039360  }
   0xd   : > { %s8474_s19 = smov (!%p238_p3, %s4465_s19), 1  ;;  %v5358_v25 = vand.u32 127, %v386_v24  ;;  %v473_v43 = vld [vmem:[%s8234_s1] sm:$0xff]  ;;  %v486_v44 = vld [vmem:[%s8234_s1 + $0x68] sm:$0xff]  ;;  %v487_v46 = vld [vmem:[%s8234_s1 + $0x70] sm:$0xff]  ;;  %s5224_s29 = smov 111  }
   0xe   : > { %s4974_s20 = smul.u32 120, %s8474_s19  ;;  %v474_v45 = vld [vmem:[%s8234_s1 + $0x8] sm:$0xff]  ;;  %v475_v48 = vld [vmem:[%s8234_s1 + $0x10] sm:$0xff]  ;;  %v488_v49 = vld [vmem:[%s8234_s1 + $0x78] sm:$0xff]  ;;  %s5225_s11 = smov 110   ;;  %vm1177_vm5 = vcmask 1031168  }
   0xf   : > { %v5363_v26 = vadd.s32 128, %v5358_v25  ;;  %v393_v27 = vand.u32 15, %v5358_v25  ;;  %v476_v53 = vld [vmem:[%s8234_s1 + $0x18] sm:$0xff]  ;;  %v477_v56 = vld [vmem:[%s8234_s1 + $0x20] sm:$0xff]  ;;  %v478_v60 = vld [vmem:[%s8234_s1 + $0x28] sm:$0xff]  ;;  %vm1565_vm8 = vcmask 916480  }
  0x10   : > { %s5274_s23 = scalar_lea.vmem %s8233_s0, %s4974_s20  ;;  %s5227_s26 = smov 95   ;;  %vm2002_vm9 = vcmask 908288   ;;  %vm2327_vm10 = vcmask 900096   ;;  %vm2715_vm11 = vcmask 785408   ;;  %vm3152_vm12 = vcmask 777216  }
  0x11   : > { %v753_v0 = vld [vmem:[%s5274_s23 + $0x70] sm:$0xf]  ;;  %v751_v1 = vld [vmem:[%s5274_s23 + $0x60] sm:$0xf]  ;;  %v5284_v3 = vld [vmem:[%s5274_s23 + $0x58] sm:$0xff]  ;;  %v400_v28 = vand.u32 15, %v5363_v26 }
  0x12   : > { %v5279_v2 = vld [vmem:[%s5274_s23 + $0x30] sm:$0xff]  ;;  %846 = vrot.lane.b32.xlu1 %v753_v0, %s5221_s24  ;;  %842 = vrot.lane.b32.xlu0 %v751_v1, %s5221_s24  ;;  %v5291_v5 = vld [vmem:[%s5274_s23 + $0x48] sm:$0xff]  ;;  %vm5369_vm0 = vcmp.gt.s32.totalorder %v393_v27, 0  ;;  %vm5615_vm6 = vcmp.lt.s32.totalorder %v393_v27, 15  ;;  %s5228_s12 = smov 94   ;;  %vm3477_vm13 = vcmask 769024  }
  0x13   : > { %v5288_v4 = vpack.i.bf16 %v5279_v2, %v5284_v3  ;;  %v5294_v6 = vld [vmem:[%s5274_s23 + $0x50] sm:$0xff]  ;;  %v5303_v8 = vld [vmem:[%s5274_s23 + $0x38] sm:$0xff]  ;;  %v5306_v9 = vld [vmem:[%s5274_s23 + $0x40] sm:$0xff]  ;;  %vm5376_vm1 = vcmp.gt.s32.totalorder %v400_v28, 0  ;;  %vm5621_vm7 = vcmp.lt.s32.totalorder %v400_v28, 15  ;;  %s7436_s9 = sshll.u32 %s8474_s19, 6 }
  0x14   : > { %v5300_v7 = vpack.i.bf16 %v5294_v6, %v5291_v5  ;;  %v752_v10 = vld [vmem:[%s5274_s23 + $0x68] sm:$0xf]  ;;  %v5311_v11 = vpack.i.bf16 %v5306_v9, %v5303_v8  ;;  %v5317_v12 = vld [vmem:[%s5274_s23 + $0x18] sm:$0xff]  ;;  %v5320_v13 = vld [vmem:[%s5274_s23 + $0x20] sm:$0xff]  ;;  %s7946_s13 = scalar_lea.vmem %s8238_s5, %s7436_s9  ;;  %s8045_s16 = scalar_lea.vmem %s8237_s4, %s7436_s9 }
  0x15   : > { %4998 = vrot.lane.b32.xlu2 %v5288_v4, %s5221_s24  ;;  %v5323_v14 = vld [vmem:[%s5274_s23] sm:$0xff]  ;;  %v5326_v15 = vld [vmem:[%s5274_s23 + $0x28] sm:$0xff]  ;;  %v5332_v16 = vpack.i.bf16 %v5320_v13, %v5317_v12  ;;  %v5348_v20 = vld [vmem:[%s5274_s23 + $0x10] sm:$0xff] }
  0x16   : > { %v5336_v17 = vpack.i.bf16 %v5323_v14, %v5326_v15  ;;  %v1125_v18 = vld [vmem:[%s5274_s23 + $0x60] sm:$0xf]  ;;  %v5345_v19 = vld [vmem:[%s5274_s23 + $0x8] sm:$0xff]  ;;  %v1127_v22 = vld [vmem:[%s5274_s23 + $0x70] sm:$0xf] }
  0x17   : > { %v1126_v21 = vld [vmem:[%s5274_s23 + $0x68] sm:$0xf]  ;;  %v5354_v23 = vpack.i.bf16 %v5348_v20, %v5345_v19  ;;  %v425_v30 = vld [vmem:[%s5274_s23 + $0x60] sm:$0xf]  ;;  %v1519_v40 = vld [vmem:[%s5274_s23 + $0x70] sm:$0xf] }
  0x18   : > { %v426_v32 = vld [vmem:[%s5274_s23 + $0x68] sm:$0xf]  ;;  %v439_v33 = vsel %vm5369_vm0, %v425_v30, 0.0  ;;  %v1517_v38 = vld [vmem:[%s5274_s23 + $0x60] sm:$0xf] }
  0x19   : > { %v440_v34 = vsel %vm5376_vm1, %v426_v32, 0.0  ;;  %4964 = vmatpush.msk.msra.mxu2 %vm538_vm2, %v439_v33  ;;  %4477 = vmatpush.msk.msra.mxu0 %vm538_vm2, %v439_v33  ;;  %v1518_v39 = vld [vmem:[%s5274_s23 + $0x68] sm:$0xf]  ;;  %v1905_v51 = vld [vmem:[%s5274_s23 + $0x60] sm:$0xf] }
  0x1a   : > { %844 = vrot.lane.b32.xlu0 %v752_v10, %s5221_s24  ;;  %4993 = vrot.lane.b32.xlu1 %v5300_v7, %s5221_s24  ;;  %v1906_v52 = vld [vmem:[%s5274_s23 + $0x68] sm:$0xf]  ;;  %v1907_v54 = vld [vmem:[%s5274_s23 + $0x70] sm:$0xf] }
  0x1b   : > { %4969 = vmatpush.msk.msra.mxu3 %vm538_vm2, %v440_v34  ;;  %4498 = vmatpush.msk.msra.mxu1 %vm538_vm2, %v440_v34  ;;  %v2279_v34 = vld [vmem:[%s5274_s23 + $0x60] sm:$0xf] }
  0x1c   : > { %4965 = vmatpush.msk.msra.mxu2 %vm5369_vm0, %v5291_v5  ;;  %4478 = vmatpush.msk.msra.mxu0 %vm5369_vm0, %v5291_v5 }
  0x1d   : > { %5003 = vrot.lane.b32.xlu2 %v5311_v11, %s5221_s24  ;;  %4970 = vmatpush.msk.msra.mxu3 %vm5376_vm1, %v5294_v6 }
  0x1e   : > { %4966 = vmatpush.msk.msra.mxu2 %vm5369_vm0, %v5279_v2  ;;  %4499 = vmatpush.msk.msra.mxu1 %vm5376_vm1, %v5294_v6 }
  0x1f   : > { %4971 = vmatpush.msk.msra.mxu3 %vm5376_vm1, %v5303_v8  ;;  %4479 = vmatpush.msk.msra.mxu0 %vm5369_vm0, %v5279_v2 }
  0x20   : > { %4967 = vmatpush.msk.msra.mxu2 %vm5369_vm0, %v5317_v12  ;;  %4500 = vmatpush.msk.msra.mxu1 %vm5376_vm1, %v5303_v8 }
  0x21   : > { %4972 = vmatpush.msk.msra.mxu3 %vm5376_vm1, %v5320_v13  ;;  %4480 = vmatpush.msk.msra.mxu0 %vm5369_vm0, %v5317_v12 }
  0x22   : > { %5008 = vrot.lane.b32.xlu0 %v5332_v16, %s5221_s24  ;;  %5013 = vrot.lane.b32.xlu1 %v5336_v17, %s5221_s24 }
  0x23   : > { %4968 = vmatpush.msk.msra.mxu2 %vm5369_vm0, %v5323_v14  ;;  %4973 = vmatpush.msk.msra.mxu3 %vm5376_vm1, %v5345_v19 }
  0x24   : > { %4490 = vmatmul.msk.f32.vlgmr.msra.gmra.mxu2 %vm489_vm3, %v481_v35  ;;  %4511 = vmatmul.msk.f32.vlgmr.msra.gmra.mxu3 %vm489_vm3, %v481_v35  ;;  %v2280_v35 = vld [vmem:[%s5274_s23 + $0x68] sm:$0xf] }
  0x25   : > { %1171 = vrot.lane.b32.xlu2 %v1125_v18, %s5222_s25  ;;  %4501 = vmatpush.msk.msra.mxu1 %vm5376_vm1, %v5320_v13 }
  0x26   : > { %4481 = vmatpush.msk.msra.mxu0 %vm5369_vm0, %v5323_v14 }
  0x27   : > { %4502 = vmatpush.msk.msra.mxu1 %vm5376_vm1, %v5345_v19  ;;  %4482 = vmatmul.msk.f32.vlgmr.msra.gmra.mxu0 %vm489_vm3, %v473_v43 }
  0x28   : > { %4503 = vmatmul.msk.f32.vlgmr.msra.gmra.mxu1 %vm489_vm3, %v473_v43 }
  0x2a   : > { %1173 = vrot.lane.b32.xlu0 %v1126_v21, %s5222_s25  ;;  %1175 = vrot.lane.b32.xlu1 %v1127_v22, %s5222_s25 }
  0x2c   : > { %4491 = vmatmul.msk.f32.gmra.mxu2 %vm489_vm3, %v482_v36  ;;  %4512 = vmatmul.msk.f32.gmra.mxu3 %vm489_vm3, %v482_v36  ;;  %v479_v36 = vld [vmem:[%s8234_s1 + $0x30] sm:$0xff] }
  0x2d   : > { %5018 = vrot.lane.b32.xlu2 %v5354_v23, %s5221_s24 }
  0x2f   : > { %4483 = vmatmul.msk.f32.gmra.mxu0 %vm489_vm3, %v474_v45 }
  0x30   : > { %4504 = vmatmul.msk.f32.gmra.mxu1 %vm489_vm3, %v474_v45 }
  0x32   : > { %1165 = vrot.lane.b32.xlu0 %v5291_v5, %s5222_s25  ;;  %1167 = vrot.lane.b32.xlu1 %v5294_v6, %s5222_s25 }
  0x34   : > { %4492 = vmatmul.msk.f32.gmra.mxu2 %vm489_vm3, %v483_v37  ;;  %4513 = vmatmul.msk.f32.gmra.mxu3 %vm489_vm3, %v483_v37 }
  0x35   : > { %1169 = vrot.lane.b32.xlu2 %v5284_v3, %s5222_s25 }
  0x37   : > { %4484 = vmatmul.msk.f32.gmra.mxu0 %vm489_vm3, %v475_v48 }
  0x38   : > { %4505 = vmatmul.msk.f32.gmra.mxu1 %vm489_vm3, %v475_v48 }
  0x3a   : > { %1159 = vrot.lane.b32.xlu0 %v5279_v2, %s5222_s25  ;;  %1161 = vrot.lane.b32.xlu1 %v5303_v8, %s5222_s25 }
  0x3c   : > { %4493 = vmatmul.msk.f32.gmra.mxu2 %vm489_vm3, %v484_v41  ;;  %4514 = vmatmul.msk.f32.gmra.mxu3 %vm489_vm3, %v484_v41 }
  0x3d   : > { %1163 = vrot.lane.b32.xlu2 %v5306_v9, %s5222_s25 }
  0x3f   : > { %4485 = vmatmul.msk.f32.gmra.mxu0 %vm489_vm3, %v476_v53 }
  0x40   : > { %4506 = vmatmul.msk.f32.gmra.mxu1 %vm489_vm3, %v476_v53  ;;  %v4519_v53 = vld [vmem:[%s8234_s1 + $0x80] sm:$0xff] }
  0x42   : > { %1153 = vrot.lane.b32.xlu0 %v5317_v12, %s5222_s25  ;;  %1155 = vrot.lane.b32.xlu1 %v5320_v13, %s5222_s25 }
  0x44   : > { %4494 = vmatmul.msk.f32.gmra.mxu2 %vm489_vm3, %v485_v42  ;;  %4515 = vmatmul.msk.f32.gmra.mxu3 %vm489_vm3, %v485_v42 }
  0x45   : > { %1157 = vrot.lane.b32.xlu2 %v5326_v15, %s5222_s25 }
  0x47   : > { %4486 = vmatmul.msk.f32.gmra.mxu0 %vm489_vm3, %v477_v56 }
  0x48   : > { %4507 = vmatmul.msk.f32.gmra.mxu1 %vm489_vm3, %v477_v56  ;;  %v4642_v56 = vld [vmem:[%s8234_s1 + $0x1f8] sm:$0xff] }
  0x4a   : > { %1147 = vrot.lane.b32.xlu0 %v5323_v14, %s5222_s25  ;;  %1149 = vrot.lane.b32.xlu1 %v5345_v19, %s5222_s25 }
  0x4c   : > { %4495 = vmatmul.msk.f32.gmra.mxu2 %vm489_vm3, %v486_v44  ;;  %4516 = vmatmul.msk.f32.gmra.mxu3 %vm489_vm3, %v486_v44 }
  0x4d   : > { %1151 = vrot.lane.b32.xlu2 %v5348_v20, %s5222_s25  ;;  %s5226_s25 = smov 96  }
  0x4f   : > { %4487 = vmatmul.msk.f32.gmra.mxu0 %vm489_vm3, %v478_v60 }
  0x50   : > { %4508 = vmatmul.msk.f32.gmra.mxu1 %vm489_vm3, %v478_v60 }
  0x52   : > { %1559 = vrot.lane.b32.xlu0 %v1517_v38, %s5223_s7  ;;  %1561 = vrot.lane.b32.xlu1 %v1518_v39, %s5223_s7  ;;  %v2281_v39 = vld [vmem:[%s5274_s23 + $0x70] sm:$0xf] }
  0x54   : > { %4496 = vmatmul.msk.f32.gmra.mxu2 %vm489_vm3, %v487_v46  ;;  %4517 = vmatmul.msk.f32.gmra.mxu3 %vm489_vm3, %v487_v46 }
  0x55   : > { %1563 = vrot.lane.b32.xlu2 %v1519_v40, %s5223_s7 }
  0x57   : > { %4488 = vmatmul.msk.f32.gmra.mxu0 %vm489_vm3, %v479_v36 }
  0x58   : > { %4509 = vmatmul.msk.f32.gmra.mxu1 %vm489_vm3, %v479_v36 }
  0x5a   : > { %1553 = vrot.lane.b32.xlu0 %v5291_v5, %s5223_s7  ;;  %1555 = vrot.lane.b32.xlu1 %v5294_v6, %s5223_s7 }
  0x5c   : > { %4497 = vmatmul.msk.f32.gmra.mxu2 %vm489_vm3, %v488_v49  ;;  %4518 = vmatmul.msk.f32.gmra.mxu3 %vm489_vm3, %v488_v49 }
  0x5d   : > { %1557 = vrot.lane.b32.xlu2 %v5284_v3, %s5223_s7 }
  0x62   : > { %1547 = vrot.lane.b32.xlu0 %v5279_v2, %s5223_s7  ;;  %1549 = vrot.lane.b32.xlu1 %v5303_v8, %s5223_s7 }
  0x65   : > { %1551 = vrot.lane.b32.xlu2 %v5306_v9, %s5223_s7 }
  0x6a   : > { %1541 = vrot.lane.b32.xlu0 %v5317_v12, %s5223_s7  ;;  %1543 = vrot.lane.b32.xlu1 %v5320_v13, %s5223_s7 }
  0x6d   : > { %1545 = vrot.lane.b32.xlu2 %v5326_v15, %s5223_s7 }
  0x6f   : > { %v5530_v47 = vpop.permute.xlu2 %4998 }
  0x70   : > { %v5000_v61 = vunpack.i.l.bf16 %v5530_v47  ;;  %v5001_v21 = vunpack.i.h.bf16 %v5530_v47 }
  0x72   : > { %1535 = vrot.lane.b32.xlu0 %v5323_v14, %s5223_s7  ;;  %1537 = vrot.lane.b32.xlu1 %v5345_v19, %s5223_s7 }
  0x75   : > { %1539 = vrot.lane.b32.xlu2 %v5348_v20, %s5223_s7 }
  0x77   : > { %v5004_v50 = vpop.permute.xlu2 %5003 }
  0x78   : > { %v5006_v22 = vunpack.i.h.bf16 %v5004_v50  ;;  %v5005_v24 = vunpack.i.l.bf16 %v5004_v50 }
  0x7a   : > { %1996 = vrot.lane.b32.xlu0 %v1905_v51, %s5224_s29  ;;  %1998 = vrot.lane.b32.xlu1 %v1906_v52, %s5224_s29  ;;  %v853_v37 = vsel %vm848_vm4, %v5001_v21, %v5005_v24  ;;  %v854_v38 = vsel %vm848_vm4, %v5005_v24, %v5006_v22  ;;  %v480_v51 = vld [vmem:[%s8234_s1 + $0x38] sm:$0xff] }
  0x7b   : > { %4489 = vmatmul.msk.f32.gmra.mxu0 %vm489_vm3, %v480_v51  ;;  %4510 = vmatmul.msk.f32.gmra.mxu1 %vm489_vm3, %v480_v51  ;;  %v4570_v51 = vld [vmem:[%s8234_s1 + $0x108] sm:$0xff] }
  0x7d   : > { %2000 = vrot.lane.b32.xlu2 %v1907_v54, %s5224_s29 }
  0x7f   : > { %v5556_v55 = vpop.permute.xlu2 %1171 }
  0x82   : > { %5023 = vrot.lane.b32.xlu0 %v5300_v7, %s5224_s29  ;;  %5028 = vrot.lane.b32.xlu1 %v5288_v4, %s5224_s29 }
  0x84   : > { %v847_v57 = vpop.permute.xlu1 %846  ;;  %v843_v58 = vpop.permute.xlu0 %842 }
  0x85   : > { %5033 = vrot.lane.b32.xlu2 %v5311_v11, %s5224_s29 }
  0x87   : > { %v5019_v59 = vpop.permute.xlu2 %5018 }
  0x88   : > { %v5021_v40 = vunpack.i.h.bf16 %v5019_v59  ;;  %v5020_v46 = vunpack.i.l.bf16 %v5019_v59 }
  0x8a   : > { %5038 = vrot.lane.b32.xlu0 %v5332_v16, %s5224_s29  ;;  %5043 = vrot.lane.b32.xlu1 %v5336_v17, %s5224_s29  ;;  %v850_v52 = vsel %vm848_vm4, %v5020_v46, %v5021_v40 }
  0x8c   : > { %v845_v62 = vpop.permute.xlu0 %844  ;;  %v4994_v63 = vpop.permute.xlu1 %4993 }
  0x8d   : > { %v4996_v0 = vunpack.i.h.bf16 %v4994_v63  ;;  %v4995_v1 = vunpack.i.l.bf16 %v4994_v63  ;;  %5048 = vrot.lane.b32.xlu2 %v5354_v23, %s5224_s29  ;;  %v857_v10 = vsel %vm848_vm4, %v843_v58, %v845_v62  ;;  %v858_v18 = vsel %vm848_vm4, %v845_v62, %v847_v57 }
  0x8e   : > { %4535 = vmatpush.msk.msrb.mxu2 %vm538_vm2, %v857_v10  ;;  %4552 = vmatpush.msk.msrb.mxu3 %vm538_vm2, %v858_v18  ;;  %v4521_v10 = vld [vmem:[%s8234_s1 + $0x90] sm:$0xff] }
  0x8f   : > { %v5580_v30 = vpop.permute.xlu2 %1169  ;;  %v855_v32 = vsel %vm848_vm4, %v4995_v1, %v4996_v0  ;;  %v856_v33 = vsel %vm848_vm4, %v4996_v0, %v5000_v61 }
  0x90   : > { %931 = vmatpush.msrb.mxu2 %v855_v32  ;;  %996 = vmatpush.msrb.mxu3 %v856_v33  ;;  %v2667_v32 = vld [vmem:[%s5274_s23 + $0x60] sm:$0xf]  ;;  %v2668_v33 = vld [vmem:[%s5274_s23 + $0x68] sm:$0xf] }
  0x92   : > { %2321 = vrot.lane.b32.xlu0 %v2279_v34, %s5225_s11  ;;  %2323 = vrot.lane.b32.xlu1 %v2280_v35, %s5225_s11  ;;  %v4522_v34 = vld [vmem:[%s8234_s1 + $0x98] sm:$0xff]  ;;  %v2669_v35 = vld [vmem:[%s5274_s23 + $0x70] sm:$0xf] }
  0x93   : > { %932 = vmatpush.msrb.mxu2 %v853_v37  ;;  %997 = vmatpush.msrb.mxu3 %v854_v38 }
  0x94   : > { %v5009_v41 = vpop.permute.xlu0 %5008  ;;  %v5014_v42 = vpop.permute.xlu1 %5013 }
  0x95   : > { %v5011_v43 = vunpack.i.h.bf16 %v5009_v41  ;;  %v5010_v44 = vunpack.i.l.bf16 %v5009_v41  ;;  %2325 = vrot.lane.b32.xlu2 %v2281_v39, %s5225_s11  ;;  %v5015_v45 = vunpack.i.l.bf16 %v5014_v42  ;;  %v5016_v47 = vunpack.i.h.bf16 %v5014_v42  ;;  %v4523_v41 = vld [vmem:[%s8234_s1 + $0xa0] sm:$0xff] }
  0x97   : > { %v1164_v48 = vpop.permute.xlu2 %1163  ;;  %v851_v49 = vsel %vm848_vm4, %v5010_v44, %v5011_v43  ;;  %v852_v50 = vsel %vm848_vm4, %v5011_v43, %v5015_v45  ;;  %v849_v54 = vsel %vm848_vm4, %v5016_v47, %v5020_v46  ;;  %v4569_v44 = vld [vmem:[%s8234_s1 + $0x100] sm:$0xff] }
  0x98   : > { %933 = vmatpush.msrb.mxu2 %v851_v49  ;;  %998 = vmatpush.msrb.mxu3 %v852_v50 }
  0x9a   : > { %2315 = vrot.lane.b32.xlu0 %v5291_v5, %s5225_s11  ;;  %2317 = vrot.lane.b32.xlu1 %v5294_v6, %s5225_s11 }
  0x9b   : > { %934 = vmatpush.msrb.mxu2 %v849_v54  ;;  %999 = vmatpush.msrb.mxu3 %v850_v52 }
  0x9c   : > { %4536 = vmatmul.msk.f32.vlgmr.msrb.gmra.mxu2 %vm489_vm3, %v4519_v53  ;;  %4553 = vmatmul.msk.f32.vlgmr.msrb.gmra.mxu3 %vm489_vm3, %v4519_v53  ;;  %v1174_v58 = vpop.permute.xlu0 %1173  ;;  %v1176_v59 = vpop.permute.xlu1 %1175 }
  0x9d   : > { %v1186_v60 = vsel %vm1177_vm5, %v5556_v55, %v1174_v58  ;;  %2319 = vrot.lane.b32.xlu2 %v5284_v3, %s5225_s11  ;;  %v1187_v25 = vsel %vm1177_vm5, %v1174_v58, %v1176_v59  ;;  %v4520_v55 = vld [vmem:[%s8234_s1 + $0x88] sm:$0xff] }
  0x9e   : > { %v1206_v26 = vsel %vm5615_vm6, %v1186_v60, 0.0  ;;  %v1207_v27 = vsel %vm5621_vm7, %v1187_v25, 0.0  ;;  %v4571_v60 = vld [vmem:[%s8234_s1 + $0x110] sm:$0xff] }
  0x9f   : > { %v1158_v28 = vpop.permute.xlu2 %1157  ;;  %4585 = vmatpush.msk.msrb.mxu0 %vm538_vm2, %v1206_v26  ;;  %4606 = vmatpush.msk.msrb.mxu1 %vm538_vm2, %v1207_v27 }
  0xa2   : > { %2309 = vrot.lane.b32.xlu0 %v5279_v2, %s5225_s11  ;;  %2311 = vrot.lane.b32.xlu1 %v5303_v8, %s5225_s11 }
  0xa4   : > { %4537 = vmatmul.msk.f32.gmra.mxu2 %vm489_vm3, %v4520_v55  ;;  %4554 = vmatmul.msk.f32.gmra.mxu3 %vm489_vm3, %v4520_v55  ;;  %v1166_v61 = vpop.permute.xlu0 %1165  ;;  %v1168_v62 = vpop.permute.xlu1 %1167 }
  0xa5   : > { %2313 = vrot.lane.b32.xlu2 %v5306_v9, %s5225_s11  ;;  %v1184_v63 = vsel %vm1177_vm5, %v1166_v61, %v1168_v62  ;;  %v1185_v0 = vsel %vm1177_vm5, %v1168_v62, %v5580_v30  ;;  %v4572_v61 = vld [vmem:[%s8234_s1 + $0x118] sm:$0xff] }
  0xa6   : > { %4586 = vmatpush.msk.msrb.mxu0 %vm5615_vm6, %v1184_v63  ;;  %4607 = vmatpush.msk.msrb.mxu1 %vm5621_vm7, %v1185_v0 }
  0xa7   : > { %v1152_v1 = vpop.permute.xlu2 %1151  ;;  %v5752_v26 = vpop.f32.mrf.mxu2 }
  0xa8   : > { %v5760_v27 = vpop.f32.mrf.mxu3 }
  0xaa   : > { %2303 = vrot.lane.b32.xlu0 %v5317_v12, %s5225_s11  ;;  %2305 = vrot.lane.b32.xlu1 %v5320_v13, %s5225_s11 }
  0xac   : > { %4538 = vmatmul.msk.f32.gmra.mxu2 %vm489_vm3, %v4521_v10  ;;  %4555 = vmatmul.msk.f32.gmra.mxu3 %vm489_vm3, %v4521_v10  ;;  %v1160_v18 = vpop.permute.xlu0 %1159  ;;  %v1162_v21 = vpop.permute.xlu1 %1161 }
  0xad   : > { %2307 = vrot.lane.b32.xlu2 %v5326_v15, %s5225_s11  ;;  %v1182_v22 = vsel %vm1177_vm5, %v1160_v18, %v1162_v21  ;;  %v1183_v24 = vsel %vm1177_vm5, %v1162_v21, %v1164_v48  ;;  %v4524_v48 = vld [vmem:[%s8234_s1 + $0xa8] sm:$0xff]  ;;  %v4573_v18 = vld [vmem:[%s8234_s1 + $0x120] sm:$0xff] }
  0xae   : > { %4587 = vmatpush.msk.msrb.mxu0 %vm5615_vm6, %v1182_v22  ;;  %4608 = vmatpush.msk.msrb.mxu1 %vm5621_vm7, %v1183_v24  ;;  %v3055_v22 = vld [vmem:[%s5274_s23 + $0x60] sm:$0xf]  ;;  %v3056_v24 = vld [vmem:[%s5274_s23 + $0x68] sm:$0xf] }
  0xaf   : > { %v1564_v30 = vpop.permute.xlu2 %1563  ;;  %v5784_v63 = vpop.f32.mrf.mxu2 }
  0xb0   : > { %v5789_v0 = vpop.f32.mrf.mxu3 }
  0xb2   : > { %2709 = vrot.lane.b32.xlu0 %v2667_v32, %s5226_s25  ;;  %2711 = vrot.lane.b32.xlu1 %v2668_v33, %s5226_s25  ;;  %v3057_v32 = vld [vmem:[%s5274_s23 + $0x70] sm:$0xf] }
  0xb4   : > { %4539 = vmatmul.msk.f32.gmra.mxu2 %vm489_vm3, %v4522_v34  ;;  %4556 = vmatmul.msk.f32.gmra.mxu3 %vm489_vm3, %v4522_v34  ;;  %v1154_v36 = vpop.permute.xlu0 %1153  ;;  %v1156_v37 = vpop.permute.xlu1 %1155 }
  0xb5   : > { %2713 = vrot.lane.b32.xlu2 %v2669_v35, %s5226_s25  ;;  %v1180_v38 = vsel %vm1177_vm5, %v1154_v36, %v1156_v37  ;;  %v1181_v39 = vsel %vm1177_vm5, %v1156_v37, %v1158_v28  ;;  %v4574_v36 = vld [vmem:[%s8234_s1 + $0x128] sm:$0xff] }
  0xb6   : > { %4588 = vmatpush.msk.msrb.mxu0 %vm5615_vm6, %v1180_v38  ;;  %4609 = vmatpush.msk.msrb.mxu1 %vm5621_vm7, %v1181_v39 }
  0xb7   : > { %v1558_v40 = vpop.permute.xlu2 %1557 }
  0xb8   : > { %v5822_v33 = vpop.f32.mrf.mxu3 }
  0xba   : > { %2297 = vrot.lane.b32.xlu0 %v5323_v14, %s5225_s11  ;;  %2299 = vrot.lane.b32.xlu1 %v5345_v19, %s5225_s11 }
  0xbc   : > { %4540 = vmatmul.msk.f32.gmra.mxu2 %vm489_vm3, %v4523_v41  ;;  %4557 = vmatmul.msk.f32.gmra.mxu3 %vm489_vm3, %v4523_v41  ;;  %v1148_v42 = vpop.permute.xlu0 %1147  ;;  %v1150_v43 = vpop.permute.xlu1 %1149 }
  0xbd   : > { %2301 = vrot.lane.b32.xlu2 %v5348_v20, %s5225_s11  ;;  %v1178_v45 = vsel %vm1177_vm5, %v1148_v42, %v1150_v43  ;;  %v1179_v46 = vsel %vm1177_vm5, %v1150_v43, %v1152_v1  ;;  %v5843_v41 = vpop.f32.mrf.mxu0  ;;  %v5851_v43 = vpop.f32.mrf.mxu1 }
  0xbe   : > { %4589 = vmatpush.msk.msrb.mxu0 %vm5615_vm6, %v1178_v45  ;;  %4610 = vmatpush.msk.msrb.mxu1 %vm5621_vm7, %v1179_v46  ;;  %8264 = vst [vmem:[#allocation3_spill] sm:$0xff] %v5843_v41  ;;  %v4575_v46 = vld [vmem:[%s8234_s1 + $0x130] sm:$0xff] }
  0xbf   : > { %v1552_v47 = vpop.permute.xlu2 %1551  ;;  %4590 = vmatmul.msk.f32.vlgmr.msrb.gmra.mxu0 %vm489_vm3, %v4569_v44  ;;  %4611 = vmatmul.msk.f32.vlgmr.msrb.gmra.mxu1 %vm489_vm3, %v4569_v44  ;;  %8265 = vst [vmem:[#allocation4_spill] sm:$0xff] %v5851_v43 }
  0xc2   : > { %2703 = vrot.lane.b32.xlu0 %v5291_v5, %s5226_s25  ;;  %2705 = vrot.lane.b32.xlu1 %v5294_v6, %s5226_s25 }
  0xc4   : > { %4541 = vmatmul.msk.f32.gmra.mxu2 %vm489_vm3, %v4524_v48  ;;  %4558 = vmatmul.msk.f32.gmra.mxu3 %vm489_vm3, %v4524_v48  ;;  %v1560_v49 = vpop.permute.xlu0 %1559  ;;  %v1562_v50 = vpop.permute.xlu1 %1561 }
  0xc5   : > { %2707 = vrot.lane.b32.xlu2 %v5284_v3, %s5226_s25  ;;  %v1574_v52 = vsel %vm1565_vm8, %v1560_v49, %v1562_v50  ;;  %v1575_v5 = vsel %vm1565_vm8, %v1562_v50, %v1564_v30  ;;  %v4525_v3 = vld [vmem:[%s8234_s1 + $0xb0] sm:$0xff]  ;;  %v5817_v30 = vpop.f32.mrf.mxu2  ;;  %v3429_v49 = vld [vmem:[%s5274_s23 + $0x60] sm:$0xf]  ;;  %v5878_v50 = vpop.f32.mrf.mxu0 }
  0xc6   : > { %v1594_v6 = vsel %vm5369_vm0, %v1574_v52, 0.0  ;;  %v1595_v53 = vsel %vm5376_vm1, %v1575_v5, 0.0  ;;  %8266 = vst [vmem:[#allocation5_spill] sm:$0xff] %v5878_v50 }
  0xc7   : > { %v1546_v54 = vpop.permute.xlu2 %1545  ;;  %4591 = vmatmul.msk.f32.gmra.mxu0 %vm489_vm3, %v4570_v51  ;;  %4612 = vmatmul.msk.f32.gmra.mxu1 %vm489_vm3, %v4570_v51 }
  0xc8   : > { %4643 = vmatpush.msk.msra.mxu2 %vm538_vm2, %v1594_v6  ;;  %4664 = vmatpush.msk.msra.mxu3 %vm538_vm2, %v1595_v53 }
  0xca   : > { %2697 = vrot.lane.b32.xlu0 %v5279_v2, %s5226_s25  ;;  %2699 = vrot.lane.b32.xlu1 %v5303_v8, %s5226_s25 }
  0xcc   : > { %4542 = vmatmul.msk.f32.gmra.mxu2 %vm489_vm3, %v4525_v3  ;;  %4559 = vmatmul.msk.f32.gmra.mxu3 %vm489_vm3, %v4525_v3  ;;  %v1554_v58 = vpop.permute.xlu0 %1553  ;;  %v1556_v59 = vpop.permute.xlu1 %1555 }
  0xcd   : > { %2701 = vrot.lane.b32.xlu2 %v5306_v9, %s5226_s25  ;;  %v1572_v25 = vsel %vm1565_vm8, %v1554_v58, %v1556_v59  ;;  %v1573_v2 = vsel %vm1565_vm8, %v1556_v59, %v1558_v40  ;;  %v4526_v9 = vld [vmem:[%s8234_s1 + $0xb8] sm:$0xff]  ;;  %v4529_v40 = vld [vmem:[%s8234_s1 + $0xd0] sm:$0xff]  ;;  %v5849_v42 = vpop.f32.mrf.mxu2  ;;  %v5887_v3 = vpop.f32.mrf.mxu1 }
  0xce   : > { %4644 = vmatpush.msk.msra.mxu2 %vm5369_vm0, %v1572_v25  ;;  %4665 = vmatpush.msk.msra.mxu3 %vm5376_vm1, %v1573_v2  ;;  %8267 = vst [vmem:[#allocation6_spill] sm:$0xff] %v5887_v3  ;;  %v3431_v25 = vld [vmem:[%s5274_s23 + $0x70] sm:$0xf] }
  0xcf   : > { %v1540_v8 = vpop.permute.xlu2 %1539  ;;  %4592 = vmatmul.msk.f32.gmra.mxu0 %vm489_vm3, %v4571_v60  ;;  %4613 = vmatmul.msk.f32.gmra.mxu1 %vm489_vm3, %v4571_v60  ;;  %v3430_v60 = vld [vmem:[%s5274_s23 + $0x68] sm:$0xf] }
  0xd2   : > { %2691 = vrot.lane.b32.xlu0 %v5317_v12, %s5226_s25  ;;  %2693 = vrot.lane.b32.xlu1 %v5320_v13, %s5226_s25 }
  0xd4   : > { %4543 = vmatmul.msk.f32.gmra.mxu2 %vm489_vm3, %v4526_v9  ;;  %4560 = vmatmul.msk.f32.gmra.mxu3 %vm489_vm3, %v4526_v9  ;;  %v1548_v28 = vpop.permute.xlu0 %1547  ;;  %v1550_v55 = vpop.permute.xlu1 %1549 }
  0xd5   : > { %2695 = vrot.lane.b32.xlu2 %v5326_v15, %s5226_s25  ;;  %v1570_v62 = vsel %vm1565_vm8, %v1548_v28, %v1550_v55  ;;  %v1571_v12 = vsel %vm1565_vm8, %v1550_v55, %v1552_v47  ;;  %v4527_v15 = vld [vmem:[%s8234_s1 + $0xc0] sm:$0xff]  ;;  %v5862_v47 = vpop.f32.mrf.mxu3  ;;  %v5889_v58 = vpop.f32.mrf.mxu2 }
  0xd6   : > { %4645 = vmatpush.msk.msra.mxu2 %vm5369_vm0, %v1570_v62  ;;  %4666 = vmatpush.msk.msra.mxu3 %vm5376_vm1, %v1571_v12  ;;  %v4531_v55 = vld [vmem:[%s8234_s1 + $0xe0] sm:$0xff] }
  0xd7   : > { %v2001_v13 = vpop.permute.xlu2 %2000  ;;  %4593 = vmatmul.msk.f32.gmra.mxu0 %vm489_vm3, %v4572_v61  ;;  %4614 = vmatmul.msk.f32.gmra.mxu1 %vm489_vm3, %v4572_v61  ;;  %v4577_v12 = vld [vmem:[%s8234_s1 + $0x140] sm:$0xff] }
  0xda   : > { %2685 = vrot.lane.b32.xlu0 %v5323_v14, %s5226_s25  ;;  %2687 = vrot.lane.b32.xlu1 %v5345_v19, %s5226_s25 }
  0xdc   : > { %4544 = vmatmul.msk.f32.gmra.mxu2 %vm489_vm3, %v4527_v15  ;;  %4561 = vmatmul.msk.f32.gmra.mxu3 %vm489_vm3, %v4527_v15  ;;  %v1542_v1 = vpop.permute.xlu0 %1541  ;;  %v1544_v10 = vpop.permute.xlu1 %1543 }
  0xdd   : > { %2689 = vrot.lane.b32.xlu2 %v5348_v20, %s5226_s25  ;;  %v1568_v14 = vsel %vm1565_vm8, %v1542_v1, %v1544_v10  ;;  %v1569_v21 = vsel %vm1565_vm8, %v1544_v10, %v1546_v54  ;;  %v4528_v20 = vld [vmem:[%s8234_s1 + $0xc8] sm:$0xff]  ;;  %v5897_v2 = vpop.f32.mrf.mxu3  ;;  %v5919_v15 = vpop.f32.mrf.mxu0 }
  0xde   : > { %4646 = vmatpush.msk.msra.mxu2 %vm5369_vm0, %v1568_v14  ;;  %4667 = vmatpush.msk.msra.mxu3 %vm5376_vm1, %v1569_v21  ;;  %v3426_v10 = vld [vmem:[%s5274_s23 + $0x48] sm:$0xff]  ;;  %v5927_v14 = vpop.f32.mrf.mxu1 }
  0xdf   : > { %v5808_v19 = vpop.permute.xlu2 %5033  ;;  %4594 = vmatmul.msk.f32.gmra.mxu0 %vm489_vm3, %v4573_v18  ;;  %4615 = vmatmul.msk.f32.gmra.mxu1 %vm489_vm3, %v4573_v18  ;;  %v3427_v18 = vld [vmem:[%s5274_s23 + $0x50] sm:$0xff]  ;;  %v4532_v21 = vld [vmem:[%s8234_s1 + $0xe8] sm:$0xff] }
  0xe0   : > { %v5035_v51 = vunpack.i.l.bf16 %v5808_v19 }
  0xe2   : > { %3146 = vrot.lane.b32.xlu0 %v3055_v22, %s5227_s26  ;;  %3148 = vrot.lane.b32.xlu1 %v3056_v24, %s5227_s26  ;;  %v5229_v22 = vmov 0   ;;  %v3428_v24 = vld [vmem:[%s5274_s23 + $0x58] sm:$0xff] }
  0xe3   : > { %5083 = vset.pattern.permute.xlu1 %v5229_v22  ;;  %5082 = vset.pattern.permute.xlu0 %v5229_v22 }
  0xe4   : > { %4545 = vmatmul.msk.f32.gmra.mxu2 %vm489_vm3, %v4528_v20  ;;  %4562 = vmatmul.msk.f32.gmra.mxu3 %vm489_vm3, %v4528_v20  ;;  %v1536_v34 = vpop.permute.xlu0 %1535  ;;  %v1538_v35 = vpop.permute.xlu1 %1537 }
  0xe5   : > { %3150 = vrot.lane.b32.xlu2 %v3057_v32, %s5227_s26  ;;  %v1566_v37 = vsel %vm1565_vm8, %v1536_v34, %v1538_v35  ;;  %v1567_v38 = vsel %vm1565_vm8, %v1538_v35, %v1540_v8  ;;  %v4578_v35 = vld [vmem:[%s8234_s1 + $0x148] sm:$0xff] }
  0xe6   : > { %4647 = vmatpush.msk.msra.mxu2 %vm5369_vm0, %v1566_v37  ;;  %4668 = vmatpush.msk.msra.mxu3 %vm5376_vm1, %v1567_v38 }
  0xe7   : > { %v5836_v39 = vpop.permute.xlu2 %5048  ;;  %4595 = vmatmul.msk.f32.gmra.mxu0 %vm489_vm3, %v4574_v36  ;;  %4616 = vmatmul.msk.f32.gmra.mxu1 %vm489_vm3, %v4574_v36 }
  0xe8   : > { %5084 = vset.pattern.permute.xlu2 %v5229_v22 }
  0xea   : > { %5053 = vrot.lane.b32.xlu0 %v5300_v7, %s5227_s26  ;;  %5058 = vrot.lane.b32.xlu1 %v5288_v4, %s5227_s26 }
  0xec   : > { %4546 = vmatmul.msk.f32.gmra.mxu2 %vm489_vm3, %v4529_v40  ;;  %4563 = vmatmul.msk.f32.gmra.mxu3 %vm489_vm3, %v4529_v40  ;;  %v1997_v44 = vpop.permute.xlu0 %1996  ;;  %v1999_v45 = vpop.permute.xlu1 %1998 }
  0xed   : > { %5063 = vrot.lane.b32.xlu2 %v5311_v11, %s5227_s26  ;;  %v2011_v4 = vsel %vm2002_vm9, %v1997_v44, %v1999_v45  ;;  %v2012_v7 = vsel %vm2002_vm9, %v1999_v45, %v2001_v13  ;;  %v4530_v11 = vld [vmem:[%s8234_s1 + $0xd8] sm:$0xff]  ;;  %v5036_v13 = vunpack.i.h.bf16 %v5808_v19  ;;  %v5934_v19 = vpop.f32.mrf.mxu3  ;;  %v3423_v45 = vld [vmem:[%s5274_s23 + $0x30] sm:$0xff] }
  0xee   : > { %4701 = vmatpush.msk.msra.mxu0 %vm538_vm2, %v2011_v4  ;;  %4718 = vmatpush.msk.msra.mxu1 %vm538_vm2, %v2012_v7  ;;  %8269 = vst [vmem:[#allocation8_spill] sm:$0xff] %v5934_v19  ;;  %v4533_v4 = vld [vmem:[%s8234_s1 + $0xf0] sm:$0xff]  ;;  %v5964_v7 = vpop.f32.mrf.mxu0 }
  0xef   : > { %v5866_v48 = vpop.permute.xlu2 %2325  ;;  %4596 = vmatmul.msk.f32.gmra.mxu0 %vm489_vm3, %v4575_v46  ;;  %4617 = vmatmul.msk.f32.gmra.mxu1 %vm489_vm3, %v4575_v46  ;;  %v2008_v20 = vsel %vm2002_vm9, %v5035_v51, %v5036_v13  ;;  %v3424_v46 = vld [vmem:[%s5274_s23 + $0x38] sm:$0xff]  ;;  %8270 = vst [vmem:[#allocation9_spill] sm:$0xff] %v5964_v7  ;;  %v4636_v7 = vld [vmem:[%s8234_s1 + $0x1c8] sm:$0xff] }
  0xf2   : > { %5068 = vrot.lane.b32.xlu0 %v5332_v16, %s5227_s26  ;;  %5073 = vrot.lane.b32.xlu1 %v5336_v17, %s5227_s26  ;;  %v4576_v16 = vld [vmem:[%s8234_s1 + $0x138] sm:$0xff] }
  0xf4   : > { %4547 = vmatmul.msk.f32.gmra.mxu2 %vm489_vm3, %v4530_v11  ;;  %4564 = vmatmul.msk.f32.gmra.mxu3 %vm489_vm3, %v4530_v11  ;;  %v5024_v52 = vpop.permute.xlu0 %5023  ;;  %v5029_v5 = vpop.permute.xlu1 %5028  ;;  %v3425_v11 = vld [vmem:[%s5274_s23 + $0x40] sm:$0xff] }
  0xf5   : > { %v5026_v6 = vunpack.i.h.bf16 %v5024_v52  ;;  %v5025_v53 = vunpack.i.l.bf16 %v5024_v52  ;;  %3471 = vrot.lane.b32.xlu2 %v3429_v49, %s5228_s12  ;;  %v5031_v17 = vunpack.i.h.bf16 %v5029_v5  ;;  %v5030_v54 = vunpack.i.l.bf16 %v5029_v5 }
  0xf7   : > { %v5891_v59 = vpop.permute.xlu2 %2319  ;;  %4597 = vmatmul.msk.f32.gmra.mxu0 %vm489_vm3, %v4576_v16  ;;  %4618 = vmatmul.msk.f32.gmra.mxu1 %vm489_vm3, %v4576_v16  ;;  %v2009_v8 = vsel %vm2002_vm9, %v5025_v53, %v5026_v6  ;;  %v2010_v9 = vsel %vm2002_vm9, %v5026_v6, %v5030_v54  ;;  %v2007_v28 = vsel %vm2002_vm9, %v5031_v17, %v5035_v51  ;;  %v5973_v51 = vpop.f32.mrf.mxu3  ;;  %v4579_v16 = vld [vmem:[%s8234_s1 + $0x150] sm:$0xff]  ;;  %v3420_v54 = vld [vmem:[%s5274_s23 + $0x18] sm:$0xff] }
  0xf8   : > { %2085 = vmatpush.msra.mxu0 %v2009_v8  ;;  %2150 = vmatpush.msra.mxu1 %v2010_v9  ;;  %v6000_v8 = vpop.f32.mrf.mxu0 }
  0xfa   : > { %3473 = vrot.lane.b32.xlu0 %v3430_v60, %s5228_s12  ;;  %3475 = vrot.lane.b32.xlu1 %v3431_v25, %s5228_s12  ;;  %v3421_v60 = vld [vmem:[%s5274_s23 + $0x20] sm:$0xff]  ;;  %v4534_v25 = vld [vmem:[%s8234_s1 + $0xf8] sm:$0xff] }
  0xfb   : > { %2086 = vmatpush.msra.mxu0 %v2007_v28  ;;  %2151 = vmatpush.msra.mxu1 %v2008_v20  ;;  %v3417_v20 = vld [vmem:[%s5274_s23] sm:$0xff] }
  0xfc   : > { %4548 = vmatmul.msk.f32.gmra.mxu2 %vm489_vm3, %v4531_v55  ;;  %4565 = vmatmul.msk.f32.gmra.mxu3 %vm489_vm3, %v4531_v55  ;;  %v5909_v61 = vpop.permute.xlu0 %5038  ;;  %v5911_v62 = vpop.permute.xlu1 %5043 }
  0xfd   : > { %5078 = vrot.lane.b32.xlu2 %v5354_v23, %s5227_s26  ;;  %v5932_v23 = vpop.f32.mrf.mxu2  ;;  %v5041_v28 = vunpack.i.h.bf16 %v5909_v61  ;;  %v5040_v55 = vunpack.i.l.bf16 %v5909_v61 }
  0xfe   : > { %8268 = vst [vmem:[#allocation7_spill] sm:$0xff] %v5932_v23 }
  0xff   : > { %v5921_v1 = vpop.permute.xlu2 %2313  ;;  %4598 = vmatmul.msk.f32.gmra.mxu0 %vm489_vm3, %v4577_v12  ;;  %4619 = vmatmul.msk.f32.gmra.mxu1 %vm489_vm3, %v4577_v12  ;;  %v6017_v22 = vpop.f32.mrf.mxu3 }
 0x102   : > { %3465 = vrot.lane.b32.xlu0 %v3426_v10, %s5228_s12  ;;  %3467 = vrot.lane.b32.xlu1 %v3427_v18, %s5228_s12  ;;  %v4580_v10 = vld [vmem:[%s8234_s1 + $0x158] sm:$0xff] }
 0x104   : > { %4549 = vmatmul.msk.f32.gmra.mxu2 %vm489_vm3, %v4532_v21  ;;  %4566 = vmatmul.msk.f32.gmra.mxu3 %vm489_vm3, %v4532_v21  ;;  %v2322_v32 = vpop.permute.xlu0 %2321  ;;  %v2324_v34 = vpop.permute.xlu1 %2323 }
 0x105   : > { %3469 = vrot.lane.b32.xlu2 %v3428_v24, %s5228_s12  ;;  %v2336_v36 = vsel %vm2327_vm10, %v2322_v32, %v2324_v34  ;;  %v2337_v37 = vsel %vm2327_vm10, %v2324_v34, %v5866_v48  ;;  %v5966_v48 = vpop.f32.mrf.mxu1  ;;  %v5971_v49 = vpop.f32.mrf.mxu2  ;;  %v3418_v32 = vld [vmem:[%s5274_s23 + $0x8] sm:$0xff]  ;;  %v5046_v34 = vunpack.i.h.bf16 %v5911_v62 }
 0x106   : > { %v2356_v38 = vsel %vm5615_vm6, %v2336_v36, 0.0  ;;  %v2357_v40 = vsel %vm5621_vm7, %v2337_v37, 0.0  ;;  %8271 = vst [vmem:[#allocation10_spill] sm:$0xff] %v5966_v48  ;;  %v2005_v36 = vsel %vm2002_vm9, %v5040_v55, %v5041_v28  ;;  %v4627_v37 = vld [vmem:[%s8234_s1 + $0x180] sm:$0xff] }
 0x107   : > { %v5953_v44 = vpop.permute.xlu2 %2307  ;;  %4599 = vmatmul.msk.f32.gmra.mxu0 %vm489_vm3, %v4578_v35  ;;  %4620 = vmatmul.msk.f32.gmra.mxu1 %vm489_vm3, %v4578_v35  ;;  %v5045_v35 = vunpack.i.l.bf16 %v5911_v62 }
 0x108   : > { %4751 = vmatpush.msk.msrb.mxu2 %vm538_vm2, %v2356_v38  ;;  %4772 = vmatpush.msk.msrb.mxu3 %vm538_vm2, %v2357_v40  ;;  %v3419_v38 = vld [vmem:[%s5274_s23 + $0x10] sm:$0xff]  ;;  %v5051_v40 = vunpack.i.h.bf16 %v5836_v39 }
 0x109   : > { %2087 = vmatpush.msra.mxu0 %v2005_v36  ;;  %v4629_v36 = vld [vmem:[%s8234_s1 + $0x190] sm:$0xff] }
 0x10a   : > { %3459 = vrot.lane.b32.xlu0 %v3423_v45, %s5228_s12  ;;  %3461 = vrot.lane.b32.xlu1 %v3424_v46, %s5228_s12  ;;  %v4581_v46 = vld [vmem:[%s8234_s1 + $0x160] sm:$0xff] }
 0x10c   : > { %4550 = vmatmul.msk.f32.gmra.mxu2 %vm489_vm3, %v4533_v4  ;;  %4567 = vmatmul.msk.f32.gmra.mxu3 %vm489_vm3, %v4533_v4  ;;  %v2316_v52 = vpop.permute.xlu0 %2315  ;;  %v2318_v5 = vpop.permute.xlu1 %2317 }
 0x10d   : > { %3463 = vrot.lane.b32.xlu2 %v3425_v11, %s5228_s12  ;;  %v2334_v6 = vsel %vm2327_vm10, %v2316_v52, %v2318_v5  ;;  %v2335_v53 = vsel %vm2327_vm10, %v2318_v5, %v5891_v59  ;;  %v3422_v59 = vld [vmem:[%s5274_s23 + $0x28] sm:$0xff]  ;;  %v6002_v9 = vpop.f32.mrf.mxu1  ;;  %v6015_v61 = vpop.f32.mrf.mxu2  ;;  %v2006_v11 = vsel %vm2002_vm9, %v5041_v28, %v5045_v35  ;;  %v260_v28 = vld [vmem:[%s8235_s2 + $0x10] sm:$0xff]  ;;  %s7471_s23 = scalar_lea.vmem %s8236_s3, %s7436_s9 }
 0x10e   : > { %4752 = vmatpush.msk.msrb.mxu2 %vm5615_vm6, %v2334_v6  ;;  %4773 = vmatpush.msk.msrb.mxu3 %vm5621_vm7, %v2335_v53  ;;  %v6051_v5 = vpop.f32.mrf.mxu0 }
 0x10f   : > { %v5988_v17 = vpop.permute.xlu2 %2713  ;;  %4600 = vmatmul.msk.f32.gmra.mxu0 %vm489_vm3, %v4579_v16  ;;  %4621 = vmatmul.msk.f32.gmra.mxu1 %vm489_vm3, %v4579_v16 }
 0x110   : > { %2152 = vmatpush.msra.mxu1 %v2006_v11 }
 0x112   : > { %3453 = vrot.lane.b32.xlu0 %v3420_v54, %s5228_s12  ;;  %3455 = vrot.lane.b32.xlu1 %v3421_v60, %s5228_s12  ;;  %v259_v54 = vld [vmem:[%s8235_s2 + $0x8] sm:$0xff] }
 0x114   : > { %4551 = vmatmul.msk.f32.gmra.mxu2 %vm489_vm3, %v4534_v25  ;;  %4568 = vmatmul.msk.f32.gmra.mxu3 %vm489_vm3, %v4534_v25  ;;  %v2310_v12 = vpop.permute.xlu0 %2309  ;;  %v2312_v13 = vpop.permute.xlu1 %2311 }
 0x115   : > { %3457 = vrot.lane.b32.xlu2 %v3422_v59, %s5228_s12  ;;  %v2332_v18 = vsel %vm2327_vm10, %v2310_v12, %v2312_v13  ;;  %v2333_v21 = vsel %vm2327_vm10, %v2312_v13, %v5921_v1  ;;  %v5050_v1 = vunpack.i.l.bf16 %v5836_v39  ;;  %v6053_v16 = vpop.f32.mrf.mxu1  ;;  %v4628_v59 = vld [vmem:[%s8234_s1 + $0x188] sm:$0xff] }
 0x116   : > { %4753 = vmatpush.msk.msrb.mxu2 %vm5615_vm6, %v2332_v18  ;;  %4774 = vmatpush.msk.msrb.mxu3 %vm5621_vm7, %v2333_v21  ;;  %8272 = vst [vmem:[#allocation11_spill] sm:$0xff] %v6053_v16  ;;  %v4582_v13 = vld [vmem:[%s8234_s1 + $0x168] sm:$0xff] }
 0x117   : > { %v6023_v24 = vpop.permute.xlu2 %2301  ;;  %4601 = vmatmul.msk.f32.gmra.mxu0 %vm489_vm3, %v4580_v10  ;;  %4622 = vmatmul.msk.f32.gmra.mxu1 %vm489_vm3, %v4580_v10  ;;  %v2003_v4 = vsel %vm2002_vm9, %v5046_v34, %v5050_v1  ;;  %v2004_v60 = vsel %vm2002_vm9, %v5050_v1, %v5051_v40  ;;  %v263_v34 = vld [vmem:[%s8235_s2 + $0x28] sm:$0xff]  ;;  %v262_v40 = vld [vmem:[%s8235_s2 + $0x20] sm:$0xff] }
 0x118   : > { %2088 = vmatpush.msra.mxu0 %v2003_v4  ;;  %2153 = vmatpush.msra.mxu1 %v2004_v60  ;;  %v4630_v60 = vld [vmem:[%s8234_s1 + $0x198] sm:$0xff] }
 0x11a   : > { %3447 = vrot.lane.b32.xlu0 %v3417_v20, %s5228_s12  ;;  %3449 = vrot.lane.b32.xlu1 %v3418_v32, %s5228_s12 }
 0x11c   : > { %4648 = vmatmul.msk.f32.vlgmr.msra.gmra.mxu2 %vm489_vm3, %v4627_v37  ;;  %4669 = vmatmul.msk.f32.vlgmr.msra.gmra.mxu3 %vm489_vm3, %v4627_v37  ;;  %v2304_v45 = vpop.permute.xlu0 %2303  ;;  %v2306_v62 = vpop.permute.xlu1 %2305 }
 0x11d   : > { %3451 = vrot.lane.b32.xlu2 %v3419_v38, %s5228_s12  ;;  %v2330_v52 = vsel %vm2327_vm10, %v2304_v45, %v2306_v62  ;;  %v2331_v39 = vsel %vm2327_vm10, %v2306_v62, %v5953_v44  ;;  %v258_v44 = vld [vmem:[%s8235_s2] sm:$0xff]  ;;  %v6111_v37 = vpop.f32.mrf.mxu0  ;;  %v6113_v38 = vpop.f32.mrf.mxu1 }
 0x11e   : > { %4754 = vmatpush.msk.msrb.mxu2 %vm5615_vm6, %v2330_v52  ;;  %4775 = vmatpush.msk.msrb.mxu3 %vm5621_vm7, %v2331_v39  ;;  %8277 = vst [vmem:[#allocation16_spill] sm:$0xff] %v6111_v37 }
 0x11f   : > { %v6057_v6 = vpop.permute.xlu2 %2707  ;;  %v6059_v53 = vpop.f32.mrf.mxu2  ;;  %4602 = vmatmul.msk.f32.gmra.mxu0 %vm489_vm3, %v4581_v46  ;;  %4623 = vmatmul.msk.f32.gmra.mxu1 %vm489_vm3, %v4581_v46  ;;  %8278 = vst [vmem:[#allocation17_spill] sm:$0xff] %v6113_v38  ;;  %v4583_v46 = vld [vmem:[%s8234_s1 + $0x170] sm:$0xff] }
 0x120   : > { %8273 = vst [vmem:[#allocation12_spill] sm:$0xff] %v6059_v53  ;;  %v6070_v25 = vpop.f32.mrf.mxu3  ;;  %v4691_v53 = vld [vmem:[%s8234_s1 + $0x230] sm:$0xff] }
 0x121   : > { %8274 = vst [vmem:[#allocation13_spill] sm:$0xff] %v6070_v25 }
 0x122   : > { %276 = vperm.xlu0 %5082, %v258_v44   ;;  %281 = vperm.xlu1 %5083, %v259_v54   ;;  %v266_v44 = vld [vmem:[%s8235_s2 + $0x40] sm:$0xff] }
 0x124   : > { %4649 = vmatmul.msk.f32.gmra.mxu2 %vm489_vm3, %v4628_v59  ;;  %4670 = vmatmul.msk.f32.gmra.mxu3 %vm489_vm3, %v4628_v59  ;;  %v2710_v55 = vpop.permute.xlu0 %2709  ;;  %v2712_v12 = vpop.permute.xlu1 %2711  ;;  %v265_v59 = vld [vmem:[%s8235_s2 + $0x38] sm:$0xff] }
 0x125   : > { %286 = vperm.xlu2 %5084, %v260_v28   ;;  %v2724_v10 = vsel %vm2715_vm11, %v2710_v55, %v2712_v12  ;;  %v2725_v18 = vsel %vm2715_vm11, %v2712_v12, %v5988_v17  ;;  %v261_v17 = vld [vmem:[%s8235_s2 + $0x18] sm:$0xff]  ;;  %v6150_v28 = vpop.f32.mrf.mxu0  ;;  %v6152_v55 = vpop.f32.mrf.mxu1 }
 0x126   : > { %v2744_v21 = vsel %vm5369_vm0, %v2724_v10, 0.0  ;;  %v2745_v20 = vsel %vm5376_vm1, %v2725_v18, 0.0  ;;  %v4584_v10 = vld [vmem:[%s8234_s1 + $0x178] sm:$0xff] }
 0x127   : > { %v6092_v32 = vpop.permute.xlu2 %2701  ;;  %v6094_v1 = vpop.f32.mrf.mxu2  ;;  %4603 = vmatmul.msk.f32.gmra.mxu0 %vm489_vm3, %v4582_v13  ;;  %4624 = vmatmul.msk.f32.gmra.mxu1 %vm489_vm3, %v4582_v13 }
 0x128   : > { %8275 = vst [vmem:[#allocation14_spill] sm:$0xff] %v6094_v1  ;;  %v6104_v35 = vpop.f32.mrf.mxu3  ;;  %4809 = vmatpush.msk.msrb.mxu0 %vm538_vm2, %v2744_v21  ;;  %4830 = vmatpush.msk.msrb.mxu1 %vm538_vm2, %v2745_v20 }
 0x129   : > { %8276 = vst [vmem:[#allocation15_spill] sm:$0xff] %v6104_v35  ;;  %v4690_v35 = vld [vmem:[%s8234_s1 + $0x228] sm:$0xff] }
 0x12a   : > { %301 = vperm.xlu0 %5082, %v263_v34   ;;  %291 = vperm.xlu1 %5083, %v261_v17   ;;  %v269_v17 = vld [vmem:[%s8235_s2 + $0x58] sm:$0xff] }
 0x12c   : > { %4650 = vmatmul.msk.f32.gmra.mxu2 %vm489_vm3, %v4629_v36  ;;  %4671 = vmatmul.msk.f32.gmra.mxu3 %vm489_vm3, %v4629_v36  ;;  %v2298_v45 = vpop.permute.xlu0 %2297  ;;  %v2300_v62 = vpop.permute.xlu1 %2299 }
 0x12d   : > { %296 = vperm.xlu2 %5084, %v262_v40   ;;  %v2328_v4 = vsel %vm2327_vm10, %v2298_v45, %v2300_v62  ;;  %v2329_v11 = vsel %vm2327_vm10, %v2300_v62, %v6023_v24  ;;  %v264_v24 = vld [vmem:[%s8235_s2 + $0x30] sm:$0xff]  ;;  %v4631_v40 = vld [vmem:[%s8234_s1 + $0x1a0] sm:$0xff] }
 0x12e   : > { %4755 = vmatpush.msk.msrb.mxu2 %vm5615_vm6, %v2328_v4  ;;  %4776 = vmatpush.msk.msrb.mxu3 %vm5621_vm7, %v2329_v11  ;;  %v268_v45 = vld [vmem:[%s8235_s2 + $0x50] sm:$0xff]  ;;  %v4685_v4 = vld [vmem:[%s8234_s1 + $0x200] sm:$0xff] }
 0x12f   : > { %v6130_v52 = vpop.permute.xlu2 %2695  ;;  %v6132_v39 = vpop.f32.mrf.mxu2  ;;  %4604 = vmatmul.msk.f32.gmra.mxu0 %vm489_vm3, %v4583_v46  ;;  %4625 = vmatmul.msk.f32.gmra.mxu1 %vm489_vm3, %v4583_v46 }
 0x130   : > { %v6142_v54 = vpop.f32.mrf.mxu3 }
 0x132   : > { %316 = vperm.xlu0 %5082, %v266_v44   ;;  %306 = vperm.xlu1 %5083, %v264_v24  }
 0x134   : > { %4651 = vmatmul.msk.f32.gmra.mxu2 %vm489_vm3, %v4630_v60  ;;  %4672 = vmatmul.msk.f32.gmra.mxu3 %vm489_vm3, %v4630_v60  ;;  %v2704_v12 = vpop.permute.xlu0 %2703  ;;  %v2706_v13 = vpop.permute.xlu1 %2705 }
 0x135   : > { %311 = vperm.xlu2 %5084, %v265_v59   ;;  %v2722_v18 = vsel %vm2715_vm11, %v2704_v12, %v2706_v13  ;;  %v2723_v21 = vsel %vm2715_vm11, %v2706_v13, %v6057_v6  ;;  %v267_v6 = vld [vmem:[%s8235_s2 + $0x48] sm:$0xff]  ;;  %v270_v13 = vld [vmem:[%s8235_s2 + $0x60] sm:$0xff] }
 0x136   : > { %4810 = vmatpush.msk.msrb.mxu0 %vm5369_vm0, %v2722_v18  ;;  %4831 = vmatpush.msk.msrb.mxu1 %vm5376_vm1, %v2723_v21  ;;  %v4632_v18 = vld [vmem:[%s8234_s1 + $0x1a8] sm:$0xff] }
 0x137   : > { %v2690_v20 = vpop.permute.xlu2 %2689  ;;  %v6166_v34 = vpop.f32.mrf.mxu2  ;;  %4605 = vmatmul.msk.f32.gmra.mxu0 %vm489_vm3, %v4584_v10  ;;  %4626 = vmatmul.msk.f32.gmra.mxu1 %vm489_vm3, %v4584_v10  ;;  %v271_v21 = vld [vmem:[%s8235_s2 + $0x68] sm:$0xff] }
 0x138   : > { %8279 = vst [vmem:[#allocation18_spill] sm:$0xff] %v6166_v34  ;;  %v6176_v36 = vpop.f32.mrf.mxu3 }
 0x139   : > { %8280 = vst [vmem:[#allocation19_spill] sm:$0xff] %v6176_v36 }
 0x13a   : > { %331 = vperm.xlu0 %5082, %v269_v17   ;;  %321 = vperm.xlu1 %5083, %v267_v6  }
 0x13c   : > { %4652 = vmatmul.msk.f32.gmra.mxu2 %vm489_vm3, %v4631_v40  ;;  %4673 = vmatmul.msk.f32.gmra.mxu3 %vm489_vm3, %v4631_v40  ;;  %v2698_v62 = vpop.permute.xlu0 %2697  ;;  %v2700_v46 = vpop.permute.xlu1 %2699  ;;  %v4686_v40 = vld [vmem:[%s8234_s1 + $0x208] sm:$0xff] }
 0x13d   : > { %326 = vperm.xlu2 %5084, %v268_v45   ;;  %v2720_v11 = vsel %vm2715_vm11, %v2698_v62, %v2700_v46  ;;  %v2721_v44 = vsel %vm2715_vm11, %v2700_v46, %v6092_v32  ;;  %v6192_v24 = vpop.f32.mrf.mxu0  ;;  %v6194_v60 = vpop.f32.mrf.mxu1  ;;  %v272_v32 = vld [vmem:[%s8235_s2 + $0x70] sm:$0xff] }
 0x13e   : > { %8281 = vst [vmem:[#allocation20_spill] sm:$0xff] %v6192_v24  ;;  %4811 = vmatpush.msk.msrb.mxu0 %vm5369_vm0, %v2720_v11  ;;  %4832 = vmatpush.msk.msrb.mxu1 %vm5376_vm1, %v2721_v44  ;;  %v4637_v24 = vld [vmem:[%s8234_s1 + $0x1d0] sm:$0xff] }
 0x13f   : > { %8282 = vst [vmem:[#allocation21_spill] sm:$0xff] %v6194_v60  ;;  %v3151_v59 = vpop.permute.xlu2 %3150  ;;  %v6200_v12 = vpop.f32.mrf.mxu2  ;;  %4702 = vmatmul.msk.f32.vlgmr.msra.gmra.mxu0 %vm489_vm3, %v4685_v4  ;;  %4719 = vmatmul.msk.f32.vlgmr.msra.gmra.mxu1 %vm489_vm3, %v4685_v4 }
 0x140   : > { %v6210_v10 = vpop.f32.mrf.mxu3 }
 0x142   : > { %346 = vperm.xlu0 %5082, %v272_v32   ;;  %336 = vperm.xlu1 %5083, %v270_v13   ;;  %v4633_v13 = vld [vmem:[%s8234_s1 + $0x1b0] sm:$0xff] }
 0x144   : > { %4653 = vmatmul.msk.f32.gmra.mxu2 %vm489_vm3, %v4632_v18  ;;  %4674 = vmatmul.msk.f32.gmra.mxu3 %vm489_vm3, %v4632_v18  ;;  %v2692_v17 = vpop.permute.xlu0 %2691  ;;  %v2694_v6 = vpop.permute.xlu1 %2693 }
 0x145   : > { %341 = vperm.xlu2 %5084, %v271_v21   ;;  %v2718_v45 = vsel %vm2715_vm11, %v2692_v17, %v2694_v6  ;;  %v2719_v62 = vsel %vm2715_vm11, %v2694_v6, %v6130_v52  ;;  %v6226_v46 = vpop.f32.mrf.mxu0  ;;  %v6228_v4 = vpop.f32.mrf.mxu1  ;;  %v273_v52 = vld [vmem:[%s8235_s2 + $0x78] sm:$0xff]  ;;  %v4687_v17 = vld [vmem:[%s8234_s1 + $0x210] sm:$0xff] }
 0x146   : > { %8283 = vst [vmem:[#allocation22_spill] sm:$0xff] %v6226_v46  ;;  %4812 = vmatpush.msk.msrb.mxu0 %vm5369_vm0, %v2718_v45  ;;  %4833 = vmatpush.msk.msrb.mxu1 %vm5376_vm1, %v2719_v62 }
 0x147   : > { %8284 = vst [vmem:[#allocation23_spill] sm:$0xff] %v6228_v4  ;;  %v6234_v11 = vpop.permute.xlu2 %5063  ;;  %v6236_v44 = vpop.f32.mrf.mxu2  ;;  %4703 = vmatmul.msk.f32.gmra.mxu0 %vm489_vm3, %v4686_v40  ;;  %4720 = vmatmul.msk.f32.gmra.mxu1 %vm489_vm3, %v4686_v40 }
 0x148   : > { %8285 = vst [vmem:[#allocation24_spill] sm:$0xff] %v6236_v44  ;;  %v6243_v32 = vpop.f32.mrf.mxu3 }
 0x149   : > { %8286 = vst [vmem:[#allocation25_spill] sm:$0xff] %v6243_v32 }
 0x14a   : > { %351 = vperm.xlu1 %5083, %v273_v52  }
 0x14c   : > { %4654 = vmatmul.msk.f32.gmra.mxu2 %vm489_vm3, %v4633_v13  ;;  %4675 = vmatmul.msk.f32.gmra.mxu3 %vm489_vm3, %v4633_v13  ;;  %v2686_v18 = vpop.permute.xlu0 %2685  ;;  %v2688_v21 = vpop.permute.xlu1 %2687 }
 0x14d   : > { %v2716_v6 = vsel %vm2715_vm11, %v2686_v18, %v2688_v21  ;;  %v2717_v40 = vsel %vm2715_vm11, %v2688_v21, %v2690_v20  ;;  %v6255_v45 = vpop.f32.mrf.mxu0  ;;  %v6257_v62 = vpop.f32.mrf.mxu1  ;;  %v4634_v20 = vld [vmem:[%s8234_s1 + $0x1b8] sm:$0xff] }
 0x14e   : > { %4813 = vmatpush.msk.msrb.mxu0 %vm5369_vm0, %v2716_v6  ;;  %4834 = vmatpush.msk.msrb.mxu1 %vm5376_vm1, %v2717_v40  ;;  %v4688_v21 = vld [vmem:[%s8234_s1 + $0x218] sm:$0xff] }
 0x14f   : > { %v3472_v52 = vpop.permute.xlu2 %3471  ;;  %v6263_v13 = vpop.f32.mrf.mxu2  ;;  %4704 = vmatmul.msk.f32.gmra.mxu0 %vm489_vm3, %v4687_v17  ;;  %4721 = vmatmul.msk.f32.gmra.mxu1 %vm489_vm3, %v4687_v17 }
 0x150   : > { %8287 = vst [vmem:[#allocation26_spill] sm:$0xff] %v6263_v13  ;;  %v6267_v18 = vpop.f32.mrf.mxu3 }
 0x151   : > { %8288 = vst [vmem:[#allocation27_spill] sm:$0xff] %v6267_v18 }
 0x154   : > { %4655 = vmatmul.msk.f32.gmra.mxu2 %vm489_vm3, %v4634_v20  ;;  %4676 = vmatmul.msk.f32.gmra.mxu3 %vm489_vm3, %v4634_v20  ;;  %v3147_v29 = vpop.permute.xlu0 %3146  ;;  %v3149_v31 = vpop.permute.xlu1 %3148 }
 0x155   : > { %v3161_v6 = vsel %vm3152_vm12, %v3147_v29, %v3149_v31  ;;  %v3162_v17 = vsel %vm3152_vm12, %v3149_v31, %v3151_v59  ;;  %v6279_v40 = vpop.f32.mrf.mxu0  ;;  %v6281_v36 = vpop.f32.mrf.mxu1  ;;  %v4635_v59 = vld [vmem:[%s8234_s1 + $0x1c0] sm:$0xff] }
 0x156   : > { %8289 = vst [vmem:[#allocation28_spill] sm:$0xff] %v6279_v40  ;;  %4867 = vmatpush.msk.msra.mxu2 %vm538_vm2, %v3161_v6  ;;  %4884 = vmatpush.msk.msra.mxu3 %vm538_vm2, %v3162_v17  ;;  %v4689_v6 = vld [vmem:[%s8234_s1 + $0x220] sm:$0xff] }
 0x157   : > { %8290 = vst [vmem:[#allocation29_spill] sm:$0xff] %v6281_v36  ;;  %v6285_v34 = vpop.permute.xlu2 %5078  ;;  %v6287_v20 = vpop.f32.mrf.mxu2  ;;  %4705 = vmatmul.msk.f32.gmra.mxu0 %vm489_vm3, %v4688_v21  ;;  %4722 = vmatmul.msk.f32.gmra.mxu1 %vm489_vm3, %v4688_v21 }
 0x158   : > { %8291 = vst [vmem:[#allocation30_spill] sm:$0xff] %v6285_v34  ;;  %v6291_v48 = vpop.f32.mrf.mxu3 }
 0x15c   : > { %4656 = vmatmul.msk.f32.gmra.mxu2 %vm489_vm3, %v4635_v59  ;;  %4677 = vmatmul.msk.f32.gmra.mxu3 %vm489_vm3, %v4635_v59  ;;  %v6298_v29 = vpop.permute.xlu0 %5053  ;;  %v6300_v31 = vpop.permute.xlu1 %5058 }
 0x15d   : > { %v6305_v17 = vpop.f32.mrf.mxu0  ;;  %v6307_v21 = vpop.f32.mrf.mxu1 }
 0x15e   : > { %8292 = vst [vmem:[#allocation31_spill] sm:$0xff] %v6307_v21 }
 0x15f   : > { %v3470_v36 = vpop.permute.xlu2 %3469  ;;  %v6309_v40 = vpop.f32.mrf.mxu2  ;;  %4706 = vmatmul.msk.f32.gmra.mxu0 %vm489_vm3, %v4689_v6  ;;  %4723 = vmatmul.msk.f32.gmra.mxu1 %vm489_vm3, %v4689_v6 }
 0x160   : > { %v6313_v59 = vpop.f32.mrf.mxu3 }
 0x164   : > { %4657 = vmatmul.msk.f32.gmra.mxu2 %vm489_vm3, %v4636_v7  ;;  %4678 = vmatmul.msk.f32.gmra.mxu3 %vm489_vm3, %v4636_v7  ;;  %v6320_v4 = vpop.permute.xlu0 %5068  ;;  %v6322_v46 = vpop.permute.xlu1 %5073 }
 0x165   : > { %8293 = vst [vmem:[#allocation32_spill] sm:$0xff] %v6320_v4  ;;  %v6327_v1 = vpop.f32.mrf.mxu0  ;;  %v6329_v6 = vpop.f32.mrf.mxu1 }
 0x166   : > { %8294 = vst [vmem:[#allocation33_spill] sm:$0xff] %v6322_v46 }
 0x167   : > { %8295 = vst [vmem:[#allocation34_spill] sm:$0xff] %v6327_v1  ;;  %v3464_v60 = vpop.permute.xlu2 %3463  ;;  %v6331_v3 = vpop.f32.mrf.mxu2  ;;  %4707 = vmatmul.msk.f32.gmra.mxu0 %vm489_vm3, %v4690_v35  ;;  %4724 = vmatmul.msk.f32.gmra.mxu1 %vm489_vm3, %v4690_v35 }
 0x168   : > { %8296 = vst [vmem:[#allocation35_spill] sm:$0xff] %v6329_v6  ;;  %v6335_v7 = vpop.f32.mrf.mxu3 }
 0x16c   : > { %4658 = vmatmul.msk.f32.gmra.mxu2 %vm489_vm3, %v4637_v24  ;;  %4679 = vmatmul.msk.f32.gmra.mxu3 %vm489_vm3, %v4637_v24  ;;  %v3474_v50 = vpop.permute.xlu0 %3473  ;;  %v3476_v25 = vpop.permute.xlu1 %3475 }
 0x16d   : > { %v3486_v43 = vsel %vm3477_vm13, %v3472_v52, %v3474_v50  ;;  %v3487_v35 = vsel %vm3477_vm13, %v3474_v50, %v3476_v25  ;;  %v6347_v41 = vpop.f32.mrf.mxu0  ;;  %v6349_v19 = vpop.f32.mrf.mxu1 }
 0x16e   : > { %8297 = vst [vmem:[#allocation36_spill] sm:$0xff] %v6347_v41  ;;  %v3506_v23 = vsel %vm5615_vm6, %v3486_v43, 0.0  ;;  %v3507_v24 = vsel %vm5621_vm7, %v3487_v35, 0.0  ;;  %v4638_v43 = vld [vmem:[%s8234_s1 + $0x1d8] sm:$0xff] }
 0x16f   : > { %8298 = vst [vmem:[#allocation37_spill] sm:$0xff] %v6349_v19  ;;  %v3458_v18 = vpop.permute.xlu2 %3457  ;;  %v6355_v13 = vpop.f32.mrf.mxu2  ;;  %4708 = vmatmul.msk.f32.gmra.mxu0 %vm489_vm3, %v4691_v53  ;;  %4725 = vmatmul.msk.f32.gmra.mxu1 %vm489_vm3, %v4691_v53  ;;  %v4692_v53 = vld [vmem:[%s8234_s1 + $0x238] sm:$0xff] }
 0x170   : > { %v6359_v52 = vpop.f32.mrf.mxu3  ;;  %4917 = vmatpush.msk.msra.mxu0 %vm538_vm2, %v3506_v23  ;;  %4938 = vmatpush.msk.msra.mxu1 %vm538_vm2, %v3507_v24 }
 0x174   : > { %4659 = vmatmul.msk.f32.gmra.mxu2 %vm489_vm3, %v4638_v43  ;;  %4680 = vmatmul.msk.f32.gmra.mxu3 %vm489_vm3, %v4638_v43  ;;  %v3466_v50 = vpop.permute.xlu0 %3465  ;;  %v3468_v25 = vpop.permute.xlu1 %3467 }
 0x175   : > { %v3484_v35 = vsel %vm3477_vm13, %v3466_v50, %v3468_v25  ;;  %v3485_v23 = vsel %vm3477_vm13, %v3468_v25, %v3470_v36  ;;  %v6373_v19 = vpop.f32.mrf.mxu0  ;;  %v6375_v24 = vpop.f32.mrf.mxu1  ;;  %v4639_v36 = vld [vmem:[%s8234_s1 + $0x1e0] sm:$0xff] }
 0x176   : > { %4918 = vmatpush.msk.msra.mxu0 %vm5615_vm6, %v3484_v35  ;;  %4939 = vmatpush.msk.msra.mxu1 %vm5621_vm7, %v3485_v23  ;;  %v4693_v23 = vld [vmem:[%s8234_s1 + $0x240] sm:$0xff] }
 0x177   : > { %v3452_v43 = vpop.permute.xlu2 %3451  ;;  %v6381_v41 = vpop.f32.mrf.mxu2  ;;  %4709 = vmatmul.msk.f32.gmra.mxu0 %vm489_vm3, %v4692_v53  ;;  %4726 = vmatmul.msk.f32.gmra.mxu1 %vm489_vm3, %v4692_v53 }
 0x178   : > { %v6385_v50 = vpop.f32.mrf.mxu3 }
 0x17c   : > { %4660 = vmatmul.msk.f32.gmra.mxu2 %vm489_vm3, %v4639_v36  ;;  %4681 = vmatmul.msk.f32.gmra.mxu3 %vm489_vm3, %v4639_v36  ;;  %v3460_v25 = vpop.permute.xlu0 %3459  ;;  %v3462_v35 = vpop.permute.xlu1 %3461 }
 0x17d   : > { %v3482_v6 = vsel %vm3477_vm13, %v3460_v25, %v3462_v35  ;;  %v3483_v53 = vsel %vm3477_vm13, %v3462_v35, %v3464_v60  ;;  %v6397_v38 = vpop.f32.mrf.mxu0  ;;  %v6399_v1 = vpop.f32.mrf.mxu1  ;;  %v4640_v60 = vld [vmem:[%s8234_s1 + $0x1e8] sm:$0xff] }
 0x17e   : > { %4919 = vmatpush.msk.msra.mxu0 %vm5615_vm6, %v3482_v6  ;;  %4940 = vmatpush.msk.msra.mxu1 %vm5621_vm7, %v3483_v53  ;;  %v4694_v53 = vld [vmem:[%s8234_s1 + $0x248] sm:$0xff] }
 0x17f   : > { %v6405_v36 = vpop.permute.xlu2 %286  ;;  %v6407_v37 = vpop.f32.mrf.mxu2  ;;  %4710 = vmatmul.msk.f32.gmra.mxu0 %vm489_vm3, %v4693_v23  ;;  %4727 = vmatmul.msk.f32.gmra.mxu1 %vm489_vm3, %v4693_v23 }
 0x180   : > { %v6411_v25 = vpop.f32.mrf.mxu3 }
 0x184   : > { %4661 = vmatmul.msk.f32.gmra.mxu2 %vm489_vm3, %v4640_v60  ;;  %4682 = vmatmul.msk.f32.gmra.mxu3 %vm489_vm3, %v4640_v60  ;;  %v3454_v6 = vpop.permute.xlu0 %3453  ;;  %v3456_v35 = vpop.permute.xlu1 %3455 }
 0x185   : > { %v3480_v46 = vsel %vm3477_vm13, %v3454_v6, %v3456_v35  ;;  %v3481_v23 = vsel %vm3477_vm13, %v3456_v35, %v3458_v18  ;;  %v6423_v34 = vpop.f32.mrf.mxu0  ;;  %v6425_v32 = vpop.f32.mrf.mxu1  ;;  %v4641_v18 = vld [vmem:[%s8234_s1 + $0x1f0] sm:$0xff] }
 0x186   : > { %4920 = vmatpush.msk.msra.mxu0 %vm5615_vm6, %v3480_v46  ;;  %4941 = vmatpush.msk.msra.mxu1 %vm5621_vm7, %v3481_v23  ;;  %v4695_v23 = vld [vmem:[%s8234_s1 + $0x250] sm:$0xff] }
 0x187   : > { %v6431_v60 = vpop.permute.xlu2 %296  ;;  %v6433_v44 = vpop.f32.mrf.mxu2  ;;  %4711 = vmatmul.msk.f32.gmra.mxu0 %vm489_vm3, %v4694_v53  ;;  %4728 = vmatmul.msk.f32.gmra.mxu1 %vm489_vm3, %v4694_v53 }
 0x188   : > { %8299 = vst [vmem:[#allocation38_spill] sm:$0xff] %v6433_v44  ;;  %v6437_v6 = vpop.f32.mrf.mxu3 }
 0x189   : > { %8300 = vst [vmem:[#allocation39_spill] sm:$0xff] %v6437_v6 }
 0x18c   : > { %4662 = vmatmul.msk.f32.gmra.mxu2 %vm489_vm3, %v4641_v18  ;;  %4683 = vmatmul.msk.f32.gmra.mxu3 %vm489_vm3, %v4641_v18  ;;  %v3448_v46 = vpop.permute.xlu0 %3447  ;;  %v3450_v35 = vpop.permute.xlu1 %3449 }
 0x18d   : > { %v3478_v44 = vsel %vm3477_vm13, %v3448_v46, %v3450_v35  ;;  %v3479_v53 = vsel %vm3477_vm13, %v3450_v35, %v3452_v43  ;;  %v1358_v4 = vpop.f32.mrf.mxu0  ;;  %v1423_v6 = vpop.f32.mrf.mxu1 }
 0x18e   : > { %4921 = vmatpush.msk.msra.mxu0 %vm5615_vm6, %v3478_v44  ;;  %4942 = vmatpush.msk.msra.mxu1 %vm5621_vm7, %v3479_v53 }
 0x18f   : > { %v312_v16 = vpop.permute.xlu2 %311  ;;  %v6453_v18 = vpop.f32.mrf.mxu2  ;;  %4712 = vmatmul.msk.f32.gmra.mxu0 %vm489_vm3, %v4695_v23  ;;  %4729 = vmatmul.msk.f32.gmra.mxu1 %vm489_vm3, %v4695_v23 }
 0x190   : > { %v689_v21 = vadd.f32 %v6150_v28, %v312_v16  ;;  %v690_v46 = vadd.f32 %v6152_v55, %v312_v16  ;;  %v6459_v43 = vpop.f32.mrf.mxu3  ;;  %v4696_v16 = vld [vmem:[%s8234_s1 + $0x258] sm:$0xff] }
 0x192   : > { %v1063_v57 = vadd.f32 %v6287_v20, %v689_v21  ;;  %v1064_v44 = vadd.f32 %v6291_v48, %v690_v46 }
 0x194   : > { %4663 = vmatmul.msk.f32.gmra.mxu2 %vm489_vm3, %v4642_v56  ;;  %4684 = vmatmul.msk.f32.gmra.mxu3 %vm489_vm3, %v4642_v56  ;;  %v6468_v35 = vpop.permute.xlu0 %276  ;;  %v6470_v23 = vpop.permute.xlu1 %281  ;;  %v6476_v28 = vadd.f32 %v6373_v19, %v1063_v57  ;;  %v6479_v55 = vadd.f32 %v6375_v24, %v1064_v44  ;;  %v4735_v19 = vld [vmem:[%s8234_s1 + $0x280] sm:$0xff] }
 0x195   : > { %8301 = vst [vmem:[#allocation40_spill] sm:$0xff] %v6468_v35  ;;  %v6481_v20 = vpop.f32.mrf.mxu0  ;;  %v6483_v48 = vpop.f32.mrf.mxu1 }
 0x196   : > { %8302 = vst [vmem:[#allocation41_spill] sm:$0xff] %v6470_v23 }
 0x197   : > { %v327_v21 = vpop.permute.xlu2 %326  ;;  %v6485_v53 = vpop.f32.mrf.mxu2  ;;  %4713 = vmatmul.msk.f32.gmra.mxu0 %vm489_vm3, %v4696_v16  ;;  %4730 = vmatmul.msk.f32.gmra.mxu1 %vm489_vm3, %v4696_v16 }
 0x198   : > { %v695_v46 = vadd.f32 %v5817_v30, %v327_v21  ;;  %v696_v56 = vadd.f32 %v5822_v33, %v327_v21  ;;  %v6490_v23 = vpop.f32.mrf.mxu3  ;;  %v4697_v33 = vld [vmem:[%s8234_s1 + $0x260] sm:$0xff] }
 0x19a   : > { %v1069_v24 = vadd.f32 %v6355_v13, %v695_v46  ;;  %v1070_v57 = vadd.f32 %v6359_v52, %v696_v56  ;;  %v4736_v56 = vld [vmem:[%s8234_s1 + $0x288] sm:$0xff] }
 0x19c   : > { %4756 = vmatmul.msk.f32.vlgmr.msrb.gmra.mxu2 %vm489_vm3, %v4735_v19  ;;  %4777 = vmatmul.msk.f32.vlgmr.msrb.gmra.mxu3 %vm489_vm3, %v4735_v19  ;;  %v6500_v44 = vpop.permute.xlu0 %301  ;;  %v6502_v30 = vpop.permute.xlu1 %291  ;;  %v6507_v16 = vadd.f32 %v1358_v4, %v1069_v24  ;;  %v6509_v21 = vadd.f32 %v1423_v6, %v1070_v57  ;;  %v4698_v19 = vld [vmem:[%s8234_s1 + $0x268] sm:$0xff] }
 0x19d   : > { %8303 = vst [vmem:[#allocation42_spill] sm:$0xff] %v6502_v30  ;;  %v6511_v35 = vpop.f32.mrf.mxu0  ;;  %v6513_v13 = vpop.f32.mrf.mxu1 }
 0x19e   : > { %8304 = vst [vmem:[#allocation43_spill] sm:$0xff] %v6507_v16 }
 0x19f   : > { %8305 = vst [vmem:[#allocation44_spill] sm:$0xff] %v6509_v21  ;;  %v6515_v52 = vpop.f32.mrf.mxu2  ;;  %4714 = vmatmul.msk.f32.gmra.mxu0 %vm489_vm3, %v4697_v33  ;;  %4731 = vmatmul.msk.f32.gmra.mxu1 %vm489_vm3, %v4697_v33 }
 0x1a0   : > { %8306 = vst [vmem:[#allocation45_spill] sm:$0xff] %v6515_v52  ;;  %v6518_v46 = vpop.f32.mrf.mxu3 }
 0x1a1   : > { %8307 = vst [vmem:[#allocation46_spill] sm:$0xff] %v6518_v46  ;;  %v679_v46 = vadd.f32 %v5919_v15, %v6405_v36 }
 0x1a4   : > { %4757 = vmatmul.msk.f32.gmra.mxu2 %vm489_vm3, %v4736_v56  ;;  %4778 = vmatmul.msk.f32.gmra.mxu3 %vm489_vm3, %v4736_v56  ;;  %v317_v4 = vpop.permute.xlu0 %316  ;;  %v6526_v6 = vpop.permute.xlu1 %306  ;;  %v680_v56 = vadd.f32 %v5927_v14, %v6405_v36  ;;  %v1053_v14 = vadd.f32 %v6132_v39, %v679_v46 }
 0x1a5   : > { %v691_v24 = vadd.f32 %v5752_v26, %v317_v4  ;;  %v692_v57 = vadd.f32 %v5760_v27, %v317_v4  ;;  %v6533_v33 = vpop.f32.mrf.mxu0  ;;  %v6535_v30 = vpop.f32.mrf.mxu1  ;;  %v4737_v27 = vld [vmem:[%s8234_s1 + $0x290] sm:$0xff] }
 0x1a6   : > { %v1445_v46 = vadd.f32 %v6255_v45, %v1053_v14 }
 0x1a7   : > { %v1065_v52 = vadd.f32 %v6309_v40, %v691_v24  ;;  %v1066_v21 = vadd.f32 %v6313_v59, %v692_v57  ;;  %v6543_v16 = vpop.f32.mrf.mxu2  ;;  %4715 = vmatmul.msk.f32.gmra.mxu0 %vm489_vm3, %v4698_v19  ;;  %4732 = vmatmul.msk.f32.gmra.mxu1 %vm489_vm3, %v4698_v19  ;;  %v1054_v40 = vadd.f32 %v6142_v54, %v680_v56  ;;  %v4699_v19 = vld [vmem:[%s8234_s1 + $0x270] sm:$0xff] }
 0x1a8   : > { %v6546_v26 = vpop.f32.mrf.mxu3 }
 0x1a9   : > { %8308 = vst [vmem:[#allocation47_spill] sm:$0xff] %v6546_v26  ;;  %v6553_v15 = vadd.f32 %v6397_v38, %v1065_v52  ;;  %v6558_v59 = vadd.f32 %v6399_v1, %v1066_v21  ;;  %v1446_v24 = vadd.f32 %v6257_v62, %v1054_v40 }
 0x1ac   : > { %4758 = vmatmul.msk.f32.gmra.mxu2 %vm489_vm3, %v4737_v27  ;;  %4779 = vmatmul.msk.f32.gmra.mxu3 %vm489_vm3, %v4737_v27  ;;  %v332_v36 = vpop.permute.xlu0 %331  ;;  %v322_v4 = vpop.permute.xlu1 %321 }
 0x1ad   : > { %v697_v38 = vadd.f32 %v5849_v42, %v332_v36  ;;  %v698_v52 = vadd.f32 %v5862_v47, %v332_v36  ;;  %v693_v39 = vadd.f32 %v5784_v63, %v322_v4  ;;  %v694_v54 = vadd.f32 %v5789_v0, %v322_v4  ;;  %v1370_v1 = vpop.f32.mrf.mxu0  ;;  %v1435_v21 = vpop.f32.mrf.mxu1 }
 0x1ae   : > { %v683_v4 = vadd.f32 %v6000_v8, %v6431_v60  ;;  %v4739_v8 = vld [vmem:[%s8234_s1 + $0x2a0] sm:$0xff] }
 0x1af   : > { %v1071_v57 = vadd.f32 %v6381_v41, %v697_v38  ;;  %v1072_v56 = vadd.f32 %v6385_v50, %v698_v52  ;;  %v1067_v27 = vadd.f32 %v6331_v3, %v693_v39  ;;  %v1068_v42 = vadd.f32 %v6335_v7, %v694_v54  ;;  %v1722_v26 = vpop.f32.mrf.mxu2  ;;  %4716 = vmatmul.msk.f32.gmra.mxu0 %vm489_vm3, %v4699_v19  ;;  %v4738_v41 = vld [vmem:[%s8234_s1 + $0x298] sm:$0xff] }
 0x1b0   : > { %v6576_v63 = vadd.f32 %v1722_v26, %v1445_v46  ;;  %v1787_v0 = vpop.f32.mrf.mxu3  ;;  %4733 = vmatmul.msk.f32.gmra.mxu1 %vm489_vm3, %v4699_v19  ;;  %v684_v19 = vadd.f32 %v6002_v9, %v6431_v60  ;;  %v5055_v60 = vunpack.i.l.bf16 %v6298_v29  ;;  %v5065_v46 = vunpack.i.l.bf16 %v6234_v11 }
 0x1b1   : > { %v6579_v47 = vadd.f32 %v1787_v0, %v1446_v24  ;;  %v6585_v45 = vadd.f32 %v6423_v34, %v1067_v27  ;;  %v6588_v3 = vadd.f32 %v6425_v32, %v1068_v42  ;;  %v6591_v62 = vadd.f32 %v6481_v20, %v1071_v57  ;;  %v4700_v34 = vld [vmem:[%s8234_s1 + $0x278] sm:$0xff]  ;;  %v8309_v27 = vld [vmem:[#allocation31_spill] sm:$0xff] }
 0x1b2   : > { %v6594_v7 = vadd.f32 %v6483_v48, %v1072_v56  ;;  %v685_v57 = vadd.f32 %v6051_v5, %v6500_v44 }
 0x1b4   : > { %4759 = vmatmul.msk.f32.gmra.mxu2 %vm489_vm3, %v4738_v41  ;;  %4780 = vmatmul.msk.f32.gmra.mxu3 %vm489_vm3, %v4738_v41  ;;  %v347_v50 = vpop.permute.xlu0 %346  ;;  %v337_v26 = vpop.permute.xlu1 %336  ;;  %v8310_v41 = vld [vmem:[#allocation11_spill] sm:$0xff] }
 0x1b5   : > { %v703_v14 = vadd.f32 %v5971_v49, %v347_v50  ;;  %v704_v32 = vadd.f32 %v5973_v51, %v347_v50  ;;  %v699_v20 = vadd.f32 %v5889_v58, %v337_v26  ;;  %v700_v40 = vadd.f32 %v5897_v2, %v337_v26  ;;  %v1373_v48 = vpop.f32.mrf.mxu0  ;;  %v1438_v36 = vpop.f32.mrf.mxu1 }
 0x1b6   : > { %v5056_v2 = vunpack.i.h.bf16 %v6298_v29  ;;  %v5060_v29 = vunpack.i.l.bf16 %v6300_v31  ;;  %v5066_v26 = vunpack.i.h.bf16 %v6234_v11 }
 0x1b7   : > { %v1077_v38 = vadd.f32 %v6453_v18, %v703_v14  ;;  %v1078_v52 = vadd.f32 %v6459_v43, %v704_v32  ;;  %v1073_v49 = vadd.f32 %v6407_v37, %v699_v20  ;;  %v1074_v51 = vadd.f32 %v6411_v25, %v700_v40  ;;  %v6613_v39 = vpop.f32.mrf.mxu2  ;;  %4717 = vmatmul.msk.f32.gmra.mxu0 %vm489_vm3, %v4700_v34  ;;  %v8311_v32 = vld [vmem:[#allocation32_spill] sm:$0xff] }
 0x1b8   : > { %v6616_v58 = vpop.f32.mrf.mxu3  ;;  %4734 = vmatmul.msk.f32.gmra.mxu1 %vm489_vm3, %v4700_v34  ;;  %v1057_v18 = vadd.f32 %v6200_v12, %v683_v4  ;;  %v1058_v43 = vadd.f32 %v6210_v10, %v684_v19  ;;  %v3159_v0 = vsel %vm3152_vm12, %v5055_v60, %v5056_v2  ;;  %v5071_v20 = vunpack.i.h.bf16 %v8311_v32  ;;  %v8312_v40 = vld [vmem:[#allocation24_spill] sm:$0xff] }
 0x1b9   : > { %v6624_v9 = vadd.f32 %v6511_v35, %v1073_v49  ;;  %v6627_v37 = vadd.f32 %v6513_v13, %v1074_v51  ;;  %v6629_v25 = vadd.f32 %v1370_v1, %v1077_v38  ;;  %v6634_v54 = vadd.f32 %v1435_v21, %v1078_v52  ;;  %v4793_v13 = vld [vmem:[%s8234_s1 + $0x300] sm:$0xff]  ;;  %3235 = vmatpush.msra.mxu2 %v3159_v0  ;;  %v8313_v38 = vld [vmem:[#allocation25_spill] sm:$0xff]  ;;  %v8314_v49 = vld [vmem:[#allocation30_spill] sm:$0xff] }
 0x1ba   : > { %v5061_v1 = vunpack.i.h.bf16 %v6300_v31  ;;  %v1449_v56 = vadd.f32 %v6305_v17, %v1057_v18  ;;  %v1450_v42 = vadd.f32 %v8309_v27, %v1058_v43  ;;  %v686_v31 = vadd.f32 %v8310_v41, %v6500_v44  ;;  %v4740_v44 = vld [vmem:[%s8234_s1 + $0x2a8] sm:$0xff]  ;;  %v8319_v27 = vld [vmem:[#allocation35_spill] sm:$0xff] }
 0x1bb   : > { %v5070_v11 = vunpack.i.l.bf16 %v8311_v32  ;;  %v1059_v4 = vadd.f32 %v8312_v40, %v685_v57  ;;  %v5080_v51 = vunpack.i.l.bf16 %v8314_v49  ;;  %v8316_v43 = vld [vmem:[#allocation16_spill] sm:$0xff]  ;;  %v8323_v40 = vld [vmem:[#allocation37_spill] sm:$0xff] }
 0x1bc   : > { %4760 = vmatmul.msk.f32.gmra.mxu2 %vm489_vm3, %v4739_v8  ;;  %4781 = vmatmul.msk.f32.gmra.mxu3 %vm489_vm3, %v4739_v8  ;;  %v352_v35 = vpop.permute.xlu1 %351  ;;  %v1060_v52 = vadd.f32 %v8313_v38, %v686_v31  ;;  %v8322_v32 = vld [vmem:[#allocation36_spill] sm:$0xff] }
 0x1bd   : > { %v705_v12 = vadd.f32 %v6015_v61, %v352_v35  ;;  %v706_v10 = vadd.f32 %v6017_v22, %v352_v35  ;;  %v6646_v21 = vpop.f32.mrf.mxu0  ;;  %v6648_v24 = vpop.f32.mrf.mxu1  ;;  %v687_v35 = vadd.f32 %v8316_v43, %v6526_v6 }
 0x1bf   : > { %v1079_v61 = vadd.f32 %v6485_v53, %v705_v12  ;;  %v1080_v22 = vadd.f32 %v6490_v23, %v706_v10  ;;  %v1728_v50 = vpop.f32.mrf.mxu2  ;;  %4814 = vmatmul.msk.f32.vlgmr.msrb.gmra.mxu0 %vm489_vm3, %v4793_v13  ;;  %v3157_v53 = vsel %vm3152_vm12, %v5061_v1, %v5065_v46  ;;  %v3160_v23 = vsel %vm3152_vm12, %v5056_v2, %v5060_v29  ;;  %v8315_v2 = vld [vmem:[#allocation33_spill] sm:$0xff] }
 0x1c0   : > { %v6661_v5 = vadd.f32 %v1728_v50, %v1449_v56  ;;  %v1793_v17 = vpop.f32.mrf.mxu3  ;;  %4835 = vmatmul.msk.f32.vlgmr.msrb.gmra.mxu1 %vm489_vm3, %v4793_v13  ;;  %3236 = vmatpush.msra.mxu2 %v3157_v53  ;;  %v5076_v8 = vunpack.i.h.bf16 %v8315_v2  ;;  %v5075_v60 = vunpack.i.l.bf16 %v8315_v2  ;;  %v8317_v13 = vld [vmem:[#allocation34_spill] sm:$0xff]  ;;  %v3155_v29 = vsel %vm3152_vm12, %v5070_v11, %v5071_v20  ;;  %v8318_v10 = vld [vmem:[#allocation17_spill] sm:$0xff] }
 0x1c1   : > { %v6664_v34 = vadd.f32 %v1793_v17, %v1450_v42  ;;  %v6671_v14 = vadd.f32 %v1373_v48, %v1079_v61  ;;  %3300 = vmatpush.msra.mxu3 %v3160_v23  ;;  %v6676_v19 = vadd.f32 %v1438_v36, %v1080_v22  ;;  %v4794_v48 = vld [vmem:[%s8234_s1 + $0x308] sm:$0xff]  ;;  %v1451_v1 = vadd.f32 %v8317_v13, %v1059_v4  ;;  %v8320_v22 = vld [vmem:[#allocation26_spill] sm:$0xff] }
 0x1c2   : > { %v3158_v12 = vsel %vm3152_vm12, %v5065_v46, %v5066_v26  ;;  %v688_v57 = vadd.f32 %v8318_v10, %v6526_v6  ;;  %v1452_v42 = vadd.f32 %v8319_v27, %v1060_v52  ;;  %3237 = vmatpush.msra.mxu2 %v3155_v29  ;;  %v4741_v46 = vld [vmem:[%s8234_s1 + $0x2b0] sm:$0xff]  ;;  %v3153_v6 = vsel %vm3152_vm12, %v5076_v8, %v5080_v51  ;;  %v8321_v26 = vld [vmem:[#allocation27_spill] sm:$0xff]  ;;  %v4742_v2 = vld [vmem:[%s8234_s1 + $0x2b8] sm:$0xff] }
 0x1c3   : > { %3301 = vmatpush.msra.mxu3 %v3158_v12  ;;  %v3156_v61 = vsel %vm3152_vm12, %v5071_v20, %v5075_v60  ;;  %v1061_v50 = vadd.f32 %v8320_v22, %v687_v35  ;;  %v4796_v8 = vld [vmem:[%s8234_s1 + $0x318] sm:$0xff]  ;;  %v4743_v12 = vld [vmem:[%s8234_s1 + $0x2c0] sm:$0xff] }
 0x1c4   : > { %4761 = vmatmul.msk.f32.gmra.mxu2 %vm489_vm3, %v4740_v44  ;;  %4782 = vmatmul.msk.f32.gmra.mxu3 %vm489_vm3, %v4740_v44  ;;  %v1062_v17 = vadd.f32 %v8321_v26, %v688_v57  ;;  %v4795_v44 = vld [vmem:[%s8234_s1 + $0x310] sm:$0xff]  ;;  %v4797_v10 = vld [vmem:[%s8234_s1 + $0x320] sm:$0xff] }
 0x1c5   : > { %v6687_v18 = vpop.f32.mrf.mxu0  ;;  %v6689_v36 = vpop.f32.mrf.mxu1  ;;  %3238 = vmatpush.msra.mxu2 %v3153_v6  ;;  %3302 = vmatpush.msra.mxu3 %v3156_v61  ;;  %v1453_v20 = vadd.f32 %v8322_v32, %v1061_v50  ;;  %v4745_v26 = vld [vmem:[%s8234_s1 + $0x2d0] sm:$0xff] }
 0x1c6   : > { %v1454_v4 = vadd.f32 %v8323_v40, %v1062_v17  ;;  %v4799_v17 = vld [vmem:[%s8234_s1 + $0x330] sm:$0xff]  ;;  %v8325_v40 = vld [vmem:[#allocation44_spill] sm:$0xff] }
 0x1c7   : > { %v1731_v56 = vpop.f32.mrf.mxu2  ;;  %4815 = vmatmul.msk.f32.gmra.mxu0 %vm489_vm3, %v4794_v48 }
 0x1c8   : > { %v6700_v0 = vadd.f32 %v1731_v56, %v1451_v1  ;;  %v1796_v41 = vpop.f32.mrf.mxu3  ;;  %4836 = vmatmul.msk.f32.gmra.mxu1 %vm489_vm3, %v4794_v48 }
 0x1c9   : > { %v6703_v31 = vadd.f32 %v1796_v41, %v1452_v42 }
 0x1cc   : > { %4762 = vmatmul.msk.f32.gmra.mxu2 %vm489_vm3, %v4741_v46  ;;  %4783 = vmatmul.msk.f32.gmra.mxu3 %vm489_vm3, %v4741_v46  ;;  %v4744_v46 = vld [vmem:[%s8234_s1 + $0x2c8] sm:$0xff] }
 0x1cd   : > { %v6719_v53 = vpop.f32.mrf.mxu0  ;;  %v6721_v23 = vpop.f32.mrf.mxu1 }
 0x1cf   : > { %v1734_v11 = vpop.f32.mrf.mxu2  ;;  %4816 = vmatmul.msk.f32.gmra.mxu0 %vm489_vm3, %v4795_v44 }
 0x1d0   : > { %v6726_v38 = vadd.f32 %v1734_v11, %v1453_v20  ;;  %v1799_v52 = vpop.f32.mrf.mxu3  ;;  %4837 = vmatmul.msk.f32.gmra.mxu1 %vm489_vm3, %v4795_v44 }
 0x1d1   : > { %v6729_v48 = vadd.f32 %v1799_v52, %v1454_v4  ;;  %v4746_v52 = vld [vmem:[%s8234_s1 + $0x2d8] sm:$0xff] }
 0x1d4   : > { %4763 = vmatmul.msk.f32.gmra.mxu2 %vm489_vm3, %v4742_v2  ;;  %4784 = vmatmul.msk.f32.gmra.mxu3 %vm489_vm3, %v4742_v2  ;;  %v4800_v2 = vld [vmem:[%s8234_s1 + $0x338] sm:$0xff] }
 0x1d5   : > { %v6739_v60 = vpop.f32.mrf.mxu0  ;;  %v6741_v43 = vpop.f32.mrf.mxu1 }
 0x1d7   : > { %v1737_v35 = vpop.f32.mrf.mxu2  ;;  %4817 = vmatmul.msk.f32.gmra.mxu0 %vm489_vm3, %v4796_v8 }
 0x1d8   : > { %v6745_v13 = vadd.f32 %v1737_v35, %v6476_v28  ;;  %v1802_v1 = vpop.f32.mrf.mxu3  ;;  %4838 = vmatmul.msk.f32.gmra.mxu1 %vm489_vm3, %v4796_v8  ;;  %v5081_v28 = vunpack.i.h.bf16 %v8314_v49 }
 0x1d9   : > { %v6749_v29 = vadd.f32 %v1802_v1, %v6479_v55 }
 0x1da   : > { %v3154_v6 = vsel %vm3152_vm12, %v5080_v51, %v5081_v28 }
 0x1db   : > { %3303 = vmatpush.msra.mxu3 %v3154_v6 }
 0x1dc   : > { %4764 = vmatmul.msk.f32.gmra.mxu2 %vm489_vm3, %v4743_v12  ;;  %4785 = vmatmul.msk.f32.gmra.mxu3 %vm489_vm3, %v4743_v12 }
 0x1dd   : > { %v6760_v57 = vpop.f32.mrf.mxu0  ;;  %v6762_v56 = vpop.f32.mrf.mxu1 }
 0x1df   : > { %v1740_v55 = vpop.f32.mrf.mxu2  ;;  %4818 = vmatmul.msk.f32.gmra.mxu0 %vm489_vm3, %v4797_v10 }
 0x1e0   : > { %v6766_v27 = vadd.f32 %v1740_v55, %v6553_v15  ;;  %v1805_v42 = vpop.f32.mrf.mxu3  ;;  %4839 = vmatmul.msk.f32.gmra.mxu1 %vm489_vm3, %v4797_v10  ;;  %v4798_v15 = vld [vmem:[%s8234_s1 + $0x328] sm:$0xff]  ;;  %v4747_v55 = vld [vmem:[%s8234_s1 + $0x2e0] sm:$0xff] }
 0x1e1   : > { %v6770_v41 = vadd.f32 %v1805_v42, %v6558_v59  ;;  %v342_v42 = vpop.permute.xlu2 %341 }
 0x1e4   : > { %4765 = vmatmul.msk.f32.gmra.mxu2 %vm489_vm3, %v4744_v46  ;;  %4786 = vmatmul.msk.f32.gmra.mxu3 %vm489_vm3, %v4744_v46 }
 0x1e5   : > { %v6783_v61 = vpop.f32.mrf.mxu0  ;;  %v6785_v59 = vpop.f32.mrf.mxu1 }
 0x1e7   : > { %v1743_v22 = vpop.f32.mrf.mxu2  ;;  %4819 = vmatmul.msk.f32.gmra.mxu0 %vm489_vm3, %v4798_v15 }
 0x1e8   : > { %v6789_v49 = vadd.f32 %v1743_v22, %v6585_v45  ;;  %v1808_v51 = vpop.f32.mrf.mxu3  ;;  %4840 = vmatmul.msk.f32.gmra.mxu1 %vm489_vm3, %v4798_v15 }
 0x1e9   : > { %v6793_v50 = vadd.f32 %v1808_v51, %v6588_v3  ;;  %v8324_v3 = vld [vmem:[#allocation43_spill] sm:$0xff] }
 0x1ec   : > { %4766 = vmatmul.msk.f32.gmra.mxu2 %vm489_vm3, %v4745_v26  ;;  %4787 = vmatmul.msk.f32.gmra.mxu3 %vm489_vm3, %v4745_v26 }
 0x1ed   : > { %v6803_v45 = vpop.f32.mrf.mxu0  ;;  %v6805_v44 = vpop.f32.mrf.mxu1 }
 0x1ef   : > { %v1746_v32 = vpop.f32.mrf.mxu2  ;;  %4820 = vmatmul.msk.f32.gmra.mxu0 %vm489_vm3, %v4799_v17 }
 0x1f0   : > { %v6809_v20 = vadd.f32 %v1746_v32, %v8324_v3  ;;  %v1811_v11 = vpop.f32.mrf.mxu3  ;;  %4841 = vmatmul.msk.f32.gmra.mxu1 %vm489_vm3, %v4799_v17  ;;  %v8327_v17 = vld [vmem:[#allocation8_spill] sm:$0xff] }
 0x1f1   : > { %v6813_v4 = vadd.f32 %v1811_v11, %v8325_v40  ;;  %v702_v32 = vadd.f32 %v8327_v17, %v342_v42  ;;  %v4748_v11 = vld [vmem:[%s8234_s1 + $0x2e8] sm:$0xff]  ;;  %v8329_v40 = vld [vmem:[#allocation38_spill] sm:$0xff] }
 0x1f4   : > { %4767 = vmatmul.msk.f32.gmra.mxu2 %vm489_vm3, %v4746_v52  ;;  %4788 = vmatmul.msk.f32.gmra.mxu3 %vm489_vm3, %v4746_v52 }
 0x1f5   : > { %v6823_v8 = vpop.f32.mrf.mxu0  ;;  %v6825_v35 = vpop.f32.mrf.mxu1 }
 0x1f7   : > { %v1749_v1 = vpop.f32.mrf.mxu2  ;;  %4821 = vmatmul.msk.f32.gmra.mxu0 %vm489_vm3, %v4800_v2 }
 0x1f8   : > { %v6829_v12 = vadd.f32 %v1749_v1, %v6591_v62  ;;  %v1814_v10 = vpop.f32.mrf.mxu3  ;;  %4842 = vmatmul.msk.f32.gmra.mxu1 %vm489_vm3, %v4800_v2  ;;  %v4801_v62 = vld [vmem:[%s8234_s1 + $0x340] sm:$0xff] }
 0x1f9   : > { %v6833_v28 = vadd.f32 %v1814_v10, %v6594_v7  ;;  %v8326_v7 = vld [vmem:[#allocation7_spill] sm:$0xff] }
 0x1fa   : > { %v701_v22 = vadd.f32 %v8326_v7, %v342_v42  ;;  %v8330_v2 = vld [vmem:[#allocation39_spill] sm:$0xff] }
 0x1fb   : > { %v1076_v1 = vadd.f32 %v8330_v2, %v702_v32  ;;  %v8335_v2 = vld [vmem:[#allocation40_spill] sm:$0xff] }
 0x1fc   : > { %4768 = vmatmul.msk.f32.gmra.mxu2 %vm489_vm3, %v4747_v55  ;;  %4789 = vmatmul.msk.f32.gmra.mxu3 %vm489_vm3, %v4747_v55  ;;  %v1075_v52 = vadd.f32 %v8329_v40, %v701_v22 }
 0x1fd   : > { %v6843_v46 = vpop.f32.mrf.mxu0  ;;  %v6845_v6 = vpop.f32.mrf.mxu1  ;;  %v1468_v42 = vadd.f32 %v6535_v30, %v1076_v1  ;;  %v4803_v30 = vld [vmem:[%s8234_s1 + $0x350] sm:$0xff]  ;;  %v8336_v1 = vld [vmem:[#allocation3_spill] sm:$0xff] }
 0x1fe   : > { %v1467_v55 = vadd.f32 %v6533_v33, %v1075_v52 }
 0x1ff   : > { %v1752_v15 = vpop.f32.mrf.mxu2  ;;  %4822 = vmatmul.msk.f32.gmra.mxu0 %vm489_vm3, %v4801_v62 }
 0x200   : > { %v6850_v51 = vadd.f32 %v1752_v15, %v6624_v9  ;;  %v1817_v26 = vpop.f32.mrf.mxu3  ;;  %4843 = vmatmul.msk.f32.gmra.mxu1 %vm489_vm3, %v4801_v62  ;;  %v4802_v9 = vld [vmem:[%s8234_s1 + $0x348] sm:$0xff] }
 0x201   : > { %v6855_v3 = vadd.f32 %v1817_v26, %v6627_v37  ;;  %v4749_v26 = vld [vmem:[%s8234_s1 + $0x2f0] sm:$0xff] }
 0x203   : > { %8328 = vst [vmem:[#allocation31_spill] sm:$0xff] %v6855_v3 }
 0x204   : > { %4769 = vmatmul.msk.f32.gmra.mxu2 %vm489_vm3, %v4748_v11  ;;  %4790 = vmatmul.msk.f32.gmra.mxu3 %vm489_vm3, %v4748_v11 }
 0x205   : > { %v6867_v10 = vpop.f32.mrf.mxu0  ;;  %v6869_v37 = vpop.f32.mrf.mxu1 }
 0x207   : > { %v1755_v62 = vpop.f32.mrf.mxu2  ;;  %4823 = vmatmul.msk.f32.gmra.mxu0 %vm489_vm3, %v4802_v9 }
 0x208   : > { %v6874_v15 = vadd.f32 %v1755_v62, %v1467_v55  ;;  %v1820_v7 = vpop.f32.mrf.mxu3  ;;  %4844 = vmatmul.msk.f32.gmra.mxu1 %vm489_vm3, %v4802_v9  ;;  %v4750_v9 = vld [vmem:[%s8234_s1 + $0x2f8] sm:$0xff]  ;;  %v675_v55 = vadd.f32 %v8336_v1, %v8335_v2 }
 0x209   : > { %v6877_v22 = vadd.f32 %v1820_v7, %v1468_v42  ;;  %v8337_v42 = vld [vmem:[#allocation4_spill] sm:$0xff] }
 0x20a   : > { %8331 = vst [vmem:[#allocation11_spill] sm:$0xff] %v6874_v15  ;;  %v676_v62 = vadd.f32 %v8337_v42, %v8335_v2 }
 0x20b   : > { %8332 = vst [vmem:[#allocation32_spill] sm:$0xff] %v6877_v22  ;;  %v8345_v22 = vld [vmem:[#allocation6_spill] sm:$0xff] }
 0x20c   : > { %4770 = vmatmul.msk.f32.gmra.mxu2 %vm489_vm3, %v4749_v26  ;;  %4791 = vmatmul.msk.f32.gmra.mxu3 %vm489_vm3, %v4749_v26  ;;  %v8338_v26 = vld [vmem:[#allocation12_spill] sm:$0xff] }
 0x20d   : > { %v6887_v33 = vpop.f32.mrf.mxu0  ;;  %v6889_v17 = vpop.f32.mrf.mxu1 }
 0x20f   : > { %v1758_v32 = vpop.f32.mrf.mxu2  ;;  %4824 = vmatmul.msk.f32.gmra.mxu0 %vm489_vm3, %v4803_v30 }
 0x210   : > { %v6893_v11 = vadd.f32 %v1758_v32, %v6629_v25  ;;  %v1823_v40 = vpop.f32.mrf.mxu3  ;;  %4845 = vmatmul.msk.f32.gmra.mxu1 %vm489_vm3, %v4803_v30  ;;  %v4804_v25 = vld [vmem:[%s8234_s1 + $0x358] sm:$0xff]  ;;  %v1049_v30 = vadd.f32 %v8338_v26, %v675_v55  ;;  %v8339_v32 = vld [vmem:[#allocation13_spill] sm:$0xff] }
 0x211   : > { %v6897_v52 = vadd.f32 %v1823_v40, %v6634_v54  ;;  %v1050_v40 = vadd.f32 %v8339_v32, %v676_v62  ;;  %v8343_v55 = vld [vmem:[#allocation5_spill] sm:$0xff]  ;;  %v8344_v62 = vld [vmem:[#allocation20_spill] sm:$0xff] }
 0x212   : > { %8333 = vst [vmem:[#allocation24_spill] sm:$0xff] %v6893_v11  ;;  %v8342_v11 = vld [vmem:[#allocation41_spill] sm:$0xff]  ;;  %v1441_v32 = vadd.f32 %v8344_v62, %v1049_v30  ;;  %v8349_v62 = vld [vmem:[#allocation14_spill] sm:$0xff] }
 0x213   : > { %8334 = vst [vmem:[#allocation25_spill] sm:$0xff] %v6897_v52  ;;  %v4851_v52 = vld [vmem:[%s8234_s1 + $0x380] sm:$0xff]  ;;  %v677_v26 = vadd.f32 %v8343_v55, %v8342_v11  ;;  %v678_v15 = vadd.f32 %v8345_v22, %v8342_v11 }
 0x214   : > { %4771 = vmatmul.msk.f32.gmra.mxu2 %vm489_vm3, %v4750_v9  ;;  %4792 = vmatmul.msk.f32.gmra.mxu3 %vm489_vm3, %v4750_v9 }
 0x215   : > { %v6911_v54 = vpop.f32.mrf.mxu0  ;;  %v6913_v7 = vpop.f32.mrf.mxu1  ;;  %v1051_v22 = vadd.f32 %v8349_v62, %v677_v26  ;;  %v4852_v26 = vld [vmem:[%s8234_s1 + $0x388] sm:$0xff] }
 0x217   : > { %v1761_v1 = vpop.f32.mrf.mxu2  ;;  %4825 = vmatmul.msk.f32.gmra.mxu0 %vm489_vm3, %v4804_v25 }
 0x218   : > { %v6919_v2 = vadd.f32 %v1761_v1, %v6671_v14  ;;  %v1826_v42 = vpop.f32.mrf.mxu3  ;;  %4846 = vmatmul.msk.f32.gmra.mxu1 %vm489_vm3, %v4804_v25  ;;  %v8346_v14 = vld [vmem:[#allocation21_spill] sm:$0xff]  ;;  %v8348_v25 = vld [vmem:[#allocation46_spill] sm:$0xff] }
 0x219   : > { %v6923_v9 = vadd.f32 %v1826_v42, %v6676_v19  ;;  %v1442_v1 = vadd.f32 %v8346_v14, %v1050_v40  ;;  %v4805_v19 = vld [vmem:[%s8234_s1 + $0x360] sm:$0xff] }
 0x21a   : > { %8340 = vst [vmem:[#allocation30_spill] sm:$0xff] %v6919_v2  ;;  %v8347_v2 = vld [vmem:[#allocation45_spill] sm:$0xff]  ;;  %v8350_v40 = vld [vmem:[#allocation15_spill] sm:$0xff] }
 0x21b   : > { %8341 = vst [vmem:[#allocation33_spill] sm:$0xff] %v6923_v9  ;;  %v1829_v3 = vadd.f32 %v8347_v2, %v1441_v32  ;;  %v1830_v42 = vadd.f32 %v8348_v25, %v1442_v1  ;;  %v1052_v2 = vadd.f32 %v8350_v40, %v678_v15  ;;  %v8351_v25 = vld [vmem:[#allocation22_spill] sm:$0xff] }
 0x21c   : > { %4868 = vmatmul.msk.f32.vlgmr.msra.gmra.mxu2 %vm489_vm3, %v4851_v52  ;;  %4885 = vmatmul.msk.f32.vlgmr.msra.gmra.mxu3 %vm489_vm3, %v4851_v52 }
 0x21d   : > { %v6941_v55 = vpop.f32.mrf.mxu0  ;;  %v6943_v30 = vpop.f32.mrf.mxu1  ;;  %v2203_v11 = vadd.f32 %v6646_v21, %v1829_v3  ;;  %v2204_v32 = vadd.f32 %v6648_v24, %v1830_v42  ;;  %v1443_v21 = vadd.f32 %v8351_v25, %v1051_v22  ;;  %v8352_v3 = vld [vmem:[#allocation23_spill] sm:$0xff]  ;;  %v8354_v25 = vld [vmem:[#allocation42_spill] sm:$0xff] }
 0x21e   : > { %v1444_v15 = vadd.f32 %v8352_v3, %v1052_v2 }
 0x21f   : > { %v2478_v14 = vpop.f32.mrf.mxu2  ;;  %4826 = vmatmul.msk.f32.gmra.mxu0 %vm489_vm3, %v4805_v19  ;;  %v1831_v24 = vadd.f32 %v6543_v16, %v1443_v21  ;;  %v8355_v21 = vld [vmem:[#allocation9_spill] sm:$0xff] }
 0x220   : > { %v6950_v52 = vadd.f32 %v2478_v14, %v2203_v11  ;;  %v2543_v9 = vpop.f32.mrf.mxu3  ;;  %4847 = vmatmul.msk.f32.gmra.mxu1 %vm489_vm3, %v4805_v19  ;;  %v4806_v19 = vld [vmem:[%s8234_s1 + $0x368] sm:$0xff]  ;;  %v681_v3 = vadd.f32 %v8355_v21, %v8354_v25 }
 0x221   : > { %v6953_v1 = vadd.f32 %v2543_v9, %v2204_v32  ;;  %v8353_v9 = vld [vmem:[#allocation47_spill] sm:$0xff]  ;;  %v2205_v22 = vadd.f32 %v6687_v18, %v1831_v24  ;;  %v8356_v18 = vld [vmem:[#allocation10_spill] sm:$0xff] }
 0x222   : > { %v1832_v42 = vadd.f32 %v8353_v9, %v1444_v15  ;;  %v4807_v15 = vld [vmem:[%s8234_s1 + $0x370] sm:$0xff]  ;;  %v8357_v9 = vld [vmem:[#allocation18_spill] sm:$0xff] }
 0x224   : > { %4869 = vmatmul.msk.f32.gmra.mxu2 %vm489_vm3, %v4852_v26  ;;  %4886 = vmatmul.msk.f32.gmra.mxu3 %vm489_vm3, %v4852_v26  ;;  %v2206_v40 = vadd.f32 %v6689_v36, %v1832_v42  ;;  %v4853_v26 = vld [vmem:[%s8234_s1 + $0x390] sm:$0xff]  ;;  %v682_v36 = vadd.f32 %v8356_v18, %v8354_v25  ;;  %v1055_v42 = vadd.f32 %v8357_v9, %v681_v3  ;;  %v4854_v3 = vld [vmem:[%s8234_s1 + $0x398] sm:$0xff] }
 0x225   : > { %v6967_v62 = vpop.f32.mrf.mxu0  ;;  %v6969_v11 = vpop.f32.mrf.mxu1 }
 0x227   : > { %v2481_v2 = vpop.f32.mrf.mxu2  ;;  %4827 = vmatmul.msk.f32.gmra.mxu0 %vm489_vm3, %v4806_v19 }
 0x228   : > { %v6974_v16 = vadd.f32 %v2481_v2, %v2205_v22  ;;  %v2546_v32 = vpop.f32.mrf.mxu3  ;;  %4848 = vmatmul.msk.f32.gmra.mxu1 %vm489_vm3, %v4806_v19  ;;  %v2207_v22 = vadd.f32 %v6719_v53, %v6576_v63  ;;  %v8359_v63 = vld [vmem:[#allocation28_spill] sm:$0xff] }
 0x229   : > { %v6977_v14 = vadd.f32 %v2546_v32, %v2206_v40  ;;  %v8358_v40 = vld [vmem:[#allocation19_spill] sm:$0xff]  ;;  %v2208_v32 = vadd.f32 %v6721_v23, %v6579_v47  ;;  %v1447_v53 = vadd.f32 %v8359_v63, %v1055_v42  ;;  %v4808_v23 = vld [vmem:[%s8234_s1 + $0x378] sm:$0xff]  ;;  %v2211_v63 = vadd.f32 %v6760_v57, %v6661_v5  ;;  %v4902_v5 = vld [vmem:[%s8234_s1 + $0x408] sm:$0xff] }
 0x22a   : > { %v1056_v2 = vadd.f32 %v8358_v40, %v682_v36  ;;  %v8360_v36 = vld [vmem:[#allocation29_spill] sm:$0xff] }
 0x22b   : > { %v1835_v47 = vadd.f32 %v6613_v39, %v1447_v53  ;;  %v2212_v53 = vadd.f32 %v6762_v56, %v6664_v34  ;;  %v2213_v56 = vadd.f32 %v6783_v61, %v6700_v0  ;;  %v4903_v0 = vld [vmem:[%s8234_s1 + $0x410] sm:$0xff] }
 0x22c   : > { %4870 = vmatmul.msk.f32.gmra.mxu2 %vm489_vm3, %v4853_v26  ;;  %4887 = vmatmul.msk.f32.gmra.mxu3 %vm489_vm3, %v4853_v26  ;;  %v1448_v9 = vadd.f32 %v8360_v36, %v1056_v2 }
 0x22d   : > { %v6991_v24 = vpop.f32.mrf.mxu0  ;;  %v6993_v19 = vpop.f32.mrf.mxu1  ;;  %v2209_v42 = vadd.f32 %v6739_v60, %v1835_v47  ;;  %v4901_v60 = vld [vmem:[%s8234_s1 + $0x400] sm:$0xff] }
 0x22f   : > { %v2484_v25 = vpop.f32.mrf.mxu2  ;;  %4828 = vmatmul.msk.f32.gmra.mxu0 %vm489_vm3, %v4807_v15 }
 0x230   : > { %v7002_v26 = vadd.f32 %v2484_v25, %v2207_v22  ;;  %v2549_v21 = vpop.f32.mrf.mxu3  ;;  %4849 = vmatmul.msk.f32.gmra.mxu1 %vm489_vm3, %v4807_v15  ;;  %v1836_v15 = vadd.f32 %v6616_v58, %v1448_v9  ;;  %v4855_v58 = vld [vmem:[%s8234_s1 + $0x3a0] sm:$0xff] }
 0x231   : > { %v7005_v18 = vadd.f32 %v2549_v21, %v2208_v32 }
 0x232   : > { %v2210_v2 = vadd.f32 %v6741_v43, %v1836_v15  ;;  %v4856_v15 = vld [vmem:[%s8234_s1 + $0x3a8] sm:$0xff] }
 0x234   : > { %4871 = vmatmul.msk.f32.gmra.mxu2 %vm489_vm3, %v4854_v3  ;;  %4888 = vmatmul.msk.f32.gmra.mxu3 %vm489_vm3, %v4854_v3 }
 0x235   : > { %v7019_v22 = vpop.f32.mrf.mxu0  ;;  %v7021_v40 = vpop.f32.mrf.mxu1 }
 0x237   : > { %v2487_v32 = vpop.f32.mrf.mxu2  ;;  %4829 = vmatmul.msk.f32.gmra.mxu0 %vm489_vm3, %v4808_v23 }
 0x238   : > { %v7026_v39 = vadd.f32 %v2487_v32, %v2209_v42  ;;  %v2552_v25 = vpop.f32.mrf.mxu3  ;;  %4850 = vmatmul.msk.f32.gmra.mxu1 %vm489_vm3, %v4808_v23  ;;  %v2214_v42 = vadd.f32 %v6785_v59, %v6703_v31  ;;  %v2215_v59 = vadd.f32 %v6803_v45, %v6726_v38  ;;  %v4904_v38 = vld [vmem:[%s8234_s1 + $0x418] sm:$0xff] }
 0x239   : > { %v7029_v21 = vadd.f32 %v2552_v25, %v2210_v2 }
 0x23c   : > { %4872 = vmatmul.msk.f32.gmra.mxu2 %vm489_vm3, %v4855_v58  ;;  %4889 = vmatmul.msk.f32.gmra.mxu3 %vm489_vm3, %v4855_v58 }
 0x23d   : > { %v7039_v43 = vpop.f32.mrf.mxu0  ;;  %v7041_v3 = vpop.f32.mrf.mxu1 }
 0x23f   : > { %v2490_v36 = vpop.f32.mrf.mxu2  ;;  %4922 = vmatmul.msk.f32.vlgmr.msra.gmra.mxu0 %vm489_vm3, %v4901_v60 }
 0x240   : > { %v7048_v9 = vadd.f32 %v2490_v36, %v2211_v63  ;;  %v2555_v47 = vpop.f32.mrf.mxu3  ;;  %4943 = vmatmul.msk.f32.vlgmr.msra.gmra.mxu1 %vm489_vm3, %v4901_v60  ;;  %v4857_v60 = vld [vmem:[%s8234_s1 + $0x3b0] sm:$0xff]  ;;  %v2216_v63 = vadd.f32 %v6805_v44, %v6729_v48  ;;  %v2217_v44 = vadd.f32 %v6823_v8, %v6745_v13  ;;  %v4905_v13 = vld [vmem:[%s8234_s1 + $0x420] sm:$0xff] }
 0x241   : > { %v7051_v23 = vadd.f32 %v2555_v47, %v2212_v53 }
 0x244   : > { %4873 = vmatmul.msk.f32.gmra.mxu2 %vm489_vm3, %v4856_v15  ;;  %4890 = vmatmul.msk.f32.gmra.mxu3 %vm489_vm3, %v4856_v15 }
 0x245   : > { %v7061_v34 = vpop.f32.mrf.mxu0  ;;  %v7063_v57 = vpop.f32.mrf.mxu1 }
 0x247   : > { %v2493_v2 = vpop.f32.mrf.mxu2  ;;  %4923 = vmatmul.msk.f32.gmra.mxu0 %vm489_vm3, %v4902_v5 }
 0x248   : > { %v7070_v32 = vadd.f32 %v2493_v2, %v2213_v56  ;;  %v2558_v25 = vpop.f32.mrf.mxu3  ;;  %4944 = vmatmul.msk.f32.gmra.mxu1 %vm489_vm3, %v4902_v5  ;;  %v4858_v5 = vld [vmem:[%s8234_s1 + $0x3b8] sm:$0xff]  ;;  %v2218_v56 = vadd.f32 %v6825_v35, %v6749_v29  ;;  %v2219_v35 = vadd.f32 %v6843_v46, %v6766_v27  ;;  %v4906_v27 = vld [vmem:[%s8234_s1 + $0x428] sm:$0xff] }
 0x249   : > { %v7073_v58 = vadd.f32 %v2558_v25, %v2214_v42 }
 0x24c   : > { %4874 = vmatmul.msk.f32.gmra.mxu2 %vm489_vm3, %v4857_v60  ;;  %4891 = vmatmul.msk.f32.gmra.mxu3 %vm489_vm3, %v4857_v60 }
 0x24d   : > { %v7083_v31 = vpop.f32.mrf.mxu0  ;;  %v7085_v61 = vpop.f32.mrf.mxu1 }
 0x24f   : > { %v2496_v53 = vpop.f32.mrf.mxu2  ;;  %4924 = vmatmul.msk.f32.gmra.mxu0 %vm489_vm3, %v4903_v0 }
 0x250   : > { %v7092_v36 = vadd.f32 %v2496_v53, %v2215_v59  ;;  %v2561_v47 = vpop.f32.mrf.mxu3  ;;  %4945 = vmatmul.msk.f32.gmra.mxu1 %vm489_vm3, %v4903_v0  ;;  %v4859_v0 = vld [vmem:[%s8234_s1 + $0x3c0] sm:$0xff]  ;;  %v2220_v59 = vadd.f32 %v6845_v6, %v6770_v41  ;;  %v2221_v6 = vadd.f32 %v6867_v10, %v6789_v49  ;;  %v4907_v49 = vld [vmem:[%s8234_s1 + $0x430] sm:$0xff] }
 0x251   : > { %v7095_v15 = vadd.f32 %v2561_v47, %v2216_v63 }
 0x254   : > { %4875 = vmatmul.msk.f32.gmra.mxu2 %vm489_vm3, %v4858_v5  ;;  %4892 = vmatmul.msk.f32.gmra.mxu3 %vm489_vm3, %v4858_v5 }
 0x255   : > { %v7105_v48 = vpop.f32.mrf.mxu0  ;;  %v7107_v45 = vpop.f32.mrf.mxu1 }
 0x257   : > { %v2499_v42 = vpop.f32.mrf.mxu2  ;;  %4925 = vmatmul.msk.f32.gmra.mxu0 %vm489_vm3, %v4904_v38 }
 0x258   : > { %v7114_v2 = vadd.f32 %v2499_v42, %v2217_v44  ;;  %v2564_v25 = vpop.f32.mrf.mxu3  ;;  %4946 = vmatmul.msk.f32.gmra.mxu1 %vm489_vm3, %v4904_v38  ;;  %v4860_v38 = vld [vmem:[%s8234_s1 + $0x3c8] sm:$0xff]  ;;  %v2222_v44 = vadd.f32 %v6869_v37, %v6793_v50  ;;  %v2223_v37 = vadd.f32 %v6887_v33, %v6809_v20  ;;  %v4908_v20 = vld [vmem:[%s8234_s1 + $0x438] sm:$0xff] }
 0x259   : > { %v7117_v60 = vadd.f32 %v2564_v25, %v2218_v56 }
 0x25c   : > { %4876 = vmatmul.msk.f32.gmra.mxu2 %vm489_vm3, %v4859_v0  ;;  %4893 = vmatmul.msk.f32.gmra.mxu3 %vm489_vm3, %v4859_v0 }
 0x25d   : > { %v7127_v29 = vpop.f32.mrf.mxu0  ;;  %v7129_v8 = vpop.f32.mrf.mxu1 }
 0x25f   : > { %v2502_v63 = vpop.f32.mrf.mxu2  ;;  %4926 = vmatmul.msk.f32.gmra.mxu0 %vm489_vm3, %v4905_v13 }
 0x260   : > { %v2607_v53 = vadd.f32 %v2502_v63, %v2219_v35  ;;  %v2567_v47 = vpop.f32.mrf.mxu3  ;;  %4947 = vmatmul.msk.f32.gmra.mxu1 %vm489_vm3, %v4905_v13  ;;  %v4861_v13 = vld [vmem:[%s8234_s1 + $0x3d0] sm:$0xff]  ;;  %v2224_v35 = vadd.f32 %v6889_v17, %v6813_v4  ;;  %v2225_v17 = vadd.f32 %v6911_v54, %v6829_v12  ;;  %v4909_v12 = vld [vmem:[%s8234_s1 + $0x440] sm:$0xff] }
 0x261   : > { %v2608_v5 = vadd.f32 %v2567_v47, %v2220_v59 }
 0x264   : > { %4877 = vmatmul.msk.f32.gmra.mxu2 %vm489_vm3, %v4860_v38  ;;  %4894 = vmatmul.msk.f32.gmra.mxu3 %vm489_vm3, %v4860_v38 }
 0x265   : > { %v7145_v41 = vpop.f32.mrf.mxu0  ;;  %v7147_v46 = vpop.f32.mrf.mxu1 }
 0x267   : > { %v2505_v56 = vpop.f32.mrf.mxu2  ;;  %4927 = vmatmul.msk.f32.gmra.mxu0 %vm489_vm3, %v4906_v27 }
 0x268   : > { %v2609_v42 = vadd.f32 %v2505_v56, %v2221_v6  ;;  %v2570_v25 = vpop.f32.mrf.mxu3  ;;  %4948 = vmatmul.msk.f32.gmra.mxu1 %vm489_vm3, %v4906_v27  ;;  %v4862_v27 = vld [vmem:[%s8234_s1 + $0x3d8] sm:$0xff]  ;;  %v2226_v6 = vadd.f32 %v6913_v7, %v6833_v28  ;;  %v2227_v7 = vadd.f32 %v6941_v55, %v6850_v51  ;;  %v4910_v51 = vld [vmem:[%s8234_s1 + $0x448] sm:$0xff] }
 0x269   : > { %v2610_v0 = vadd.f32 %v2570_v25, %v2222_v44 }
 0x26c   : > { %4878 = vmatmul.msk.f32.gmra.mxu2 %vm489_vm3, %v4861_v13  ;;  %4895 = vmatmul.msk.f32.gmra.mxu3 %vm489_vm3, %v4861_v13 }
 0x26d   : > { %v7163_v50 = vpop.f32.mrf.mxu0  ;;  %v7165_v10 = vpop.f32.mrf.mxu1 }
 0x26f   : > { %v2508_v59 = vpop.f32.mrf.mxu2  ;;  %4928 = vmatmul.msk.f32.gmra.mxu0 %vm489_vm3, %v4907_v49 }
 0x270   : > { %v2611_v63 = vadd.f32 %v2508_v59, %v2223_v37  ;;  %v2573_v47 = vpop.f32.mrf.mxu3  ;;  %4949 = vmatmul.msk.f32.gmra.mxu1 %vm489_vm3, %v4907_v49  ;;  %v4863_v49 = vld [vmem:[%s8234_s1 + $0x3e0] sm:$0xff] }
 0x271   : > { %v2612_v38 = vadd.f32 %v2573_v47, %v2224_v35  ;;  %v8361_v59 = vld [vmem:[#allocation31_spill] sm:$0xff] }
 0x272   : > { %v2228_v47 = vadd.f32 %v6943_v30, %v8361_v59 }
 0x274   : > { %4879 = vmatmul.msk.f32.gmra.mxu2 %vm489_vm3, %v4862_v27  ;;  %4896 = vmatmul.msk.f32.gmra.mxu3 %vm489_vm3, %v4862_v27 }
 0x275   : > { %v7181_v4 = vpop.f32.mrf.mxu0  ;;  %v7183_v33 = vpop.f32.mrf.mxu1 }
 0x277   : > { %v2511_v44 = vpop.f32.mrf.mxu2  ;;  %4929 = vmatmul.msk.f32.gmra.mxu0 %vm489_vm3, %v4908_v20 }
 0x278   : > { %v2613_v56 = vadd.f32 %v2511_v44, %v2225_v17  ;;  %v2576_v25 = vpop.f32.mrf.mxu3  ;;  %4950 = vmatmul.msk.f32.gmra.mxu1 %vm489_vm3, %v4908_v20  ;;  %v4864_v44 = vld [vmem:[%s8234_s1 + $0x3e8] sm:$0xff] }
 0x279   : > { %v2614_v13 = vadd.f32 %v2576_v25, %v2226_v6 }
 0x27c   : > { %4880 = vmatmul.msk.f32.gmra.mxu2 %vm489_vm3, %v4863_v49  ;;  %4897 = vmatmul.msk.f32.gmra.mxu3 %vm489_vm3, %v4863_v49 }
 0x27d   : > { %v2890_v28 = vpop.f32.mrf.mxu0  ;;  %v2955_v54 = vpop.f32.mrf.mxu1 }
 0x27e   : > { %v7201_v37 = vadd.f32 %v2890_v28, %v2607_v53  ;;  %v7203_v35 = vadd.f32 %v2955_v54, %v2608_v5  ;;  %v8362_v53 = vld [vmem:[#allocation11_spill] sm:$0xff] }
 0x27f   : > { %v2514_v27 = vpop.f32.mrf.mxu2  ;;  %4930 = vmatmul.msk.f32.gmra.mxu0 %vm489_vm3, %v4909_v12  ;;  %v2229_v5 = vadd.f32 %v6967_v62, %v8362_v53  ;;  %v4911_v62 = vld [vmem:[%s8234_s1 + $0x450] sm:$0xff] }
 0x280   : > { %v2615_v20 = vadd.f32 %v2514_v27, %v2227_v7  ;;  %v2579_v17 = vpop.f32.mrf.mxu3  ;;  %4951 = vmatmul.msk.f32.gmra.mxu1 %vm489_vm3, %v4909_v12  ;;  %v8363_v12 = vld [vmem:[#allocation32_spill] sm:$0xff]  ;;  %v4865_v27 = vld [vmem:[%s8234_s1 + $0x3f0] sm:$0xff] }
 0x281   : > { %v2616_v6 = vadd.f32 %v2579_v17, %v2228_v47  ;;  %v2230_v28 = vadd.f32 %v6969_v11, %v8363_v12 }
 0x284   : > { %4881 = vmatmul.msk.f32.gmra.mxu2 %vm489_vm3, %v4864_v44  ;;  %4898 = vmatmul.msk.f32.gmra.mxu3 %vm489_vm3, %v4864_v44 }
 0x285   : > { %v2893_v55 = vpop.f32.mrf.mxu0  ;;  %v2958_v30 = vpop.f32.mrf.mxu1 }
 0x286   : > { %v7219_v25 = vadd.f32 %v2893_v55, %v2609_v42  ;;  %v7221_v49 = vadd.f32 %v2958_v30, %v2610_v0  ;;  %v8364_v0 = vld [vmem:[#allocation24_spill] sm:$0xff]  ;;  %v8365_v55 = vld [vmem:[#allocation25_spill] sm:$0xff] }
 0x287   : > { %v2517_v54 = vpop.f32.mrf.mxu2  ;;  %4931 = vmatmul.msk.f32.gmra.mxu0 %vm489_vm3, %v4910_v51  ;;  %v2231_v17 = vadd.f32 %v6991_v24, %v8364_v0  ;;  %v2232_v30 = vadd.f32 %v6993_v19, %v8365_v55  ;;  %v4912_v24 = vld [vmem:[%s8234_s1 + $0x458] sm:$0xff] }
 0x288   : > { %v2617_v7 = vadd.f32 %v2517_v54, %v2229_v5  ;;  %v2582_v59 = vpop.f32.mrf.mxu3  ;;  %4952 = vmatmul.msk.f32.gmra.mxu1 %vm489_vm3, %v4910_v51  ;;  %v4866_v54 = vld [vmem:[%s8234_s1 + $0x3f8] sm:$0xff] }
 0x289   : > { %v2618_v47 = vadd.f32 %v2582_v59, %v2230_v28 }
 0x28c   : > { %4882 = vmatmul.msk.f32.gmra.mxu2 %vm489_vm3, %v4865_v27  ;;  %4899 = vmatmul.msk.f32.gmra.mxu3 %vm489_vm3, %v4865_v27 }
 0x28d   : > { %v2896_v11 = vpop.f32.mrf.mxu0  ;;  %v2961_v42 = vpop.f32.mrf.mxu1 }
 0x28e   : > { %v7237_v44 = vadd.f32 %v2896_v11, %v2611_v63  ;;  %v7239_v51 = vadd.f32 %v2961_v42, %v2612_v38  ;;  %v8366_v38 = vld [vmem:[#allocation30_spill] sm:$0xff]  ;;  %v8367_v11 = vld [vmem:[#allocation33_spill] sm:$0xff] }
 0x28f   : > { %v2520_v53 = vpop.f32.mrf.mxu2  ;;  %4932 = vmatmul.msk.f32.gmra.mxu0 %vm489_vm3, %v4911_v62  ;;  %v2233_v59 = vadd.f32 %v7019_v22, %v8366_v38  ;;  %v2234_v42 = vadd.f32 %v7021_v40, %v8367_v11 }
 0x290   : > { %v2619_v5 = vadd.f32 %v2520_v53, %v2231_v17  ;;  %v2585_v12 = vpop.f32.mrf.mxu3  ;;  %4953 = vmatmul.msk.f32.gmra.mxu1 %vm489_vm3, %v4911_v62  ;;  %v4913_v53 = vld [vmem:[%s8234_s1 + $0x460] sm:$0xff] }
 0x291   : > { %v2620_v28 = vadd.f32 %v2585_v12, %v2232_v30 }
 0x294   : > { %4883 = vmatmul.msk.f32.gmra.mxu2 %vm489_vm3, %v4866_v54  ;;  %4900 = vmatmul.msk.f32.gmra.mxu3 %vm489_vm3, %v4866_v54  ;;  %v2980_v54 = vadd.f32 %v7041_v3, %v6953_v1  ;;  %v2982_v3 = vadd.f32 %v7063_v57, %v6977_v14  ;;  %v2984_v57 = vadd.f32 %v7085_v61, %v7005_v18 }
 0x295   : > { %v2899_v19 = vpop.f32.mrf.mxu0  ;;  %v2964_v63 = vpop.f32.mrf.mxu1  ;;  %v2986_v61 = vadd.f32 %v7107_v45, %v7029_v21 }
 0x296   : > { %v7255_v27 = vadd.f32 %v2899_v19, %v2613_v56  ;;  %v7257_v62 = vadd.f32 %v2964_v63, %v2614_v13  ;;  %v2979_v13 = vadd.f32 %v7039_v43, %v6950_v52 }
 0x297   : > { %v2523_v0 = vpop.f32.mrf.mxu2  ;;  %4933 = vmatmul.msk.f32.gmra.mxu0 %vm489_vm3, %v4912_v24 }
 0x298   : > { %v2621_v17 = vadd.f32 %v2523_v0, %v2233_v59  ;;  %v2588_v55 = vpop.f32.mrf.mxu3  ;;  %4954 = vmatmul.msk.f32.gmra.mxu1 %vm489_vm3, %v4912_v24  ;;  %v4914_v59 = vld [vmem:[%s8234_s1 + $0x468] sm:$0xff] }
 0x299   : > { %v2622_v30 = vadd.f32 %v2588_v55, %v2234_v42 }
 0x29d   : > { %v2902_v22 = vpop.f32.mrf.mxu0  ;;  %v2967_v56 = vpop.f32.mrf.mxu1 }
 0x29e   : > { %v7268_v12 = vadd.f32 %v2902_v22, %v2615_v20  ;;  %v7270_v40 = vadd.f32 %v2967_v56, %v2616_v6  ;;  %v2981_v20 = vadd.f32 %v7061_v34, %v6974_v16 }
 0x29f   : > { %v3240_v19 = vpop.f32.mrf.mxu2  ;;  %4934 = vmatmul.msk.f32.gmra.mxu0 %vm489_vm3, %v4913_v53 }
 0x2a0   : > { %v3353_v24 = vadd.f32 %v3240_v19, %v2979_v13  ;;  %v3305_v63 = vpop.f32.mrf.mxu3  ;;  %4955 = vmatmul.msk.f32.gmra.mxu1 %vm489_vm3, %v4913_v53  ;;  %v4915_v53 = vld [vmem:[%s8234_s1 + $0x470] sm:$0xff]  ;;  %v4916_v19 = vld [vmem:[%s8234_s1 + $0x478] sm:$0xff] }
 0x2a1   : > { %v3354_v38 = vadd.f32 %v3305_v63, %v2980_v54 }
 0x2a5   : > { %v2905_v52 = vpop.f32.mrf.mxu0  ;;  %v2970_v43 = vpop.f32.mrf.mxu1 }
 0x2a6   : > { %v7281_v6 = vadd.f32 %v2905_v52, %v2617_v7  ;;  %v7283_v1 = vadd.f32 %v2970_v43, %v2618_v47  ;;  %v2983_v7 = vadd.f32 %v7083_v31, %v7002_v26 }
 0x2a7   : > { %v3243_v11 = vpop.f32.mrf.mxu2  ;;  %4935 = vmatmul.msk.f32.gmra.mxu0 %vm489_vm3, %v4914_v59 }
 0x2a8   : > { %v3355_v42 = vadd.f32 %v3243_v11, %v2981_v20  ;;  %v3308_v0 = vpop.f32.mrf.mxu3  ;;  %4956 = vmatmul.msk.f32.gmra.mxu1 %vm489_vm3, %v4914_v59 }
 0x2a9   : > { %v3356_v55 = vadd.f32 %v3308_v0, %v2982_v3 }
 0x2ad   : > { %v2908_v16 = vpop.f32.mrf.mxu0  ;;  %v2973_v34 = vpop.f32.mrf.mxu1 }
 0x2ae   : > { %v7294_v47 = vadd.f32 %v2908_v16, %v2619_v5  ;;  %v7296_v14 = vadd.f32 %v2973_v34, %v2620_v28  ;;  %v2985_v5 = vadd.f32 %v7105_v48, %v7026_v39 }
 0x2af   : > { %v3246_v22 = vpop.f32.mrf.mxu2  ;;  %4936 = vmatmul.msk.f32.gmra.mxu0 %vm489_vm3, %v4915_v53 }
 0x2b0   : > { %v3357_v56 = vadd.f32 %v3246_v22, %v2983_v7  ;;  %v3311_v13 = vpop.f32.mrf.mxu3  ;;  %4957 = vmatmul.msk.f32.gmra.mxu1 %vm489_vm3, %v4915_v53 }
 0x2b1   : > { %v3358_v54 = vadd.f32 %v3311_v13, %v2984_v57 }
 0x2b5   : > { %v2911_v26 = vpop.f32.mrf.mxu0  ;;  %v2976_v31 = vpop.f32.mrf.mxu1 }
 0x2b6   : > { %v7307_v28 = vadd.f32 %v2911_v26, %v2621_v17  ;;  %v7309_v18 = vadd.f32 %v2976_v31, %v2622_v30 }
 0x2b7   : > { %v3249_v63 = vpop.f32.mrf.mxu2  ;;  %4937 = vmatmul.msk.f32.gmra.mxu0 %vm489_vm3, %v4916_v19 }
 0x2b8   : > { %8368 = vst [vmem:[#allocation16_spill] sm:$0xff] %v7307_v28  ;;  %v3359_v59 = vadd.f32 %v3249_v63, %v2985_v5  ;;  %v3314_v52 = vpop.f32.mrf.mxu3  ;;  %4958 = vmatmul.msk.f32.gmra.mxu1 %vm489_vm3, %v4916_v19 }
 0x2b9   : > { %8369 = vst [vmem:[#allocation34_spill] sm:$0xff] %v7309_v18  ;;  %v3360_v43 = vadd.f32 %v3314_v52, %v2986_v61 }
 0x2bd   : > { %v3628_v20 = vpop.f32.mrf.mxu0  ;;  %v3693_v3 = vpop.f32.mrf.mxu1 }
 0x2be   : > { %v3741_v11 = vadd.f32 %v3628_v20, %v3353_v24  ;;  %v3742_v0 = vadd.f32 %v3693_v3, %v3354_v38 }
 0x2bf   : > { %v3252_v39 = vpop.f32.mrf.mxu2 }
 0x2c0   : > { %v3317_v48 = vpop.f32.mrf.mxu3  ;;  %v3837_v17 = vsub.f32 0.0, %v3741_v11  ;;  %v3838_v30 = vsub.f32 0.0, %v3742_v0 }
 0x2c2   : > { %v3845_v7 = vmul.f32 1.442695, %v3837_v17  ;;  %v3847_v22 = vmul.f32 1.442695, %v3838_v30 }
 0x2c4   : > { %5085 = vpow2.f32 %v3845_v7  ;;  %v2987_v7 = vadd.f32 %v7127_v29, %v7048_v9 }
 0x2c5   : > { %v3631_v53 = vpop.f32.mrf.mxu0  ;;  %v3696_v16 = vpop.f32.mrf.mxu1  ;;  %5087 = vpow2.f32 %v3847_v22  ;;  %v2988_v22 = vadd.f32 %v7129_v8, %v7051_v23 }
 0x2c6   : > { %v3743_v34 = vadd.f32 %v3631_v53, %v3355_v42  ;;  %v3744_v21 = vadd.f32 %v3696_v16, %v3356_v55 }
 0x2c7   : > { %v7315_v45 = vpop.f32.mrf.mxu2 }
 0x2c8   : > { %v7317_v57 = vpop.f32.mrf.mxu3  ;;  %v3839_v13 = vsub.f32 0.0, %v3743_v34  ;;  %v3840_v5 = vsub.f32 0.0, %v3744_v21 }
 0x2ca   : > { %v3849_v42 = vmul.f32 1.442695, %v3839_v13  ;;  %v5086_v55 = vpop.eup %5085  ;;  %v3851_v20 = vmul.f32 1.442695, %v3840_v5 }
 0x2cb   : > { %v5088_v63 = vpop.eup %5087  ;;  %v7323_v11 = vadd.f32 1.0, %v5086_v55 }
 0x2cc   : > { %5089 = vpow2.f32 %v3849_v42  ;;  %v7325_v30 = vadd.f32 1.0, %v5088_v63 }
 0x2cd   : > { %v3634_v19 = vpop.f32.mrf.mxu0  ;;  %v3699_v24 = vpop.f32.mrf.mxu1  ;;  %5091 = vpow2.f32 %v3851_v20  ;;  %vm3874_vm14 = vweird.f32 %v7323_v11 }
 0x2ce   : > { %v3745_v38 = vadd.f32 %v3634_v19, %v3357_v56  ;;  %v3746_v26 = vadd.f32 %v3699_v24, %v3358_v54  ;;  %5093 = vrcp.f32 %v7323_v11  ;;  %v3362_v19 = vadd.f32 %v3317_v48, %v2988_v22 }
 0x2cf   : > { %v7319_v31 = vpop.f32.mrf.mxu2  ;;  %5095 = vrcp.f32 %v7325_v30  ;;  %v2989_v48 = vadd.f32 %v7145_v41, %v7070_v32  ;;  %v2991_v32 = vadd.f32 %v7163_v50, %v7092_v36  ;;  %v2992_v41 = vadd.f32 %v7165_v10, %v7095_v15 }
 0x2d0   : > { %v7321_v61 = vpop.f32.mrf.mxu3  ;;  %v3841_v52 = vsub.f32 0.0, %v3745_v38  ;;  %v3842_v3 = vsub.f32 0.0, %v3746_v26  ;;  %v2993_v22 = vadd.f32 %v7181_v4, %v7114_v2  ;;  %v2994_v2 = vadd.f32 %v7183_v33, %v7117_v60 }
 0x2d1   : > { %v3895_v10 = vand.u32 2147483648, %v7325_v30  ;;  %vm3889_vm15 = vweird.f32 %v7325_v30  ;;  %v3893_v33 = vand.u32 2147483647, %v7325_v30 }
 0x2d2   : > { %v3853_v56 = vmul.f32 1.442695, %v3841_v52  ;;  %v3855_v34 = vmul.f32 1.442695, %v3842_v3  ;;  %v5090_v13 = vpop.eup %5089 }
 0x2d3   : > { %v5092_v26 = vpop.eup %5091  ;;  %v7337_v5 = vadd.f32 1.0, %v5090_v13  ;;  %vm7411_vm3 = vcmp.eq.f32.partialorder %v3893_v33, 8.507059e+37 }
 0x2d4   : > { %5097 = vpow2.f32 %v3853_v56  ;;  %v7339_v9 = vpop.eup %5093  ;;  %v7349_v20 = vadd.f32 1.0, %v5092_v26  ;;  %v3878_v26 = vand.u32 2147483647, %v7323_v11 }
 0x2d5   : > { %v3637_v0 = vpop.f32.mrf.mxu0  ;;  %v3702_v17 = vpop.f32.mrf.mxu1  ;;  %5099 = vpow2.f32 %v3855_v34  ;;  %v3910_v60 = vand.u32 2147483648, %v7337_v5  ;;  %vm3875_vm0 = vweird.f32 %v7339_v9  ;;  %vm3904_vm7 = vweird.f32 %v7337_v5 }
 0x2d6   : > { %v3747_v54 = vadd.f32 %v3637_v0, %v3359_v59  ;;  %v3748_v53 = vadd.f32 %v3702_v17, %v3360_v43  ;;  %v3361_v43 = vadd.f32 %v3252_v39, %v2987_v7  ;;  %v7341_v23 = vpop.eup %5095  ;;  %v3870_v17 = vmul.f32 %v7339_v9, %v7323_v11  ;;  %vm7442_vm4 = vmor %vm3874_vm14, %vm3875_vm0 }
 0x2d7   : > { %v7327_v16 = vpop.f32.mrf.mxu2  ;;  %5101 = vrcp.f32 %v7337_v5  ;;  %v3885_v34 = vmul.f32 %v7341_v23, %v7325_v30  ;;  %vm3890_vm1 = vweird.f32 %v7341_v23  ;;  %vm7407_vm2 = vcmp.eq.f32.partialorder %v3878_v26, 8.507059e+37 }
 0x2d8   : > { %v7329_v21 = vpop.f32.mrf.mxu3  ;;  %v3843_v59 = vsub.f32 0.0, %v3747_v54  ;;  %v3844_v42 = vsub.f32 0.0, %v3748_v53  ;;  %v2990_v53 = vadd.f32 %v7147_v46, %v7073_v58  ;;  %v3363_v58 = vadd.f32 %v7315_v45, %v2989_v48  ;;  %vm7452_vm6 = vmor %vm3889_vm15, %vm3890_vm1 }
 0x2d9   : > { %v3886_v50 = vsub.f32 1.0, %v3885_v34  ;;  %vm3919_vm10 = vweird.f32 %v7349_v20 }
 0x2da   : > { %v3857_v29 = vmul.f32 1.442695, %v3843_v59  ;;  %v5098_v39 = vpop.eup %5097  ;;  %v3859_v56 = vmul.f32 1.442695, %v3844_v42  ;;  %v3880_v59 = vand.u32 2147483648, %v7323_v11  ;;  %v3364_v36 = vadd.f32 %v7317_v57, %v2990_v53 }
 0x2db   : > { %v5100_v0 = vpop.eup %5099  ;;  %v7364_v13 = vadd.f32 1.0, %v5098_v39 }
 0x2dc   : > { %5103 = vpow2.f32 %v3857_v29  ;;  %v7369_v46 = vadd.f32 1.0, %v5100_v0  ;;  %v7380_v42 = vor.u32 1.1754944e-38, %v3880_v59  ;;  %v3887_v0 = vmul.f32 %v7341_v23, %v3886_v50 }
 0x2dd   : > { %v3640_v24 = vpop.f32.mrf.mxu0  ;;  %v3705_v38 = vpop.f32.mrf.mxu1  ;;  %5105 = vrcp.f32 %v7349_v20  ;;  %v3367_v50 = vadd.f32 %v7327_v16, %v2993_v22  ;;  %v4302_v22 = vld [vmem:[%s7471_s23 + $0x8] sm:$0xff] }
 0x2de   : > { %v3749_v55 = vadd.f32 %v3640_v24, %v3361_v43  ;;  %v3750_v63 = vadd.f32 %v3705_v38, %v3362_v19  ;;  %8370 = vst [vmem:[#allocation17_spill] sm:$0xff] %v7369_v46  ;;  %v3871_v24 = vsub.f32 1.0, %v3870_v17  ;;  %5107 = vpow2.f32 %v3859_v56  ;;  %v7375_v4 = vpop.eup %5101 }
 0x2df   : > { %v7343_v8 = vpop.f32.mrf.mxu2  ;;  %v7394_v17 = vor.u32 1.1754944e-38, %v3895_v10  ;;  %v3925_v56 = vand.u32 2147483648, %v7349_v20  ;;  %v3900_v34 = vmul.f32 %v7375_v4, %v7337_v5  ;;  %v3888_v33 = vadd.f32 %v7341_v23, %v3887_v0 }
 0x2e0   : > { %v7345_v52 = vpop.f32.mrf.mxu3  ;;  %v3989_v3 = vsub.f32 0.0, %v3749_v55  ;;  %v3990_v54 = vsub.f32 0.0, %v3750_v63  ;;  %v3872_v55 = vmul.f32 %v7339_v9, %v3871_v24  ;;  %vm3905_vm5 = vweird.f32 %v7375_v4 }
 0x2e1   : > { %v7424_v26 = vor.u32 1.1754944e-38, %v3925_v56  ;;  %v3901_v18 = vsub.f32 1.0, %v3900_v34  ;;  %vm7533_vm11 = vmor %vm3904_vm7, %vm3905_vm5 }
 0x2e2   : > { %v3997_v7 = vmul.f32 1.442695, %v3989_v3  ;;  %v3999_v15 = vmul.f32 1.442695, %v3990_v54  ;;  %v5104_v57 = vpop.eup %5103  ;;  %v3365_v54 = vadd.f32 %v7319_v31, %v2991_v32 }
 0x2e3   : > { %v7391_v3 = vpop.eup %5105  ;;  %v7402_v59 = vadd.f32 1.0, %v5104_v57 }
 0x2e4   : > { %5109 = vpow2.f32 %v3997_v7  ;;  %v5108_v53 = vpop.eup %5107  ;;  %v3366_v7 = vadd.f32 %v7321_v61, %v2992_v41  ;;  %v3908_v61 = vand.u32 2147483647, %v7337_v5  ;;  %vm3920_vm8 = vweird.f32 %v7391_v3 }
 0x2e5   : > { %v3643_v43 = vpop.f32.mrf.mxu0  ;;  %v3708_v19 = vpop.f32.mrf.mxu1  ;;  %5111 = vrcp.f32 %v7364_v13  ;;  %v7426_v57 = vadd.f32 1.0, %v5108_v53  ;;  %v3902_v53 = vmul.f32 %v7375_v4, %v3901_v18  ;;  %vm7575_vm12 = vmor %vm3919_vm10, %vm3920_vm8 }
 0x2e6   : > { %v3751_v45 = vadd.f32 %v3643_v43, %v3363_v58  ;;  %v3752_v38 = vadd.f32 %v3708_v19, %v3364_v36  ;;  %5113 = vrcp.f32 %v7369_v46  ;;  %v7405_v43 = vor.u32 1.1754944e-38, %v3910_v60 }
 0x2e7   : > { %5115 = vpow2.f32 %v3999_v15  ;;  %v7387_v39 = vpop.f32.mrf.mxu2  ;;  %v3915_v15 = vmul.f32 %v7391_v3, %v7349_v20  ;;  %v7429_v60 = vadd.f32 %v7329_v21, %v2994_v2  ;;  %v3940_v21 = vand.u32 2147483648, %v7364_v13 }
 0x2e8   : > { %v3991_v63 = vsub.f32 0.0, %v3751_v45  ;;  %v3992_v29 = vsub.f32 0.0, %v3752_v38  ;;  %v7389_v48 = vpop.f32.mrf.mxu3  ;;  %v3873_v45 = vadd.f32 %v7339_v9, %v3872_v55  ;;  %5117 = vrcp.f32 %v7402_v59 }
 0x2e9   : > { %v3916_v11 = vsub.f32 1.0, %v3915_v15  ;;  %vm7499_vm9 = vcmp.eq.f32.partialorder %v3908_v61, 8.507059e+37  ;;  %v3903_v61 = vadd.f32 %v7375_v4, %v3902_v53 }
 0x2ea   : > { %v5110_v58 = vpop.eup %5109  ;;  %v4001_v19 = vmul.f32 1.442695, %v3991_v63  ;;  %v4003_v10 = vmul.f32 1.442695, %v3992_v29  ;;  %v3877_v0 = vsel %vm7442_vm4, %v7339_v9, %v3873_v45  ;;  %v3955_v9 = vand.u32 2147483648, %v7369_v46 }
 0x2eb   : > { %v7416_v41 = vpop.eup %5111  ;;  %v7433_v28 = vadd.f32 1.0, %v5110_v58  ;;  %v3907_v5 = vsel %vm7533_vm11, %v7375_v4, %v3903_v61  ;;  %v4303_v61 = vld [vmem:[%s7471_s23 + $0x10] sm:$0xff] }
 0x2ec   : > { %v7422_v38 = vpop.eup %5113  ;;  %5119 = vpow2.f32 %v4001_v19  ;;  %v3930_v29 = vmul.f32 %v7416_v41, %v7364_v13  ;;  %v7484_v19 = vor.u32 1.1754944e-38, %v3940_v21  ;;  %v7506_v55 = vor.u32 1.1754944e-38, %v3955_v9 }
 0x2ed   : > { %v3646_v24 = vpop.f32.mrf.mxu0  ;;  %v3711_v36 = vpop.f32.mrf.mxu1  ;;  %5121 = vpow2.f32 %v4003_v10  ;;  %v3945_v56 = vmul.f32 %v7422_v38, %v7369_v46  ;;  %v3917_v10 = vmul.f32 %v7391_v3, %v3916_v11  ;;  %vm4026_vm13 = vweird.f32 %v7433_v28 }
 0x2ee   : > { %v5116_v63 = vpop.eup %5115  ;;  %v3753_v16 = vadd.f32 %v3646_v24, %v3365_v54  ;;  %v3754_v2 = vadd.f32 %v3711_v36, %v3366_v7  ;;  %5123 = vrcp.f32 %v7426_v57  ;;  %v3892_v54 = vsel %vm7452_vm6, %v7341_v23, %v3888_v33  ;;  %8381 = vst [vmem:[#allocation35_spill] sm:$0xff] %v7506_v55 }
 0x2ef   : > { %v7465_v30 = vadd.f32 1.0, %v5116_v63  ;;  %5125 = vrcp.f32 %v7433_v28  ;;  %v7479_v7 = vpop.f32.mrf.mxu2  ;;  %v3369_v23 = vadd.f32 %v7343_v8, %v7201_v37  ;;  %v7488_v15 = vpop.eup %5117  ;;  %v3931_v45 = vsub.f32 1.0, %v3930_v29  ;;  %v4301_v63 = vld [vmem:[%s7471_s23] sm:$0xff] }
 0x2f0   : > { %v3993_v34 = vsub.f32 0.0, %v3753_v16  ;;  %v7481_v58 = vpop.f32.mrf.mxu3  ;;  %v3994_v24 = vsub.f32 0.0, %v3754_v2  ;;  %v3882_v33 = vsel %vm7407_vm2, %v7380_v42, %v3877_v0  ;;  %v3897_v16 = vsel %vm7411_vm3, %v7394_v17, %v3892_v54 }
 0x2f1   : > { %v3946_v21 = vsub.f32 1.0, %v3945_v56  ;;  %v3970_v2 = vand.u32 2147483648, %v7402_v59  ;;  %5127 = vrcp.f32 %v7465_v30  ;;  %v3370_v17 = vadd.f32 %v7345_v52, %v7203_v35 }
 0x2f2   : > { %v5120_v8 = vpop.eup %5119  ;;  %v4005_v32 = vmul.f32 1.442695, %v3993_v34  ;;  %v3985_v29 = vand.u32 2147483648, %v7426_v57  ;;  %v4007_v0 = vmul.f32 1.442695, %v3994_v24  ;;  %v7514_v56 = vmul.f32 %v4301_v63, %v3882_v33 }
 0x2f3   : > { %v5122_v42 = vpop.eup %5121  ;;  %v7516_v54 = vmul.f32 %v4302_v22, %v3897_v16  ;;  %v7523_v9 = vadd.f32 1.0, %v5120_v8  ;;  %v7527_v52 = vadd.f32 %v7391_v3, %v3917_v10  ;;  %v7538_v34 = vmul.f32 %v7422_v38, %v3946_v21 }
 0x2f4   : > { %v7511_v11 = vpop.eup %5123  ;;  %v7540_v24 = vor.u32 1.1754944e-38, %v3970_v2  ;;  %5129 = vpow2.f32 %v4005_v32  ;;  %v7555_v63 = vor.u32 1.1754944e-38, %v3985_v29  ;;  %v3372_v2 = vadd.f32 %v7389_v48, %v7221_v49 }
 0x2f5   : > { %v3649_v18 = vpop.f32.mrf.mxu0  ;;  %v3714_v36 = vpop.f32.mrf.mxu1  ;;  %v3975_v33 = vmul.f32 %v7511_v11, %v7426_v57  ;;  %5131 = vpow2.f32 %v4007_v0  ;;  %v3912_v32 = vsel %vm7499_vm9, %v7405_v43, %v3907_v5  ;;  %v3923_v37 = vand.u32 2147483647, %v7349_v20 }
 0x2f6   : > { %v3755_v31 = vadd.f32 %v3649_v18, %v3367_v50  ;;  %v7518_v46 = vpop.eup %5125  ;;  %v7521_v50 = vmul.f32 %v7416_v41, %v3931_v45  ;;  %v3756_v35 = vadd.f32 %v3714_v36, %v7429_v60  ;;  %8384 = vst [vmem:[#allocation26_spill] sm:$0xff] %v7540_v24  ;;  %v7542_v18 = vadd.f32 1.0, %v5122_v42 }
 0x2f7   : > { %v3960_v60 = vmul.f32 %v7488_v15, %v7402_v59  ;;  %v3371_v36 = vadd.f32 %v7387_v39, %v7219_v25  ;;  %v7551_v10 = vpop.eup %5127  ;;  %8385 = vst [vmem:[#allocation27_spill] sm:$0xff] %v7555_v63  ;;  %v4022_v16 = vmul.f32 %v7518_v46, %v7433_v28  ;;  %5133 = vrcp.f32 %v7523_v9  ;;  %v7560_v39 = vpop.f32.mrf.mxu2 }
 0x2f8   : > { %v3995_v45 = vsub.f32 0.0, %v3755_v31  ;;  %v3996_v25 = vsub.f32 0.0, %v3756_v35  ;;  %5135 = vrcp.f32 %v7542_v18  ;;  %v7565_v42 = vpop.f32.mrf.mxu3  ;;  %v4037_v49 = vmul.f32 %v7551_v10, %v7465_v30 }
 0x2f9   : > { %v3976_v0 = vsub.f32 1.0, %v3975_v33  ;;  %v4023_v35 = vsub.f32 1.0, %v4022_v16  ;;  %v4030_v16 = vand.u32 2147483647, %v7433_v28  ;;  %vm4041_vm14 = vweird.f32 %v7465_v30 }
 0x2fa   : > { %v4009_v31 = vmul.f32 1.442695, %v3995_v45  ;;  %v5130_v53 = vpop.eup %5129  ;;  %v4011_v45 = vmul.f32 1.442695, %v3996_v25  ;;  %v4038_v25 = vsub.f32 1.0, %v4037_v49  ;;  %vm4027_vm0 = vweird.f32 %v7518_v46 }
 0x2fb   : > { %vm7617_vm15 = vcmp.eq.f32.partialorder %v4030_v16, 8.507059e+37  ;;  %vm7631_vm1 = vcmp.eq.f32.partialorder %v3923_v37, 8.507059e+37  ;;  %vm4042_vm2 = vweird.f32 %v7551_v10  ;;  %vm7650_vm3 = vmor %vm4026_vm13, %vm4027_vm0  ;;  %vm4056_vm5 = vweird.f32 %v7523_v9 }
 0x2fc   : > { %5137 = vpow2.f32 %v4009_v31  ;;  %vm7678_vm6 = vmor %vm4041_vm14, %vm4042_vm2  ;;  %vm3935_vm10 = vweird.f32 %v7416_v41  ;;  %vm3934_vm13 = vweird.f32 %v7364_v13 }
 0x2fd   : > { %v3652_v22 = vpop.f32.mrf.mxu0  ;;  %v3717_v8 = vpop.f32.mrf.mxu1 }
 0x2fe   : > { %v3757_v4 = vadd.f32 %v3652_v22, %v3369_v23  ;;  %v3758_v21 = vadd.f32 %v3717_v8, %v3370_v17  ;;  %v3961_v17 = vsub.f32 1.0, %v3960_v60  ;;  %v7586_v22 = vmul.f32 %v4303_v61, %v3912_v32  ;;  %v5132_v8 = vpop.eup %5131 }
 0x2ff   : > { %v3374_v32 = vadd.f32 %v7481_v58, %v7239_v51  ;;  %v4045_v60 = vand.u32 2147483647, %v7465_v30  ;;  %v7615_v58 = vadd.f32 1.0, %v5132_v8 }
 0x300   : > { %v4141_v48 = vsub.f32 0.0, %v3757_v4  ;;  %v4142_v29 = vsub.f32 0.0, %v3758_v21  ;;  %v7591_v4 = vadd.f32 %v7479_v7, %v7237_v44  ;;  %v7595_v21 = vpop.eup %5133  ;;  %v7598_v20 = vmul.f32 %v7488_v15, %v3961_v17 }
 0x301   : > { %v7602_v61 = vpop.eup %5135  ;;  %v7605_v44 = vmul.f32 %v7511_v11, %v3976_v0  ;;  %v7610_v17 = vadd.f32 1.0, %v5130_v53  ;;  %v4052_v51 = vmul.f32 %v7595_v21, %v7523_v9  ;;  %vm7666_vm4 = vcmp.eq.f32.partialorder %v4045_v60, 8.507059e+37 }
 0x302   : > { %v4149_v5 = vmul.f32 1.442695, %v4141_v48  ;;  %v4151_v33 = vmul.f32 1.442695, %v4142_v29  ;;  %v4024_v48 = vmul.f32 %v7518_v46, %v4023_v35  ;;  %v4032_v29 = vand.u32 2147483648, %v7433_v28 }
 0x303   : > { %8388 = vst [vmem:[#allocation36_spill] sm:$0xff] %v7605_v44  ;;  %v4047_v35 = vand.u32 2147483648, %v7465_v30  ;;  %v4067_v53 = vmul.f32 %v7602_v61, %v7542_v18  ;;  %v4062_v28 = vand.u32 2147483648, %v7523_v9  ;;  %vm4057_vm8 = vweird.f32 %v7595_v21 }
 0x304   : > { %5139 = vpow2.f32 %v4149_v5  ;;  %v4039_v5 = vmul.f32 %v7551_v10, %v4038_v25  ;;  %v4025_v8 = vadd.f32 %v7518_v46, %v4024_v48  ;;  %v3375_v25 = vadd.f32 %v7560_v39, %v7255_v27  ;;  %vm7740_vm11 = vmor %vm4056_vm5, %vm4057_vm8 }
 0x305   : > { %v3655_v7 = vpop.f32.mrf.mxu0  ;;  %v3720_v31 = vpop.f32.mrf.mxu1  ;;  %5141 = vpow2.f32 %v4011_v45  ;;  %v7642_v48 = vadd.f32 %v7565_v42, %v7257_v62  ;;  %v4063_v0 = vor.u32 1.1754944e-38, %v4062_v28  ;;  %vm4072_vm9 = vweird.f32 %v7602_v61 }
 0x306   : > { %v3759_v49 = vadd.f32 %v3655_v7, %v3371_v36  ;;  %v3760_v43 = vadd.f32 %v3720_v31, %v3372_v2  ;;  %5143 = vpow2.f32 %v4151_v33  ;;  %v7624_v45 = vpop.f32.mrf.mxu2  ;;  %v5138_v7 = vpop.eup %5137  ;;  %v4033_v33 = vor.u32 1.1754944e-38, %v4032_v29 }
 0x307   : > { %v7627_v31 = vpop.f32.mrf.mxu3  ;;  %5145 = vrcp.f32 %v7610_v17  ;;  %v4068_v29 = vsub.f32 1.0, %v4067_v53  ;;  %v7644_v24 = vadd.f32 1.0, %v5138_v7  ;;  %v4060_v53 = vand.u32 2147483647, %v7523_v9 }
 0x308   : > { %v4143_v36 = vsub.f32 0.0, %v3759_v49  ;;  %v4144_v2 = vsub.f32 0.0, %v3760_v43  ;;  %v4053_v43 = vsub.f32 1.0, %v4052_v51  ;;  %5147 = vrcp.f32 %v7615_v58 }
 0x309   : > { %8393 = vst [vmem:[#allocation37_spill] sm:$0xff] %v7644_v24  ;;  %v4069_v30 = vmul.f32 %v7602_v61, %v4068_v29  ;;  %vm7698_vm7 = vcmp.eq.f32.partialorder %v4060_v53, 8.507059e+37  ;;  %v4075_v29 = vand.u32 2147483647, %v7542_v18 }
 0x30a   : > { %v5140_v63 = vpop.eup %5139  ;;  %v4153_v44 = vmul.f32 1.442695, %v4143_v36  ;;  %v4155_v49 = vmul.f32 1.442695, %v4144_v2  ;;  %v7655_v36 = vadd.f32 %v7551_v10, %v4039_v5  ;;  %v4048_v5 = vor.u32 1.1754944e-38, %v4047_v35 }
 0x30b   : > { %v5142_v37 = vpop.eup %5141  ;;  %v7657_v39 = vadd.f32 1.0, %v5140_v63  ;;  %v4054_v60 = vmul.f32 %v7595_v21, %v4053_v43 }
 0x30c   : > { %5149 = vpow2.f32 %v4153_v44  ;;  %v5144_v27 = vpop.eup %5143  ;;  %v4029_v44 = vsel %vm7650_vm3, %v7518_v46, %v4025_v8  ;;  %v7671_v63 = vadd.f32 1.0, %v5142_v37  ;;  %v4077_v46 = vand.u32 2147483648, %v7542_v18 }
 0x30d   : > { %v3658_v62 = vpop.f32.mrf.mxu0  ;;  %v3723_v42 = vpop.f32.mrf.mxu1  ;;  %v7664_v2 = vadd.f32 1.0, %v5144_v27  ;;  %5151 = vpow2.f32 %v4155_v49  ;;  %v7688_v35 = vsel %vm7617_vm15, %v4033_v33, %v4029_v44  ;;  %v4055_v44 = vadd.f32 %v7595_v21, %v4054_v60 }
 0x30e   : > { %8398 = vst [vmem:[#allocation43_spill] sm:$0xff] %v7671_v63  ;;  %v3761_v55 = vadd.f32 %v3658_v62, %v7591_v4  ;;  %v3762_v51 = vadd.f32 %v3723_v42, %v3374_v32  ;;  %v7683_v8 = vpop.eup %5145  ;;  %5153 = vrcp.f32 %v7644_v24  ;;  %v4044_v4 = vsel %vm7678_vm6, %v7551_v10, %v7655_v36  ;;  %v3279_v27 = vpop.f32.mrf.mxu2 }
 0x30f   : > { %v7695_v32 = vpop.eup %5147  ;;  %5155 = vrcp.f32 %v7657_v39  ;;  %v8403_v10 = vsel %vm7575_vm12, %v7391_v3, %v7527_v52  ;;  %v3344_v62 = vpop.f32.mrf.mxu3  ;;  %v7719_v23 = vmul.f32 %v7683_v8, %v7610_v17  ;;  %v3377_v52 = vadd.f32 %v7624_v45, %v7268_v12 }
 0x310   : > { %v4145_v49 = vsub.f32 0.0, %v3761_v55  ;;  %v4146_v43 = vsub.f32 0.0, %v3762_v51  ;;  %5157 = vrcp.f32 %v7664_v2  ;;  %v3927_v55 = vsel %vm7631_vm1, %v7424_v26, %v8403_v10  ;;  %v4304_v10 = vld [vmem:[%s7471_s23 + $0x18] sm:$0xff]  ;;  %vm7832_vm1 = vmor %vm3934_vm13, %vm3935_vm10 }
 0x311   : > { %5159 = vrcp.f32 %v7671_v63  ;;  %v7723_v3 = vmul.f32 %v7695_v32, %v7615_v58  ;;  %v4070_v26 = vadd.f32 %v7602_v61, %v4069_v30  ;;  %vm4071_vm12 = vweird.f32 %v7542_v18 }
 0x312   : > { %v5150_v33 = vpop.eup %5149  ;;  %v4157_v42 = vmul.f32 1.442695, %v4145_v49  ;;  %v4159_v16 = vmul.f32 1.442695, %v4146_v43  ;;  %v3378_v43 = vadd.f32 %v7627_v31, %v7270_v40  ;;  %v4059_v9 = vsel %vm7740_vm11, %v7595_v21, %v4055_v44  ;;  %vm7759_vm14 = vmor %vm4071_vm12, %vm4072_vm9 }
 0x313   : > { %v7714_v36 = vadd.f32 1.0, %v5150_v33  ;;  %v5152_v53 = vpop.eup %5151  ;;  %vm7763_vm15 = vcmp.eq.f32.partialorder %v4075_v29, 8.507059e+37  ;;  %v4074_v21 = vsel %vm7759_vm14, %v7602_v61, %v4070_v26  ;;  %v7790_v12 = vmul.f32 %v4304_v10, %v3927_v55 }
 0x314   : > { %v7732_v60 = vpop.eup %5153  ;;  %v7734_v49 = vadd.f32 1.0, %v5152_v53  ;;  %v7784_v53 = vadd.f32 %v3344_v62, %v7283_v1  ;;  %v4184_v55 = vand.u32 2147483648, %v7657_v39  ;;  %v8413_v33 = vand.u32 2147483647, %v7364_v13 }
 0x315   : > { %5161 = vrcp.f32 %v7714_v36  ;;  %v3661_v28 = vpop.f32.mrf.mxu0  ;;  %v3726_v51 = vpop.f32.mrf.mxu1  ;;  %8404 = vst [vmem:[#allocation44_spill] sm:$0xff] %v7732_v60  ;;  %v7803_v37 = vmul.f32 %v7732_v60, %v7644_v24  ;;  %vm4178_vm2 = vweird.f32 %v7657_v39  ;;  %vm4193_vm3 = vweird.f32 %v7664_v2 }
 0x316   : > { %5163 = vpow2.f32 %v4157_v42  ;;  %v3763_v30 = vadd.f32 %v3661_v28, %v3375_v25  ;;  %v7745_v45 = vpop.eup %5155  ;;  %v7752_v25 = vsel %vm7666_vm4, %v4048_v5, %v4044_v4  ;;  %v7779_v4 = vadd.f32 %v3279_v27, %v7281_v6  ;;  %v3282_v62 = vpop.f32.mrf.mxu2 }
 0x317   : > { %v7768_v40 = vpop.eup %5157  ;;  %5165 = vrcp.f32 %v7734_v49  ;;  %v4078_v42 = vor.u32 1.1754944e-38, %v4077_v46  ;;  %v4174_v44 = vmul.f32 %v7745_v45, %v7657_v39  ;;  %v7788_v28 = vsel %vm7698_vm7, %v4063_v0, %v4059_v9 }
 0x318   : > { %v7776_v5 = vpop.eup %5159  ;;  %5167 = vpow2.f32 %v4159_v16  ;;  %v4147_v29 = vsub.f32 0.0, %v3763_v30  ;;  %v4189_v6 = vmul.f32 %v7768_v40, %v7664_v2  ;;  %v3764_v26 = vadd.f32 %v3726_v51, %v7642_v48  ;;  %v3347_v30 = vpop.f32.mrf.mxu3 }
 0x319   : > { %8411 = vst [vmem:[#allocation7_spill] sm:$0xff] %v7776_v5  ;;  %v7799_v16 = vsel %vm7763_vm15, %v4078_v42, %v4074_v21  ;;  %v7807_v0 = vmul.f32 %v7776_v5, %v7671_v63  ;;  %v3933_v46 = vadd.f32 %v7416_v41, %v7521_v50  ;;  %v4182_v48 = vand.u32 2147483647, %v7657_v39 }
 0x31a   : > { %v4161_v27 = vmul.f32 1.442695, %v4147_v29  ;;  %vm7817_vm0 = vcmp.eq.f32.partialorder %v8413_v33, 8.507059e+37  ;;  %v4175_v29 = vsub.f32 1.0, %v4174_v44  ;;  %v4199_v42 = vand.u32 2147483648, %v7664_v2 }
 0x31b   : > { %v7792_v61 = vpop.eup %5161  ;;  %8412 = vst [vmem:[#allocation8_spill] sm:$0xff] %v7807_v0  ;;  %v4190_v31 = vsub.f32 1.0, %v4189_v6  ;;  %v4148_v33 = vsub.f32 0.0, %v3764_v26  ;;  %v7839_v6 = vor.u32 1.1754944e-38, %v4184_v55  ;;  %v3937_v44 = vsel %vm7832_vm1, %v7416_v41, %v3933_v46 }
 0x31c   : > { %v5164_v1 = vpop.eup %5163  ;;  %5169 = vpow2.f32 %v4161_v27  ;;  %v4204_v63 = vmul.f32 %v7792_v61, %v7714_v36  ;;  %v4197_v27 = vand.u32 2147483647, %v7664_v2  ;;  %v7852_v5 = vadd.f32 %v3282_v62, %v7294_v47 }
 0x31d   : > { %v7813_v51 = vadd.f32 1.0, %v5164_v1  ;;  %v3664_v9 = vpop.f32.mrf.mxu0  ;;  %v7822_v21 = vpop.eup %5165  ;;  %v7855_v55 = vadd.f32 %v3347_v30, %v7296_v14  ;;  %v4191_v0 = vmul.f32 %v7768_v40, %v4190_v31  ;;  %v7858_v24 = vor.u32 1.1754944e-38, %v4199_v42 }
 0x31e   : > { %v3765_v50 = vadd.f32 %v3664_v9, %v3377_v52  ;;  %v3729_v7 = vpop.f32.mrf.mxu1  ;;  %v5168_v1 = vpop.eup %5167  ;;  %v4219_v26 = vmul.f32 %v7822_v21, %v7734_v49  ;;  %v4176_v52 = vmul.f32 %v7745_v45, %v4175_v29  ;;  %v4163_v60 = vmul.f32 1.442695, %v4148_v33 }
 0x31f   : > { %5171 = vrcp.f32 %v7813_v51  ;;  %v7845_v13 = vadd.f32 1.0, %v5168_v1  ;;  %v3766_v9 = vadd.f32 %v3729_v7, %v3378_v43  ;;  %v4205_v1 = vsub.f32 1.0, %v4204_v63  ;;  %v3285_v33 = vpop.f32.mrf.mxu2 }
 0x320   : > { %5173 = vtanh.f32 %v3765_v50  ;;  %vm4179_vm4 = vweird.f32 %v7745_v45  ;;  %v4214_v41 = vand.u32 2147483648, %v7714_v36  ;;  %v7866_v47 = vsel %vm7817_vm0, %v7484_v19, %v3937_v44 }
 0x321   : > { %5175 = vrcp.f32 %v7845_v13  ;;  %vm7870_vm5 = vcmp.eq.f32.partialorder %v4182_v48, 8.507059e+37  ;;  %vm7874_vm6 = vcmp.eq.f32.partialorder %v4197_v27, 8.507059e+37  ;;  %v4212_v7 = vand.u32 2147483647, %v7714_v36  ;;  %vm7901_vm11 = vmor %vm4178_vm2, %vm4179_vm4 }
 0x322   : > { %v5170_v43 = vpop.eup %5169  ;;  %v4220_v62 = vsub.f32 1.0, %v4219_v26  ;;  %5177 = vtanh.f32 %v3766_v9  ;;  %v8422_v30 = vsub.f32 1.0, %v7719_v23  ;;  %v4177_v18 = vadd.f32 %v7745_v45, %v4176_v52  ;;  %v3350_v23 = vpop.f32.mrf.mxu3 }
 0x323   : > { %vm4194_vm7 = vweird.f32 %v7768_v40  ;;  %v4229_v48 = vand.u32 2147483648, %v7734_v49  ;;  %v4192_v29 = vadd.f32 %v7768_v40, %v4191_v0  ;;  %v4206_v42 = vmul.f32 %v7792_v61, %v4205_v1 }
 0x324   : > { %v4084_v19 = vmul.f32 %v7683_v8, %v8422_v30  ;;  %v4227_v50 = vand.u32 2147483647, %v7734_v49  ;;  %5179 = vpow2.f32 %v4163_v60  ;;  %vm4208_vm8 = vweird.f32 %v7714_v36  ;;  %vm7917_vm12 = vmor %vm4193_vm3, %vm4194_vm7 }
 0x325   : > { %v7868_v14 = vpop.eup %5171  ;;  %v3667_v46 = vpop.f32.mrf.mxu0  ;;  %v7891_v52 = vor.u32 1.1754944e-38, %v4214_v41  ;;  %vm4223_vm9 = vweird.f32 %v7734_v49  ;;  %v7894_v27 = vadd.f32 1.0, %v5170_v43  ;;  %vm4087_vm10 = vweird.f32 %v7683_v8 }
 0x326   : > { %v4234_v10 = vmul.f32 %v7868_v14, %v7813_v51  ;;  %v5174_v44 = vpop.eup %5173  ;;  %v4221_v60 = vmul.f32 %v7822_v21, %v4220_v62  ;;  %v3767_v1 = vadd.f32 %v3667_v46, %v7779_v4  ;;  %v3732_v43 = vpop.f32.mrf.mxu1  ;;  %v4181_v30 = vsel %vm7901_vm11, %v7745_v45, %v4177_v18  ;;  %v8429_v62 = vld [vmem:[#allocation16_spill] sm:$0xff] }
 0x327   : > { %v4317_v9 = vmul.f32 %v5174_v44, %v7688_v35  ;;  %v7908_v41 = vpop.eup %5175  ;;  %vm7921_vm13 = vcmp.eq.f32.partialorder %v4212_v7, 8.507059e+37  ;;  %v4230_v4 = vor.u32 1.1754944e-38, %v4229_v48  ;;  %v7926_v46 = vadd.f32 %v3285_v33, %v8429_v62 }
 0x328   : > { %v4235_v26 = vsub.f32 1.0, %v4234_v10  ;;  %v8430_v10 = vld [vmem:[#allocation34_spill] sm:$0xff]  ;;  %vm4086_vm14 = vweird.f32 %v7610_v17  ;;  %v5178_v45 = vpop.eup %5177  ;;  %v4196_v2 = vsel %vm7917_vm12, %v7768_v40, %v4192_v29  ;;  %v4207_v18 = vadd.f32 %v7792_v61, %v4206_v42 }
 0x329   : > { %v7929_v44 = vadd.f32 %v3350_v23, %v8430_v10  ;;  %vm4209_vm15 = vweird.f32 %v7792_v61  ;;  %vm4224_vm0 = vweird.f32 %v7822_v21  ;;  %vm7938_vm1 = vcmp.eq.f32.partialorder %v4227_v50, 8.507059e+37 }
 0x32a   : > { %5181 = vrcp.f32 %v7894_v27  ;;  %v4325_v40 = vadd.f32 %v4317_v9, %v7514_v56  ;;  %v4318_v48 = vmul.f32 %v5178_v45, %v7752_v25  ;;  %v3768_v29 = vadd.f32 %v3732_v43, %v7784_v53  ;;  %v5180_v42 = vpop.eup %5179  ;;  %vm7970_vm3 = vmor %vm4208_vm8, %vm4209_vm15 }
 0x32b   : > { %v4222_v50 = vadd.f32 %v7822_v21, %v4221_v60  ;;  %v4236_v33 = vmul.f32 %v7868_v14, %v4235_v26  ;;  %v4249_v23 = vmul.f32 %v7908_v41, %v7845_v13  ;;  %5183 = vtanh.f32 %v3767_v1  ;;  %vm7984_vm4 = vmor %vm4223_vm9, %vm4224_vm0 }
 0x32c   : > { %v4186_v39 = vsel %vm7870_vm5, %v7839_v6, %v4181_v30  ;;  %v4201_v56 = vsel %vm7874_vm6, %v7858_v24, %v4196_v2  ;;  %v4242_v25 = vand.u32 2147483647, %v7813_v51  ;;  %v4244_v53 = vand.u32 2147483648, %v7813_v51  ;;  %4357 = vst [vmem:[%s7946_s13] sm:$0xff] %v4325_v40  ;;  %vm8015_vm9 = vmor %vm4086_vm14, %vm4087_vm10 }
 0x32d   : > { %v3670_v0 = vpop.f32.mrf.mxu0  ;;  %vm3950_vm2 = vweird.f32 %v7422_v38  ;;  %5185 = vtanh.f32 %v4325_v40  ;;  %v4326_v6 = vadd.f32 %v4318_v48, %v7516_v54  ;;  %v4085_v31 = vadd.f32 %v7683_v8, %v4084_v19  ;;  %v8437_v54 = vld [vmem:[#allocation17_spill] sm:$0xff]  ;;  %v4305_v40 = vld [vmem:[%s7471_s23 + $0x20] sm:$0xff] }
 0x32e   : > { %v3769_v24 = vadd.f32 %v3670_v0, %v7852_v5  ;;  %v4211_v63 = vsel %vm7970_vm3, %v7792_v61, %v4207_v18  ;;  %vm4239_vm5 = vweird.f32 %v7868_v14  ;;  %v7989_v26 = vadd.f32 1.0, %v5180_v42  ;;  %v3735_v45 = vpop.f32.mrf.mxu1 }
 0x32f   : > { %5187 = vtanh.f32 %v3768_v29  ;;  %vm3949_vm6 = vweird.f32 %v8437_v54  ;;  %v4226_v5 = vsel %vm7984_vm4, %v7822_v21, %v4222_v50  ;;  %v4237_v61 = vadd.f32 %v7868_v14, %v4236_v33  ;;  %4358 = vst [vmem:[%s7946_s13 + $0x8] sm:$0xff] %v4326_v6 }
 0x330   : > { %v4250_v19 = vsub.f32 1.0, %v4249_v23  ;;  %5189 = vtanh.f32 %v4326_v6  ;;  %v7997_v49 = vpop.eup %5181  ;;  %vm4238_vm7 = vweird.f32 %v7813_v51  ;;  %vm8000_vm8 = vcmp.eq.f32.partialorder %v4242_v25, 8.507059e+37  ;;  %vm8082_vm15 = vmor %vm3949_vm6, %vm3950_vm2 }
 0x331   : > { %v4245_v1 = vor.u32 1.1754944e-38, %v4244_v53  ;;  %v4257_v43 = vand.u32 2147483647, %v7845_v13  ;;  %v5184_v30 = vpop.eup %5183  ;;  %v8008_v21 = vsel %vm7921_vm13, %v7891_v52, %v4211_v63  ;;  %v4259_v62 = vand.u32 2147483648, %v7845_v13  ;;  %vm8027_vm12 = vmor %vm4238_vm7, %vm4239_vm5 }
 0x332   : > { %v4092_v10 = vand.u32 2147483648, %v7610_v17  ;;  %5191 = vtanh.f32 %v3769_v24  ;;  %vm3965_vm11 = vweird.f32 %v7488_v15  ;;  %v8023_v52 = vsel %vm7938_vm1, %v4230_v4, %v4226_v5 }
 0x333   : > { %5193 = vrcp.f32 %v7989_v26  ;;  %v4319_v2 = vmul.f32 %v5184_v30, %v7788_v28  ;;  %v4089_v18 = vsel %vm8015_vm9, %v7683_v8, %v4085_v31  ;;  %v5186_v48 = vpop.eup %5185  ;;  %v4241_v4 = vsel %vm8027_vm12, %v7868_v14, %v4237_v61  ;;  %v8457_v28 = vld [vmem:[#allocation37_spill] sm:$0xff] }
 0x334   : > { %v4251_v7 = vmul.f32 %v7908_v41, %v4250_v19  ;;  %v8444_v29 = vand.u32 2147483647, %v7610_v17  ;;  %v8447_v8 = vsub.f32 1.0, %v7723_v3  ;;  %vm3964_vm13 = vweird.f32 %v7402_v59 }
 0x335   : > { %v5188_v50 = vpop.eup %5187  ;;  %v8059_v14 = vmul.f32 %v7997_v49, %v7894_v27  ;;  %v4341_v33 = vmul.f32 %v5186_v48, %v4186_v39  ;;  %v4327_v17 = vadd.f32 %v4319_v2, %v7586_v22  ;;  %v3770_v23 = vadd.f32 %v3735_v45, %v7855_v55 }
 0x336   : > { %vm8049_vm10 = vcmp.eq.f32.partialorder %v8444_v29, 8.507059e+37  ;;  %v4099_v42 = vmul.f32 %v7695_v32, %v8447_v8  ;;  %v5190_v0 = vpop.eup %5189  ;;  %v4320_v25 = vmul.f32 %v5188_v50, %v7799_v16  ;;  %v4093_v53 = vor.u32 1.1754944e-38, %v4092_v10  ;;  %v8453_v10 = vld [vmem:[#allocation44_spill] sm:$0xff] }
 0x337   : > { %v4313_v3 = vmul.f32 %v4305_v40, %v7866_v47  ;;  %v3948_v60 = vadd.f32 %v7422_v38, %v7538_v34  ;;  %4349 = vst [vmem:[%s8045_s16] sm:$0xff] %v4341_v33  ;;  %v4342_v6 = vmul.f32 %v5190_v0, %v4201_v56  ;;  %5195 = vtanh.f32 %v4327_v17  ;;  %v3673_v34 = vpop.f32.mrf.mxu0 }
 0x338   : > { %v4100_v24 = vadd.f32 %v7695_v32, %v4099_v42  ;;  %vm4102_vm14 = vweird.f32 %v7695_v32  ;;  %v5192_v22 = vpop.eup %5191  ;;  %4359 = vst [vmem:[%s7946_s13 + $0x10] sm:$0xff] %v4327_v17  ;;  %v4328_v55 = vadd.f32 %v4320_v25, %v7790_v12  ;;  %v4094_v16 = vsel %vm8049_vm10, %v4093_v53, %v4089_v18  ;;  %v8462_v25 = vld [vmem:[#allocation7_spill] sm:$0xff] }
 0x339   : > { %v3953_v47 = vand.u32 2147483647, %v8437_v54  ;;  %v4107_v39 = vand.u32 2147483648, %v7615_v58  ;;  %v8076_v31 = vpop.eup %5193  ;;  %4350 = vst [vmem:[%s8045_s16 + $0x8] sm:$0xff] %v4342_v6  ;;  %v4321_v12 = vmul.f32 %v5192_v22, %v4094_v16  ;;  %vm4101_vm0 = vweird.f32 %v7615_v58  ;;  %v8464_v22 = vld [vmem:[#allocation36_spill] sm:$0xff] }
 0x33a   : > { %v4105_v63 = vand.u32 2147483647, %v7615_v58  ;;  %5197 = vtanh.f32 %v3770_v23  ;;  %vm3980_vm1 = vweird.f32 %v7511_v11  ;;  %v4246_v36 = vsel %vm8000_vm8, %v4245_v1, %v4241_v4  ;;  %4360 = vst [vmem:[%s7946_s13 + $0x18] sm:$0xff] %v4328_v55  ;;  %vm8101_vm2 = vmor %vm4101_vm0, %vm4102_vm14  ;;  %v3738_v4 = vpop.f32.mrf.mxu1  ;;  %v8460_v23 = vld [vmem:[#allocation8_spill] sm:$0xff] }
 0x33b   : > { %v8093_v5 = vadd.f32 %v7908_v41, %v4251_v7  ;;  %5199 = vtanh.f32 %v4328_v55  ;;  %v3952_v54 = vsel %vm8082_vm15, %v7422_v38, %v3948_v60  ;;  %vm4254_vm3 = vweird.f32 %v7908_v41  ;;  %vm8126_vm8 = vmor %vm3964_vm13, %vm3965_vm11  ;;  %v8463_v60 = vld [vmem:[#allocation26_spill] sm:$0xff] }
 0x33c   : > { %v4329_v61 = vadd.f32 %v4321_v12, %v4313_v3  ;;  %v4104_v19 = vsel %vm8101_vm2, %v7695_v32, %v4100_v24  ;;  %v3771_v9 = vadd.f32 %v3673_v34, %v7926_v46  ;;  %v3963_v1 = vadd.f32 %v7488_v15, %v7598_v20  ;;  %v8454_v32 = vld [vmem:[#allocation35_spill] sm:$0xff]  ;;  %v4306_v20 = vld [vmem:[%s7471_s23 + $0x28] sm:$0xff]  ;;  %v4307_v24 = vld [vmem:[%s7471_s23 + $0x30] sm:$0xff] }
 0x33d   : > { %vm3979_vm4 = vweird.f32 %v7426_v57  ;;  %v4265_v38 = vsub.f32 1.0, %v8059_v14  ;;  %vm3954_vm5 = vcmp.eq.f32.partialorder %v3953_v47, 8.507059e+37  ;;  %v4108_v30 = vor.u32 1.1754944e-38, %v4107_v39  ;;  %v5196_v35 = vpop.eup %5195 }
 0x33e   : > { %v8452_v51 = vsub.f32 1.0, %v7803_v37  ;;  %vm4253_vm6 = vweird.f32 %v7845_v13  ;;  %5201 = vtanh.f32 %v4329_v61  ;;  %4361 = vst [vmem:[%s7946_s13 + $0x20] sm:$0xff] %v4329_v61  ;;  %v3957_v46 = vsel %vm3954_vm5, %v8454_v32, %v3952_v54  ;;  %vm8170_vm15 = vmor %vm3979_vm4, %vm3980_vm1  ;;  %v8467_v61 = vld [vmem:[#allocation43_spill] sm:$0xff] }
 0x33f   : > { %vm4106_vm7 = vcmp.eq.f32.partialorder %v4105_v63, 8.507059e+37  ;;  %v3968_v2 = vand.u32 2147483647, %v7402_v59  ;;  %v4343_v18 = vmul.f32 %v5196_v35, %v8008_v21  ;;  %vm4117_vm9 = vweird.f32 %v8453_v10  ;;  %vm8179_vm0 = vmor %vm4253_vm6, %vm4254_vm3  ;;  %v8472_v13 = vld [vmem:[#allocation27_spill] sm:$0xff] }
 0x340   : > { %v4114_v45 = vmul.f32 %v8453_v10, %v8452_v51  ;;  %v4109_v40 = vsel %vm4106_vm7, %v4108_v30, %v4104_v19  ;;  %v5198_v7 = vpop.eup %5197  ;;  %v3967_v29 = vsel %vm8126_vm8, %v7488_v15, %v3963_v1  ;;  %v4120_v8 = vand.u32 2147483647, %v8457_v28 }
 0x341   : > { %v4122_v59 = vand.u32 2147483648, %v8457_v28  ;;  %5203 = vtanh.f32 %v3771_v9  ;;  %v5200_v42 = vpop.eup %5199  ;;  %v4266_v21 = vmul.f32 %v7997_v49, %v4265_v38  ;;  %4351 = vst [vmem:[%s8045_s16 + $0x10] sm:$0xff] %v4343_v18  ;;  %v4314_v50 = vmul.f32 %v4306_v20, %v3957_v46 }
 0x342   : > { %v4115_v48 = vadd.f32 %v8453_v10, %v4114_v45  ;;  %v4322_v14 = vmul.f32 %v5198_v7, %v4109_v40  ;;  %vm4116_vm11 = vweird.f32 %v8457_v28  ;;  %v4344_v33 = vmul.f32 %v5200_v42, %v8023_v52  ;;  %v4308_v45 = vld [vmem:[%s7471_s23 + $0x38] sm:$0xff] }
 0x343   : > { %vm3969_vm12 = vcmp.eq.f32.partialorder %v3968_v2, 8.507059e+37  ;;  %vm8144_vm10 = vmor %vm4116_vm11, %vm4117_vm9  ;;  %v3772_v17 = vadd.f32 %v3738_v4, %v7929_v44  ;;  %v8461_v0 = vsub.f32 1.0, %v8460_v23  ;;  %v3978_v55 = vadd.f32 %v7511_v11, %v8464_v22 }
 0x344   : > { %v4330_v3 = vadd.f32 %v4322_v14, %v4314_v50  ;;  %v3972_v6 = vsel %vm3969_vm12, %v8463_v60, %v3967_v29  ;;  %v4119_v52 = vsel %vm8144_vm10, %v8453_v10, %v4115_v48  ;;  %v5202_v16 = vpop.eup %5201  ;;  %v4279_v47 = vmul.f32 %v8076_v31, %v7989_v26  ;;  %4352 = vst [vmem:[%s8045_s16 + $0x18] sm:$0xff] %v4344_v33 }
 0x345   : > { %v4129_v53 = vmul.f32 %v8462_v25, %v8461_v0  ;;  %vm4121_vm13 = vcmp.eq.f32.partialorder %v4120_v8, 8.507059e+37  ;;  %v4123_v44 = vor.u32 1.1754944e-38, %v4122_v59  ;;  %v3983_v39 = vand.u32 2147483647, %v7426_v57 }
 0x346   : > { %v4345_v34 = vmul.f32 %v5202_v16, %v4246_v36  ;;  %5205 = vtanh.f32 %v4330_v3  ;;  %4362 = vst [vmem:[%s7946_s13 + $0x28] sm:$0xff] %v4330_v3  ;;  %vm4132_vm14 = vweird.f32 %v8462_v25  ;;  %v4315_v58 = vmul.f32 %v4307_v24, %v3972_v6 }
 0x347   : > { %v4130_v56 = vadd.f32 %v8462_v25, %v4129_v53  ;;  %v5204_v12 = vpop.eup %5203  ;;  %v4124_v54 = vsel %vm4121_vm13, %v4123_v44, %v4119_v52  ;;  %v4137_v19 = vand.u32 2147483648, %v8467_v61  ;;  %5207 = vtanh.f32 %v3772_v17 }
 0x348   : > { %4353 = vst [vmem:[%s8045_s16 + $0x20] sm:$0xff] %v4345_v34  ;;  %v4323_v9 = vmul.f32 %v5204_v12, %v4124_v54  ;;  %v3982_v57 = vsel %vm8170_vm15, %v7511_v11, %v3978_v55  ;;  %vm4131_vm1 = vweird.f32 %v8467_v61  ;;  %v4135_v1 = vand.u32 2147483647, %v8467_v61 }
 0x349   : > { %v4256_v38 = vsel %vm8179_vm0, %v7908_v41, %v8093_v5  ;;  %vm4258_vm2 = vcmp.eq.f32.partialorder %v4257_v43, 8.507059e+37  ;;  %v4260_v30 = vor.u32 1.1754944e-38, %v4259_v62  ;;  %v4280_v51 = vsub.f32 1.0, %v4279_v47  ;;  %vm8199_vm3 = vmor %vm4131_vm1, %vm4132_vm14 }
 0x34a   : > { %vm4268_vm4 = vweird.f32 %v7894_v27  ;;  %v4331_v10 = vadd.f32 %v4323_v9, %v4315_v58  ;;  %vm3984_vm5 = vcmp.eq.f32.partialorder %v3983_v39, 8.507059e+37  ;;  %v4134_v41 = vsel %vm8199_vm3, %v8462_v25, %v4130_v56 }
 0x34b   : > { %v4267_v43 = vadd.f32 %v7997_v49, %v4266_v21  ;;  %vm4269_vm6 = vweird.f32 %v7997_v49  ;;  %v3987_v62 = vsel %vm3984_vm5, %v8472_v13, %v3982_v57  ;;  %v4138_v5 = vor.u32 1.1754944e-38, %v4137_v19 }
 0x34c   : > { %v5206_v35 = vpop.eup %5205  ;;  %v4261_v32 = vsel %vm4258_vm2, %v4260_v30, %v4256_v38  ;;  %v4274_v46 = vand.u32 2147483648, %v7894_v27  ;;  %5209 = vtanh.f32 %v4331_v10  ;;  %4363 = vst [vmem:[%s7946_s13 + $0x30] sm:$0xff] %v4331_v10  ;;  %vm4136_vm7 = vcmp.eq.f32.partialorder %v4135_v1, 8.507059e+37  ;;  %vm4270_vm8 = vmor %vm4268_vm4, %vm4269_vm6 }
 0x34d   : > { %v5208_v20 = vpop.eup %5207  ;;  %v4272_v2 = vand.u32 2147483647, %v7894_v27  ;;  %v4281_v37 = vmul.f32 %v8076_v31, %v4280_v51  ;;  %v4346_v18 = vmul.f32 %v5206_v35, %v4261_v32  ;;  %v4139_v40 = vsel %vm4136_vm7, %v4138_v5, %v4134_v41 }
 0x34e   : > { %v4316_v48 = vmul.f32 %v4308_v45, %v3987_v62  ;;  %v4324_v4 = vmul.f32 %v5208_v20, %v4139_v40  ;;  %v4271_v7 = vsel %vm4270_vm8, %v7997_v49, %v4267_v43  ;;  %v4275_v29 = vor.u32 1.1754944e-38, %v4274_v46 }
 0x34f   : > { %4354 = vst [vmem:[%s8045_s16 + $0x28] sm:$0xff] %v4346_v18  ;;  %vm4273_vm9 = vcmp.eq.f32.partialorder %v4272_v2, 8.507059e+37  ;;  %v4282_v8 = vadd.f32 %v8076_v31, %v4281_v37  ;;  %vm4284_vm11 = vweird.f32 %v8076_v31  ;;  %v4289_v21 = vand.u32 2147483648, %v7989_v26 }
 0x350   : > { %v4332_v28 = vadd.f32 %v4324_v4, %v4316_v48  ;;  %v4276_v42 = vsel %vm4273_vm9, %v4275_v29, %v4271_v7  ;;  %vm4283_vm12 = vweird.f32 %v7989_v26  ;;  %v4287_v27 = vand.u32 2147483647, %v7989_v26 }
 0x351   : > { %vm4285_vm10 = vmor %vm4283_vm12, %vm4284_vm11  ;;  %v4290_v14 = vor.u32 1.1754944e-38, %v4289_v21 }
 0x352   : > { %v5210_v59 = vpop.eup %5209  ;;  %5211 = vtanh.f32 %v4332_v28  ;;  %4364 = vst [vmem:[%s7946_s13 + $0x38] sm:$0xff] %v4332_v28  ;;  %v4286_v50 = vsel %vm4285_vm10, %v8076_v31, %v4282_v8  ;;  %vm4288_vm13 = vcmp.eq.f32.partialorder %v4287_v27, 8.507059e+37 }
 0x353   : > { %v4347_v49 = vmul.f32 %v5210_v59, %v4276_v42  ;;  %v4291_v15 = vsel %vm4288_vm13, %v4290_v14, %v4286_v50 }
 0x355   : > { %4355 = vst [vmem:[%s8045_s16 + $0x30] sm:$0xff] %v4347_v49 }
 0x358   : > { %v5212_v33 = vpop.eup %5211 }
 0x359   : > { %v4348_v17 = vmul.f32 %v5212_v33, %v4291_v15 }
 0x35b   : > { %4356 = vst [vmem:[%s8045_s16 + $0x38] sm:$0xff] %v4348_v17 }
 0x35c PF: > { %s16_s18 = sadd.s32 1, %s5219_s18  }
 0x35d   : > { %p13_p4 = scmp.ge.s32.totalorder %s16_s18, 4  }
 0x35f   :  { %15 = sbr.rel (!%p13_p4) target bundleno = 1 (0x1), region = 89 }

</bundles_post_ra>
